<compile_context>
chip_gen: v7x
topology: tpu7x:2x2x1
jax: 0.10.0
libtpu: 0.0.40
codegen_flags: <defaults>
</compile_context>

<pallas_src>
import functools

import jax
import jax.numpy as jnp
from jax.experimental import pallas as pl
from jax.experimental.pallas import tpu as pltpu

_VMEM_LIMIT = 32 * 1024 * 1024  # >= every gen's scoped default, <= v7x physical


# ----------------------------------------------------------------------------
# tiling helpers (bounded tiles: pad rows instead of one-giant-block fallback)
# ----------------------------------------------------------------------------
def _round_up(x, m):
    return ((x + m - 1) // m) * m


def _choose_row_tile(M, cap):
    """Return (row_tile, padded_rows); cap must be a multiple of 8."""
    Mp = _round_up(max(M, 1), 8)
    if Mp <= cap:
        return Mp, Mp
    return cap, _round_up(M, cap)


def _pad_rows(x, Mp):
    M = x.shape[0]
    if M == Mp:
        return x
    return jnp.pad(x, ((0, Mp - M),) + ((0, 0),) * (x.ndim - 1))


def _pick_col_tile(Nc, cap):
    """Largest 128-multiple divisor of Nc that is <= cap (Nc is a 128-multiple
    at every call site); falls back to the full width otherwise."""
    if Nc <= cap or Nc % 128 != 0:
        return Nc
    t = (cap // 128) * 128
    while t >= 128:
        if Nc % t == 0:
            return t
        t -= 128
    return 128


def _pick_divisor_tile(dim, cap, align):
    if dim <= cap:
        return dim
    t = (cap // align) * align
    while t >= align:
        if dim % t == 0:
            return t
        t -= align
    return dim  # full-dim fallback (block equals full array dim)


# ----------------------------------------------------------------------------
# Pallas kernels
# ----------------------------------------------------------------------------
def _conv_mm_stats_kernel(x_ref, w_ref, o_ref, sum_ref, sumsq_ref):
    """rows = patches @ W (bf16 in, f32 acc) + per-TILE BN partial stats."""
    acc = jnp.dot(x_ref[...], w_ref[...], preferred_element_type=jnp.float32)
    o_ref[...] = acc.astype(o_ref.dtype)
    sum_ref[0, :, :] = jnp.sum(acc, axis=0, keepdims=True)
    sumsq_ref[0, :, :] = jnp.sum(acc * acc, axis=0, keepdims=True)


def conv_mm_stats(patches, w, *, tm_cap=1024):
    """(M, K) @ (K, Cout) -> rows (M, Cout) bf16, per-tile partial sums (f32).

    Per-tile partials (instead of one accumulator) keep the grid axis
    "parallel" so v7x's two TensorCores both work on the encoder matmul.
    """
    M, K = patches.shape
    _, Cout = w.shape
    TM, Mp = _choose_row_tile(M, tm_cap)
    patches = _pad_rows(patches, Mp)       # zero rows contribute 0 to the sums
    nt = Mp // TM
    rows, s, sq = pl.pallas_call(
        _conv_mm_stats_kernel,
        out_shape=(jax.ShapeDtypeStruct((Mp, Cout), jnp.bfloat16),
                   jax.ShapeDtypeStruct((nt, 1, Cout), jnp.float32),
                   jax.ShapeDtypeStruct((nt, 1, Cout), jnp.float32)),
        grid=(nt,),
        in_specs=[pl.BlockSpec((TM, K), lambda i: (i, 0)),
                  pl.BlockSpec((K, Cout), lambda i: (0, 0))],
        out_specs=(pl.BlockSpec((TM, Cout), lambda i: (i, 0)),
                   pl.BlockSpec((1, 1, Cout), lambda i: (i, 0, 0)),
                   pl.BlockSpec((1, 1, Cout), lambda i: (i, 0, 0))),
        compiler_params=pltpu.CompilerParams(
            dimension_semantics=("parallel",),
            vmem_limit_bytes=_VMEM_LIMIT),
    )(patches, w)
    return rows[:M], s, sq


def _conv2_tap_kernel(x_ref, w_ref, o_ref, sum_ref, sumsq_ref, *, H2, W2):
    """4x4/stride-2 conv as 16 tap matmuls over stride-2 phase slabs.

    x_ref: (4, H2+1, W2+1, 64) bf16 -- phases indexed 2*p+q of ONE image.
    w_ref: (16, 64, 128) bf16      -- tap t = 4*i + j.
    o_ref: (1, H2, W2, 128) bf16   -- raw conv rows (pre-BN).
    sum/sumsq: (1, 1, 128) f32     -- per-image BN partial stats.
    """
    csum = jnp.zeros((1, 128), jnp.float32)
    csumsq = jnp.zeros((1, 128), jnp.float32)
    for oh in range(H2):                       # TODO(synk): pl.loop for big H2
        acc = jnp.zeros((W2, 128), jnp.float32)
        for i in range(4):
            p, a = i % 2, i // 2
            for j in range(4):
                q, b = j % 2, j // 2
                lhs = x_ref[2 * p + q, oh + a, b:b + W2, :]          # (W2, 64)
                acc = acc + jnp.dot(lhs, w_ref[4 * i + j, :, :],
                                    preferred_element_type=jnp.float32)
        o_ref[0, oh, :, :] = acc.astype(o_ref.dtype)
        csum = csum + jnp.sum(acc, axis=0, keepdims=True)
        csumsq = csumsq + jnp.sum(acc * acc, axis=0, keepdims=True)
    sum_ref[0, :, :] = csum
    sumsq_ref[0, :, :] = csumsq


def conv2_tap_stats(phases4, w_taps, N, H2, W2):
    H2p, W2p = H2 + 1, W2 + 1
    return pl.pallas_call(
        functools.partial(_conv2_tap_kernel, H2=H2, W2=W2),
        out_shape=(jax.ShapeDtypeStruct((N, H2, W2, 128), jnp.bfloat16),
                   jax.ShapeDtypeStruct((N, 1, 128), jnp.float32),
                   jax.ShapeDtypeStruct((N, 1, 128), jnp.float32)),
        grid=(N,),
        in_specs=[pl.BlockSpec((4, H2p, W2p, 64), lambda n: (n, 0, 0, 0)),
                  pl.BlockSpec((16, 64, 128), lambda n: (0, 0, 0))],
        out_specs=(pl.BlockSpec((1, H2, W2, 128), lambda n: (n, 0, 0, 0)),
                   pl.BlockSpec((1, 1, 128), lambda n: (n, 0, 0)),
                   pl.BlockSpec((1, 1, 128), lambda n: (n, 0, 0))),
        compiler_params=pltpu.CompilerParams(
            dimension_semantics=("parallel",),
            vmem_limit_bytes=_VMEM_LIMIT),
    )(phases4, w_taps)


def _scale_shift_relu_kernel(x_ref, sc_ref, sh_ref, o_ref):
    y = jnp.maximum(x_ref[...].astype(jnp.float32) * sc_ref[...] + sh_ref[...],
                    0.0)
    o_ref[...] = y.astype(o_ref.dtype)


def scale_shift_relu(rows, scale, shift, *, tm_cap=1024):
    """relu(rows * scale + shift) -> bf16, lane-packing narrow channel dims."""
    M, C = rows.shape
    pack = 1
    if C < 128 and 128 % C == 0 and M % (128 // C) == 0:
        pack = 128 // C                    # e.g. C=64 -> view as (M/2, 128)
    Mv, Cv = M // pack, C * pack
    x = rows.reshape(Mv, Cv)
    sc = jnp.tile(scale, (1, pack))
    sh = jnp.tile(shift, (1, pack))
    TM, Mp = _choose_row_tile(Mv, tm_cap)
    x = _pad_rows(x, Mp)
    y = pl.pallas_call(
        _scale_shift_relu_kernel,
        out_shape=jax.ShapeDtypeStruct((Mp, Cv), jnp.bfloat16),
        grid=(Mp // TM,),
        in_specs=[pl.BlockSpec((TM, Cv), lambda i: (i, 0)),
                  pl.BlockSpec((1, Cv), lambda i: (0, 0)),
                  pl.BlockSpec((1, Cv), lambda i: (0, 0))],
        out_specs=pl.BlockSpec((TM, Cv), lambda i: (i, 0)),
        compiler_params=pltpu.CompilerParams(
            dimension_semantics=("parallel",)),
    )(x, sc, sh)
    return y[:Mv].reshape(M, C)


def _bn_relu_pool_kernel(x_ref, sc_ref, sh_ref, o_ref, pool_ref, *, inv_hw):
    t = pl.program_id(1)
    y = jnp.maximum(x_ref[...].astype(jnp.float32) * sc_ref[...] + sh_ref[...],
                    0.0)
    o_ref[...] = y.astype(o_ref.dtype)

    @pl.when(t == 0)
    def _():
        pool_ref[...] = jnp.zeros_like(pool_ref)

    pool_ref[...] += jnp.sum(y, axis=1, keepdims=True) * inv_hw


def bn_relu_pool(x3, scale, shift):
    """BN-apply + ReLU on (N, HW, C) -> bf16, fused AdaptiveAvgPool -> (N,1,C)."""
    N, HW, C = x3.shape
    T = _pick_divisor_tile(HW, 512, 8)
    y, pooled = pl.pallas_call(
        functools.partial(_bn_relu_pool_kernel, inv_hw=1.0 / HW),
        out_shape=(jax.ShapeDtypeStruct((N, HW, C), jnp.bfloat16),
                   jax.ShapeDtypeStruct((N, 1, C), jnp.float32)),
        grid=(N, HW // T),
        in_specs=[pl.BlockSpec((1, T, C), lambda n, t: (n, t, 0)),
                  pl.BlockSpec((1, 1, C), lambda n, t: (0, 0, 0)),
                  pl.BlockSpec((1, 1, C), lambda n, t: (0, 0, 0))],
        out_specs=(pl.BlockSpec((1, T, C), lambda n, t: (n, t, 0)),
                   pl.BlockSpec((1, 1, C), lambda n, t: (n, 0, 0))),
        compiler_params=pltpu.CompilerParams(
            dimension_semantics=("parallel", "arbitrary")),
    )(x3, scale.reshape(1, 1, C), shift.reshape(1, 1, C))
    return y, pooled


def _mm_bias_add_kernel(x_ref, w_ref, b_ref, add_ref, o_ref, *, relu):
    acc = jnp.dot(x_ref[...], w_ref[...], preferred_element_type=jnp.float32)
    acc = acc + b_ref[...] + add_ref[...].astype(jnp.float32)
    if relu:
        acc = jnp.maximum(acc, 0.0)
    o_ref[...] = acc


def matmul_bias_add(x, w, b_row, add, *, relu, tm_cap=1024, tn_cap=2048):
    """relu_or_id(x @ w + b_row + add), tiled over rows and output columns.
    Used for deconv2 (pure weight streaming: large N columns, tiny M rows)."""
    M, K = x.shape
    _, Nc = w.shape
    TM, Mp = _choose_row_tile(M, tm_cap)
    x = _pad_rows(x, Mp)
    add = _pad_rows(add, Mp)
    TN = _pick_col_tile(Nc, tn_cap)
    out = pl.pallas_call(
        functools.partial(_mm_bias_add_kernel, relu=relu),
        out_shape=jax.ShapeDtypeStruct((Mp, Nc), jnp.float32),
        grid=(Mp // TM, Nc // TN),
        in_specs=[pl.BlockSpec((TM, K), lambda i, j: (i, 0)),
                  pl.BlockSpec((K, TN), lambda i, j: (0, j)),
                  pl.BlockSpec((1, TN), lambda i, j: (0, j)),
                  pl.BlockSpec((TM, TN), lambda i, j: (i, j))],
        out_specs=pl.BlockSpec((TM, TN), lambda i, j: (i, j)),
        compiler_params=pltpu.CompilerParams(
            dimension_semantics=("parallel", "parallel"),
            vmem_limit_bytes=_VMEM_LIMIT),
    )(x, w, b_row, add)
    return out[:M]


def _fused_deconv_kernel(x_ref, w1_ref, b1_ref, add1_ref,
                         w0_ref, b0_ref, add0_ref, o_ref):
    """deconv1 (+bias +residual, ReLU) fused with deconv0 (+bias +residual)."""
    acc1 = jnp.dot(x_ref[...], w1_ref[...], preferred_element_type=jnp.float32)
    y1 = jnp.maximum(acc1 + b1_ref[...] + add1_ref[...].astype(jnp.float32),
                     0.0)
    acc0 = jnp.dot(y1, w0_ref[...], preferred_element_type=jnp.float32)
    o_ref[...] = acc0 + b0_ref[...] + add0_ref[...]


def fused_deconv10(d2, w1, b1, add1, w0_block, b0, add0, *, tm_cap=1024):
    M, K = d2.shape
    N1 = w1.shape[1]
    N0 = w0_block.shape[1]
    TM, Mp = _choose_row_tile(M, tm_cap)
    d2 = _pad_rows(d2, Mp)
    add1 = _pad_rows(add1, Mp)
    add0 = _pad_rows(add0, Mp)
    out = pl.pallas_call(
        _fused_deconv_kernel,
        out_shape=jax.ShapeDtypeStruct((Mp, N0), jnp.float32),
        grid=(Mp // TM,),
        in_specs=[pl.BlockSpec((TM, K), lambda i: (i, 0)),
                  pl.BlockSpec((K, N1), lambda i: (0, 0)),
                  pl.BlockSpec((1, N1), lambda i: (0, 0)),
                  pl.BlockSpec((TM, N1), lambda i: (i, 0)),
                  pl.BlockSpec((N1, N0), lambda i: (0, 0)),
                  pl.BlockSpec((1, N0), lambda i: (0, 0)),
                  pl.BlockSpec((TM, N0), lambda i: (i, 0))],
        out_specs=pl.BlockSpec((TM, N0), lambda i: (i, 0)),
        compiler_params=pltpu.CompilerParams(
            dimension_semantics=("parallel",),
            vmem_limit_bytes=_VMEM_LIMIT),
    )(d2, w1, b1, add1, w0_block, b0, add0)
    return out[:M]


# ----------------------------------------------------------------------------
# plain-JAX glue: im2col (layer 1), phase slabs (layer 2), BN finalize
# ----------------------------------------------------------------------------
def im2col_nhwc(x_nhwc, k, stride, pad):
    """Patches with column ordering (tap_i, tap_j, channel) -- channels fastest."""
    N, H, W, C = x_nhwc.shape
    xp = jnp.pad(x_nhwc, ((0, 0), (pad, pad), (pad, pad), (0, 0)))
    Ho = (H + 2 * pad - k) // stride + 1
    Wo = (W + 2 * pad - k) // stride + 1
    cols = []
    for i in range(k):
        for j in range(k):
            cols.append(xp[:, i:i + stride * Ho:stride, j:j + stride * Wo:stride, :])
    p = jnp.concatenate(cols, axis=-1)                     # (N, Ho, Wo, k*k*C)
    return p.reshape(N * Ho * Wo, k * k * C), Ho, Wo


def make_phase_slabs(x_nhwc, H2, W2):
    """Stride-2 phase decomposition of the pad-1 activation: (N*4, H2+1, W2+1, C)."""
    N = x_nhwc.shape[0]
    C = x_nhwc.shape[-1]
    xp = jnp.pad(x_nhwc, ((0, 0), (1, 1), (1, 1), (0, 0)))
    phases = jnp.stack([xp[:, p::2, q::2, :] for p in (0, 1) for q in (0, 1)],
                       axis=1)                             # (N, 4, H2+1, W2+1, C)
    return phases.reshape(N * 4, H2 + 1, W2 + 1, C)


def bn_scale_shift(psum, psumsq, m, gamma, beta, eps=1e-5):
    """Reduce per-tile partials and fold train-mode BN (biased var) into (1, C)."""
    C = psum.shape[-1]
    colsum = jnp.sum(psum.reshape(-1, C), axis=0, keepdims=True)
    colsumsq = jnp.sum(psumsq.reshape(-1, C), axis=0, keepdims=True)
    mean = colsum / m
    var = jnp.maximum(colsumsq / m - mean * mean, 0.0)
    inv = jax.lax.rsqrt(var + eps)
    scale = gamma.reshape(1, -1) * inv
    shift = beta.reshape(1, -1) - mean * scale
    return scale, shift


# ----------------------------------------------------------------------------
# REDNet forward
# ----------------------------------------------------------------------------
def rednet_forward(params, x):
    N, Cin, H, W = x.shape
    assert H % 4 == 0 and W % 4 == 0
    xf = x.astype(jnp.float32)
    x_nhwc = jnp.transpose(xf, (0, 2, 3, 1))

    # ---- encoder layer 1: Conv2d(Cin,64,6,2,2) -> BN(train) -> ReLU ----
    # conv bias omitted: exactly cancelled by the BN batch-mean subtraction.
    p1, H1, W1 = im2col_nhwc(x_nhwc, 6, 2, 2)
    M1 = N * H1 * W1
    w1 = (params["conv1_w"].transpose(2, 3, 1, 0).reshape(-1, 64)
          .astype(jnp.bfloat16))
    rows1, ps1, psq1 = conv_mm_stats(p1.astype(jnp.bfloat16), w1)
    scale1, shift1 = bn_scale_shift(ps1, psq1, M1,
                                    params["bn1_g"], params["bn1_b"])
    out1_rows = scale_shift_relu(rows1, scale1, shift1)          # (M1, 64) bf16
    out1_nhwc = out1_rows.reshape(N, H1, W1, 64)

    # ---- encoder layer 2: Conv2d(64,128,4,2,1) -> BN -> ReLU (+ fused pool) ----
    assert H1 % 2 == 0 and W1 % 2 == 0
    H2, W2 = H1 // 2, W1 // 2
    M2 = N * H2 * W2
    phases4 = make_phase_slabs(out1_nhwc, H2, W2)                # bf16, ~1x relayout
    w2_taps = (params["conv2_w"].transpose(2, 3, 1, 0).reshape(16, 64, 128)
               .astype(jnp.bfloat16))
    rows2, ps2, psq2 = conv2_tap_stats(phases4, w2_taps, N, H2, W2)
    scale2, shift2 = bn_scale_shift(ps2, psq2, M2,
                                    params["bn2_g"], params["bn2_b"])
    out2_3d, pooled = bn_relu_pool(rows2.reshape(N, H2 * W2, 128),
                                   scale2, shift2)
    pooled = pooled.reshape(N, 128)                              # AdaptiveAvgPool(1,1)

    # ---- decoder deconv2: ConvTranspose2d(128,128,H2) on 1x1 input, +out2, ReLU ----
    k2 = params["deconv2_w"].shape[2]
    assert k2 == H2 and k2 == W2, "deconv2 kernel must equal encoder-2 spatial size"
    w2d = params["deconv2_w"].transpose(0, 2, 3, 1).reshape(128, k2 * k2 * 128)
    b2d = jnp.broadcast_to(params["deconv2_b"], (k2 * k2, 128)).reshape(1, -1)
    add2 = out2_3d.reshape(N, H2 * W2 * 128)
    d2_rows = matmul_bias_add(pooled, w2d, b2d, add2, relu=True)  # (N, HW2*128)
    d2 = d2_rows.reshape(N * H2 * W2, 128)

    # ---- decoder deconv1 + deconv0, fused (block-diagonal second matmul) ----
    w1d = params["deconv1_w"].transpose(0, 2, 3, 1).reshape(128, 4 * 64)
    b1d = jnp.broadcast_to(params["deconv1_b"], (4, 64)).reshape(1, -1)
    add1 = (out1_nhwc.reshape(N, H2, 2, W2, 2, 64)
            .transpose(0, 1, 3, 2, 4, 5).reshape(N * H2 * W2, 4 * 64))
    w0d = params["deconv0_w"].transpose(0, 2, 3, 1).reshape(64, 4 * Cin)
    w0_block = jnp.zeros((256, 16 * Cin), jnp.float32)
    for s in range(4):       # block-diagonal: subpixel s of deconv1 -> deconv0
        w0_block = w0_block.at[s * 64:(s + 1) * 64,
                               s * 4 * Cin:(s + 1) * 4 * Cin].set(w0d)
    b0d = jnp.broadcast_to(params["deconv0_b"], (16, Cin)).reshape(1, -1)
    add0 = (xf.reshape(N, Cin, H2, 2, 2, W2, 2, 2)
            .transpose(0, 2, 5, 3, 6, 4, 7, 1).reshape(N * H2 * W2, 16 * Cin))
    out_rows = fused_deconv10(d2, w1d, b1d, add1, w0_block, b0d, add0)

    out = (out_rows.reshape(N, H2, W2, 2, 2, 2, 2, Cin)
           .transpose(0, 7, 1, 3, 5, 2, 4, 6).reshape(N, Cin, H, W))
    return out


# ----------------------------------------------------------------------------
# params / driver
# ----------------------------------------------------------------------------
def init_params(key, in_channels, input_size):
    ks = jax.random.split(key, 14)

    def w(k, shape, scale=0.05):
        return scale * jax.random.normal(k, shape, jnp.float32)

    return dict(
        conv1_w=w(ks[0], (64, in_channels, 6, 6)),
        conv1_b=w(ks[1], (64,)),          # unused: cancelled by train-mode BN
        bn1_g=1.0 + 0.1 * jax.random.normal(ks[2], (64,), jnp.float32),
        bn1_b=w(ks[3], (64,)),
        conv2_w=w(ks[4], (128, 64, 4, 4)),
        conv2_b=w(ks[5], (128,)),         # unused: cancelled by train-mode BN
        bn2_g=1.0 + 0.1 * jax.random.normal(ks[6], (128,), jnp.float32),
        bn2_b=w(ks[7], (128,)),
        deconv2_w=w(ks[8], (128, 128, input_size // 4, input_size // 4)),
        deconv2_b=w(ks[9], (128,)),
        deconv1_w=w(ks[10], (128, 64, 2, 2)),
        deconv1_b=w(ks[11], (64,)),
        deconv0_w=w(ks[12], (64, in_channels, 2, 2)),
        deconv0_b=w(ks[13], (in_channels,)),
    )


if __name__ == "__main__":
    in_channels, input_size, batch = 4, 16, 2
    key = jax.random.PRNGKey(0)
    kp, kx = jax.random.split(key)
    params = init_params(kp, in_channels, input_size)
    x = jax.random.normal(kx, (batch, in_channels, input_size, input_size),
                          jnp.float32)

    out = jax.jit(rednet_forward)(params, x)
    out = jax.block_until_ready(out)

    assert out.shape == (batch, in_channels, input_size, input_size), out.shape
    assert bool(jnp.all(jnp.isfinite(out)))
    print("KERNEL_OK")
</pallas_src>

<mosaic_0001>
module attributes {stable_mosaic.version = 11 : i64} {
  func.func @_conv_mm_stats_kernel(%arg0: i32, %arg1: memref<128x144xbf16, #tpu.memory_space<vmem>>, %arg2: memref<144x64xbf16, #tpu.memory_space<vmem>>, %arg3: memref<128x64xbf16, #tpu.memory_space<vmem>>, %arg4: memref<1x1x64xf32, #tpu.memory_space<vmem>>, %arg5: memref<1x1x64xf32, #tpu.memory_space<vmem>>) attributes {dimension_semantics = [#tpu.dimension_semantics<parallel>], iteration_bounds = array<i64: 1>, scalar_prefetch = 0 : i64, scratch_operands = 0 : i64, tpu.core_type = #tpu.core_type<tc>, window_params = [{transform_indices = @transform_0, window_bounds = array<i64: 128, 144>}, {pipeline_mode = #tpu.pipeline_mode<synchronous>, transform_indices = @transform_1, window_bounds = array<i64: 144, 64>}, {transform_indices = @transform_2, window_bounds = array<i64: 128, 64>}, {transform_indices = @transform_3, window_bounds = array<i64: 1, 1, 64>}, {transform_indices = @transform_4, window_bounds = array<i64: 1, 1, 64>}]} {
    %c0 = arith.constant 0 : index
    %c0_0 = arith.constant 0 : index
    %0 = vector.load %arg1[%c0, %c0_0] : memref<128x144xbf16, #tpu.memory_space<vmem>>, vector<128x144xbf16>
    %c0_1 = arith.constant 0 : index
    %c0_2 = arith.constant 0 : index
    %1 = vector.load %arg2[%c0_1, %c0_2] : memref<144x64xbf16, #tpu.memory_space<vmem>>, vector<144x64xbf16>
    %cst = arith.constant dense<0.000000e+00> : vector<128x64xf32>
    %2 = tpu.matmul %0, %1, %cst {dimension_numbers = #tpu.dot_dimension_numbers<[1], [0], [0], [1], [0, 0, 1, 1], [], []>} : vector<128x144xbf16>, vector<144x64xbf16>, vector<128x64xf32> -> vector<128x64xf32>
    %3 = arith.truncf %2 : vector<128x64xf32> to vector<128x64xbf16>
    %c0_3 = arith.constant 0 : index
    %c0_4 = arith.constant 0 : index
    %4 = vector.load %arg3[%c0_3, %c0_4] : memref<128x64xbf16, #tpu.memory_space<vmem>>, vector<128x64xbf16>
    tpu.vector_store %arg3[%c0_3, %c0_4], %3 {strides = array<i32>} : memref<128x64xbf16, #tpu.memory_space<vmem>>, vector<128x64xbf16>,
    %cst_5 = arith.constant dense<0.000000e+00> : vector<64xf32>
    %5 = vector.multi_reduction <add>, %2, %cst_5 [0] : vector<128x64xf32> to vector<64xf32>
    %6 = vector.shape_cast %5 : vector<64xf32> to vector<1x64xf32>
    %c0_6 = arith.constant 0 : index
    %c0_7 = arith.constant 0 : index
    %c0_8 = arith.constant 0 : index
    %7 = vector.load %arg4[%c0_6, %c0_7, %c0_8] : memref<1x1x64xf32, #tpu.memory_space<vmem>>, vector<1x1x64xf32>
    %8 = vector.shape_cast %7 : vector<1x1x64xf32> to vector<1x64xf32>
    %9 = vector.shape_cast %6 : vector<1x64xf32> to vector<1x1x64xf32>
    tpu.vector_store %arg4[%c0_6, %c0_7, %c0_8], %9 {strides = array<i32>} : memref<1x1x64xf32, #tpu.memory_space<vmem>>, vector<1x1x64xf32>,
    %10 = arith.mulf %2, %2 : vector<128x64xf32>
    %cst_9 = arith.constant dense<0.000000e+00> : vector<64xf32>
    %11 = vector.multi_reduction <add>, %10, %cst_9 [0] : vector<128x64xf32> to vector<64xf32>
    %12 = vector.shape_cast %11 : vector<64xf32> to vector<1x64xf32>
    %c0_10 = arith.constant 0 : index
    %c0_11 = arith.constant 0 : index
    %c0_12 = arith.constant 0 : index
    %13 = vector.load %arg5[%c0_10, %c0_11, %c0_12] : memref<1x1x64xf32, #tpu.memory_space<vmem>>, vector<1x1x64xf32>
    %14 = vector.shape_cast %13 : vector<1x1x64xf32> to vector<1x64xf32>
    %15 = vector.shape_cast %12 : vector<1x64xf32> to vector<1x1x64xf32>
    tpu.vector_store %arg5[%c0_10, %c0_11, %c0_12], %15 {strides = array<i32>} : memref<1x1x64xf32, #tpu.memory_space<vmem>>, vector<1x1x64xf32>,
    return
  }
  func.func @transform_0(%arg0: i32) -> (i32, i32) {
    %c0_i32 = arith.constant 0 : i32
    %c0_i32_0 = arith.constant 0 : i32
    return %arg0, %c0_i32 : i32, i32
  }
  func.func @transform_1(%arg0: i32) -> (i32, i32) {
    %c0_i32 = arith.constant 0 : i32
    %c0_i32_0 = arith.constant 0 : i32
    %c0_i32_1 = arith.constant 0 : i32
    return %c0_i32, %c0_i32_0 : i32, i32
  }
  func.func @transform_2(%arg0: i32) -> (i32, i32) {
    %c0_i32 = arith.constant 0 : i32
    %c0_i32_0 = arith.constant 0 : i32
    return %arg0, %c0_i32 : i32, i32
  }
  func.func @transform_3(%arg0: i32) -> (i32, i32, i32) {
    %c0_i32 = arith.constant 0 : i32
    %c0_i32_0 = arith.constant 0 : i32
    %c0_i32_1 = arith.constant 0 : i32
    return %arg0, %c0_i32, %c0_i32_0 : i32, i32, i32
  }
  func.func @transform_4(%arg0: i32) -> (i32, i32, i32) {
    %c0_i32 = arith.constant 0 : i32
    %c0_i32_0 = arith.constant 0 : i32
    %c0_i32_1 = arith.constant 0 : i32
    return %arg0, %c0_i32, %c0_i32_0 : i32, i32, i32
  }
}

module attributes {stable_mosaic.version = 11 : i64} {
  func.func @_scale_shift_relu_kernel(%arg0: i32, %arg1: memref<64x128xbf16, #tpu.memory_space<vmem>>, %arg2: memref<1x128xf32, #tpu.memory_space<vmem>>, %arg3: memref<1x128xf32, #tpu.memory_space<vmem>>, %arg4: memref<64x128xbf16, #tpu.memory_space<vmem>>) attributes {dimension_semantics = [#tpu.dimension_semantics<parallel>], iteration_bounds = array<i64: 1>, scalar_prefetch = 0 : i64, scratch_operands = 0 : i64, tpu.core_type = #tpu.core_type<tc>, window_params = [{transform_indices = @transform_0, window_bounds = array<i64: 64, 128>}, {pipeline_mode = #tpu.pipeline_mode<synchronous>, transform_indices = @transform_1, window_bounds = array<i64: 1, 128>}, {pipeline_mode = #tpu.pipeline_mode<synchronous>, transform_indices = @transform_2, window_bounds = array<i64: 1, 128>}, {transform_indices = @transform_3, window_bounds = array<i64: 64, 128>}]} {
    %c0 = arith.constant 0 : index
    %c0_0 = arith.constant 0 : index
    %0 = vector.load %arg1[%c0, %c0_0] : memref<64x128xbf16, #tpu.memory_space<vmem>>, vector<64x128xbf16>
    %1 = arith.extf %0 : vector<64x128xbf16> to vector<64x128xf32>
    %c0_1 = arith.constant 0 : index
    %c0_2 = arith.constant 0 : index
    %2 = vector.load %arg2[%c0_1, %c0_2] : memref<1x128xf32, #tpu.memory_space<vmem>>, vector<1x128xf32>
    %3 = vector.broadcast %2 : vector<1x128xf32> to vector<64x128xf32>
    %4 = arith.mulf %1, %3 : vector<64x128xf32>
    %c0_3 = arith.constant 0 : index
    %c0_4 = arith.constant 0 : index
    %5 = vector.load %arg3[%c0_3, %c0_4] : memref<1x128xf32, #tpu.memory_space<vmem>>, vector<1x128xf32>
    %6 = vector.broadcast %5 : vector<1x128xf32> to vector<64x128xf32>
    %7 = arith.addf %4, %6 : vector<64x128xf32>
    %cst = arith.constant 0.000000e+00 : f32
    %8 = vector.broadcast %cst : f32 to vector<64x128xf32>
    %9 = arith.maximumf %7, %8 : vector<64x128xf32>
    %10 = arith.truncf %9 : vector<64x128xf32> to vector<64x128xbf16>
    %c0_5 = arith.constant 0 : index
    %c0_6 = arith.constant 0 : index
    %11 = vector.load %arg4[%c0_5, %c0_6] : memref<64x128xbf16, #tpu.memory_space<vmem>>, vector<64x128xbf16>
    tpu.vector_store %arg4[%c0_5, %c0_6], %10 {strides = array<i32>} : memref<64x128xbf16, #tpu.memory_space<vmem>>, vector<64x128xbf16>,
    return
  }
  func.func @transform_0(%arg0: i32) -> (i32, i32) {
    %c0_i32 = arith.constant 0 : i32
    %c0_i32_0 = arith.constant 0 : i32
    return %arg0, %c0_i32 : i32, i32
  }
  func.func @transform_1(%arg0: i32) -> (i32, i32) {
    %c0_i32 = arith.constant 0 : i32
    %c0_i32_0 = arith.constant 0 : i32
    %c0_i32_1 = arith.constant 0 : i32
    return %c0_i32, %c0_i32_0 : i32, i32
  }
  func.func @transform_2(%arg0: i32) -> (i32, i32) {
    %c0_i32 = arith.constant 0 : i32
    %c0_i32_0 = arith.constant 0 : i32
    %c0_i32_1 = arith.constant 0 : i32
    return %c0_i32, %c0_i32_0 : i32, i32
  }
  func.func @transform_3(%arg0: i32) -> (i32, i32) {
    %c0_i32 = arith.constant 0 : i32
    %c0_i32_0 = arith.constant 0 : i32
    return %arg0, %c0_i32 : i32, i32
  }
}

module attributes {stable_mosaic.version = 11 : i64} {
  func.func @_conv2_tap_kernel(%arg0: i32, %arg1: memref<4x5x5x64xbf16, #tpu.memory_space<vmem>>, %arg2: memref<16x64x128xbf16, #tpu.memory_space<vmem>>, %arg3: memref<1x4x4x128xbf16, #tpu.memory_space<vmem>>, %arg4: memref<1x1x128xf32, #tpu.memory_space<vmem>>, %arg5: memref<1x1x128xf32, #tpu.memory_space<vmem>>) attributes {dimension_semantics = [#tpu.dimension_semantics<parallel>], iteration_bounds = array<i64: 2>, scalar_prefetch = 0 : i64, scratch_operands = 0 : i64, tpu.core_type = #tpu.core_type<tc>, window_params = [{transform_indices = @transform_0, window_bounds = array<i64: 4, 5, 5, 64>}, {pipeline_mode = #tpu.pipeline_mode<synchronous>, transform_indices = @transform_1, window_bounds = array<i64: 16, 64, 128>}, {transform_indices = @transform_2, window_bounds = array<i64: 1, 4, 4, 128>}, {transform_indices = @transform_3, window_bounds = array<i64: 1, 1, 128>}, {transform_indices = @transform_4, window_bounds = array<i64: 1, 1, 128>}]} {
    %cst = arith.constant 0.000000e+00 : f32
    %0 = vector.broadcast %cst : f32 to vector<1x128xf32>
    %cst_0 = arith.constant 0.000000e+00 : f32
    %1 = vector.broadcast %cst_0 : f32 to vector<1x128xf32>
    %cst_1 = arith.constant 0.000000e+00 : f32
    %2 = vector.broadcast %cst_1 : f32 to vector<4x128xf32>
    %c0 = arith.constant 0 : index
    %c0_2 = arith.constant 0 : index
    %c0_3 = arith.constant 0 : index
    %c0_4 = arith.constant 0 : index
    %3 = vector.load %arg1[%c0, %c0_2, %c0_3, %c0_4] : memref<4x5x5x64xbf16, #tpu.memory_space<vmem>>, vector<1x1x4x64xbf16>
    %4 = vector.shape_cast %3 : vector<1x1x4x64xbf16> to vector<4x64xbf16>
    %c0_5 = arith.constant 0 : index
    %c0_6 = arith.constant 0 : index
    %c0_7 = arith.constant 0 : index
    %5 = vector.load %arg2[%c0_5, %c0_6, %c0_7] : memref<16x64x128xbf16, #tpu.memory_space<vmem>>, vector<1x64x128xbf16>
    %6 = vector.shape_cast %5 : vector<1x64x128xbf16> to vector<64x128xbf16>
    %cst_8 = arith.constant dense<0.000000e+00> : vector<4x128xf32>
    %7 = tpu.matmul %4, %6, %cst_8 {dimension_numbers = #tpu.dot_dimension_numbers<[1], [0], [0], [1], [0, 0, 1, 1], [], []>} : vector<4x64xbf16>, vector<64x128xbf16>, vector<4x128xf32> -> vector<4x128xf32>
    %8 = arith.addf %2, %7 : vector<4x128xf32>
    %c1 = arith.constant 1 : index
    %c0_9 = arith.constant 0 : index
    %c0_10 = arith.constant 0 : index
    %c0_11 = arith.constant 0 : index
    %9 = vector.load %arg1[%c1, %c0_9, %c0_10, %c0_11] : memref<4x5x5x64xbf16, #tpu.memory_space<vmem>>, vector<1x1x4x64xbf16>
    %10 = vector.shape_cast %9 : vector<1x1x4x64xbf16> to vector<4x64xbf16>
    %c1_12 = arith.constant 1 : index
    %c0_13 = arith.constant 0 : index
    %c0_14 = arith.constant 0 : index
    %11 = vector.load %arg2[%c1_12, %c0_13, %c0_14] : memref<16x64x128xbf16, #tpu.memory_space<vmem>>, vector<1x64x128xbf16>
    %12 = vector.shape_cast %11 : vector<1x64x128xbf16> to vector<64x128xbf16>
    %cst_15 = arith.constant dense<0.000000e+00> : vector<4x128xf32>
    %13 = tpu.matmul %10, %12, %cst_15 {dimension_numbers = #tpu.dot_dimension_numbers<[1], [0], [0], [1], [0, 0, 1, 1], [], []>} : vector<4x64xbf16>, vector<64x128xbf16>, vector<4x128xf32> -> vector<4x128xf32>
    %14 = arith.addf %8, %13 : vector<4x128xf32>
    %c0_16 = arith.constant 0 : index
    %c0_17 = arith.constant 0 : index
    %c1_18 = arith.constant 1 : index
    %c0_19 = arith.constant 0 : index
    %15 = vector.load %arg1[%c0_16, %c0_17, %c1_18, %c0_19] : memref<4x5x5x64xbf16, #tpu.memory_space<vmem>>, vector<1x1x4x64xbf16>
    %16 = vector.shape_cast %15 : vector<1x1x4x64xbf16> to vector<4x64xbf16>
    %c2 = arith.constant 2 : index
    %c0_20 = arith.constant 0 : index
    %c0_21 = arith.constant 0 : index
    %17 = vector.load %arg2[%c2, %c0_20, %c0_21] : memref<16x64x128xbf16, #tpu.memory_space<vmem>>, vector<1x64x128xbf16>
    %18 = vector.shape_cast %17 : vector<1x64x128xbf16> to vector<64x128xbf16>
    %cst_22 = arith.constant dense<0.000000e+00> : vector<4x128xf32>
    %19 = tpu.matmul %16, %18, %cst_22 {dimension_numbers = #tpu.dot_dimension_numbers<[1], [0], [0], [1], [0, 0, 1, 1], [], []>} : vector<4x64xbf16>, vector<64x128xbf16>, vector<4x128xf32> -> vector<4x128xf32>
    %20 = arith.addf %14, %19 : vector<4x128xf32>
    %c1_23 = arith.constant 1 : index
    %c0_24 = arith.constant 0 : index
    %c1_25 = arith.constant 1 : index
    %c0_26 = arith.constant 0 : index
    %21 = vector.load %arg1[%c1_23, %c0_24, %c1_25, %c0_26] : memref<4x5x5x64xbf16, #tpu.memory_space<vmem>>, vector<1x1x4x64xbf16>
    %22 = vector.shape_cast %21 : vector<1x1x4x64xbf16> to vector<4x64xbf16>
    %c3 = arith.constant 3 : index
    %c0_27 = arith.constant 0 : index
    %c0_28 = arith.constant 0 : index
    %23 = vector.load %arg2[%c3, %c0_27, %c0_28] : memref<16x64x128xbf16, #tpu.memory_space<vmem>>, vector<1x64x128xbf16>
    %24 = vector.shape_cast %23 : vector<1x64x128xbf16> to vector<64x128xbf16>
    %cst_29 = arith.constant dense<0.000000e+00> : vector<4x128xf32>
    %25 = tpu.matmul %22, %24, %cst_29 {dimension_numbers = #tpu.dot_dimension_numbers<[1], [0], [0], [1], [0, 0, 1, 1], [], []>} : vector<4x64xbf16>, vector<64x128xbf16>, vector<4x128xf32> -> vector<4x128xf32>
    %26 = arith.addf %20, %25 : vector<4x128xf32>
    %c2_30 = arith.constant 2 : index
    %c0_31 = arith.constant 0 : index
    %c0_32 = arith.constant 0 : index
    %c0_33 = arith.constant 0 : index
    %27 = vector.load %arg1[%c2_30, %c0_31, %c0_32, %c0_33] : memref<4x5x5x64xbf16, #tpu.memory_space<vmem>>, vector<1x1x4x64xbf16>
    %28 = vector.shape_cast %27 : vector<1x1x4x64xbf16> to vector<4x64xbf16>
    %c4 = arith.constant 4 : index
    %c0_34 = arith.constant 0 : index
    %c0_35 = arith.constant 0 : index
    %29 = vector.load %arg2[%c4, %c0_34, %c0_35] : memref<16x64x128xbf16, #tpu.memory_space<vmem>>, vector<1x64x128xbf16>
    %30 = vector.shape_cast %29 : vector<1x64x128xbf16> to vector<64x128xbf16>
    %cst_36 = arith.constant dense<0.000000e+00> : vector<4x128xf32>
    %31 = tpu.matmul %28, %30, %cst_36 {dimension_numbers = #tpu.dot_dimension_numbers<[1], [0], [0], [1], [0, 0, 1, 1], [], []>} : vector<4x64xbf16>, vector<64x128xbf16>, vector<4x128xf32> -> vector<4x128xf32>
    %32 = arith.addf %26, %31 : vector<4x128xf32>
    %c3_37 = arith.constant 3 : index
    %c0_38 = arith.constant 0 : index
    %c0_39 = arith.constant 0 : index
    %c0_40 = arith.constant 0 : index
    %33 = vector.load %arg1[%c3_37, %c0_38, %c0_39, %c0_40] : memref<4x5x5x64xbf16, #tpu.memory_space<vmem>>, vector<1x1x4x64xbf16>
    %34 = vector.shape_cast %33 : vector<1x1x4x64xbf16> to vector<4x64xbf16>
    %c5 = arith.constant 5 : index
    %c0_41 = arith.constant 0 : index
    %c0_42 = arith.constant 0 : index
    %35 = vector.load %arg2[%c5, %c0_41, %c0_42] : memref<16x64x128xbf16, #tpu.memory_space<vmem>>, vector<1x64x128xbf16>
    %36 = vector.shape_cast %35 : vector<1x64x128xbf16> to vector<64x128xbf16>
    %cst_43 = arith.constant dense<0.000000e+00> : vector<4x128xf32>
    %37 = tpu.matmul %34, %36, %cst_43 {dimension_numbers = #tpu.dot_dimension_numbers<[1], [0], [0], [1], [0, 0, 1, 1], [], []>} : vector<4x64xbf16>, vector<64x128xbf16>, vector<4x128xf32> -> vector<4x128xf32>
    %38 = arith.addf %32, %37 : vector<4x128xf32>
    %c2_44 = arith.constant 2 : index
    %c0_45 = arith.constant 0 : index
    %c1_46 = arith.constant 1 : index
    %c0_47 = arith.constant 0 : index
    %39 = vector.load %arg1[%c2_44, %c0_45, %c1_46, %c0_47] : memref<4x5x5x64xbf16, #tpu.memory_space<vmem>>, vector<1x1x4x64xbf16>
    %40 = vector.shape_cast %39 : vector<1x1x4x64xbf16> to vector<4x64xbf16>
    %c6 = arith.constant 6 : index
    %c0_48 = arith.constant 0 : index
    %c0_49 = arith.constant 0 : index
    %41 = vector.load %arg2[%c6, %c0_48, %c0_49] : memref<16x64x128xbf16, #tpu.memory_space<vmem>>, vector<1x64x128xbf16>
    %42 = vector.shape_cast %41 : vector<1x64x128xbf16> to vector<64x128xbf16>
    %cst_50 = arith.constant dense<0.000000e+00> : vector<4x128xf32>
    %43 = tpu.matmul %40, %42, %cst_50 {dimension_numbers = #tpu.dot_dimension_numbers<[1], [0], [0], [1], [0, 0, 1, 1], [], []>} : vector<4x64xbf16>, vector<64x128xbf16>, vector<4x128xf32> -> vector<4x128xf32>
    %44 = arith.addf %38, %43 : vector<4x128xf32>
    %c3_51 = arith.constant 3 : index
    %c0_52 = arith.constant 0 : index
    %c1_53 = arith.constant 1 : index
    %c0_54 = arith.constant 0 : index
    %45 = vector.load %arg1[%c3_51, %c0_52, %c1_53, %c0_54] : memref<4x5x5x64xbf16, #tpu.memory_space<vmem>>, vector<1x1x4x64xbf16>
    %46 = vector.shape_cast %45 : vector<1x1x4x64xbf16> to vector<4x64xbf16>
    %c7 = arith.constant 7 : index
    %c0_55 = arith.constant 0 : index
    %c0_56 = arith.constant 0 : index
    %47 = vector.load %arg2[%c7, %c0_55, %c0_56] : memref<16x64x128xbf16, #tpu.memory_space<vmem>>, vector<1x64x128xbf16>
    %48 = vector.shape_cast %47 : vector<1x64x128xbf16> to vector<64x128xbf16>
    %cst_57 = arith.constant dense<0.000000e+00> : vector<4x128xf32>
    %49 = tpu.matmul %46, %48, %cst_57 {dimension_numbers = #tpu.dot_dimension_numbers<[1], [0], [0], [1], [0, 0, 1, 1], [], []>} : vector<4x64xbf16>, vector<64x128xbf16>, vector<4x128xf32> -> vector<4x128xf32>
    %50 = arith.addf %44, %49 : vector<4x128xf32>
    %c0_58 = arith.constant 0 : index
    %c1_59 = arith.constant 1 : index
    %c0_60 = arith.constant 0 : index
    %c0_61 = arith.constant 0 : index
    %51 = vector.load %arg1[%c0_58, %c1_59, %c0_60, %c0_61] : memref<4x5x5x64xbf16, #tpu.memory_space<vmem>>, vector<1x1x4x64xbf16>
    %52 = vector.shape_cast %51 : vector<1x1x4x64xbf16> to vector<4x64xbf16>
    %c8 = arith.constant 8 : index
    %c0_62 = arith.constant 0 : index
    %c0_63 = arith.constant 0 : index
    %53 = vector.load %arg2[%c8, %c0_62, %c0_63] : memref<16x64x128xbf16, #tpu.memory_space<vmem>>, vector<1x64x128xbf16>
    %54 = vector.shape_cast %53 : vector<1x64x128xbf16> to vector<64x128xbf16>
    %cst_64 = arith.constant dense<0.000000e+00> : vector<4x128xf32>
    %55 = tpu.matmul %52, %54, %cst_64 {dimension_numbers = #tpu.dot_dimension_numbers<[1], [0], [0], [1], [0, 0, 1, 1], [], []>} : vector<4x64xbf16>, vector<64x128xbf16>, vector<4x128xf32> -> vector<4x128xf32>
    %56 = arith.addf %50, %55 : vector<4x128xf32>
    %c1_65 = arith.constant 1 : index
    %c1_66 = arith.constant 1 : index
    %c0_67 = arith.constant 0 : index
    %c0_68 = arith.constant 0 : index
    %57 = vector.load %arg1[%c1_65, %c1_66, %c0_67, %c0_68] : memref<4x5x5x64xbf16, #tpu.memory_space<vmem>>, vector<1x1x4x64xbf16>
    %58 = vector.shape_cast %57 : vector<1x1x4x64xbf16> to vector<4x64xbf16>
    %c9 = arith.constant 9 : index
    %c0_69 = arith.constant 0 : index
    %c0_70 = arith.constant 0 : index
    %59 = vector.load %arg2[%c9, %c0_69, %c0_70] : memref<16x64x128xbf16, #tpu.memory_space<vmem>>, vector<1x64x128xbf16>
    %60 = vector.shape_cast %59 : vector<1x64x128xbf16> to vector<64x128xbf16>
    %cst_71 = arith.constant dense<0.000000e+00> : vector<4x128xf32>
    %61 = tpu.matmul %58, %60, %cst_71 {dimension_numbers = #tpu.dot_dimension_numbers<[1], [0], [0], [1], [0, 0, 1, 1], [], []>} : vector<4x64xbf16>, vector<64x128xbf16>, vector<4x128xf32> -> vector<4x128xf32>
    %62 = arith.addf %56, %61 : vector<4x128xf32>
    %c0_72 = arith.constant 0 : index
    %c1_73 = arith.constant 1 : index
    %c1_74 = arith.constant 1 : index
    %c0_75 = arith.constant 0 : index
    %63 = vector.load %arg1[%c0_72, %c1_73, %c1_74, %c0_75] : memref<4x5x5x64xbf16, #tpu.memory_space<vmem>>, vector<1x1x4x64xbf16>
    %64 = vector.shape_cast %63 : vector<1x1x4x64xbf16> to vector<4x64xbf16>
    %c10 = arith.constant 10 : index
    %c0_76 = arith.constant 0 : index
    %c0_77 = arith.constant 0 : index
    %65 = vector.load %arg2[%c10, %c0_76, %c0_77] : memref<16x64x128xbf16, #tpu.memory_space<vmem>>, vector<1x64x128xbf16>
    %66 = vector.shape_cast %65 : vector<1x64x128xbf16> to vector<64x128xbf16>
    %cst_78 = arith.constant dense<0.000000e+00> : vector<4x128xf32>
    %67 = tpu.matmul %64, %66, %cst_78 {dimension_numbers = #tpu.dot_dimension_numbers<[1], [0], [0], [1], [0, 0, 1, 1], [], []>} : vector<4x64xbf16>, vector<64x128xbf16>, vector<4x128xf32> -> vector<4x128xf32>
    %68 = arith.addf %62, %67 : vector<4x128xf32>
    %c1_79 = arith.constant 1 : index
    %c1_80 = arith.constant 1 : index
    %c1_81 = arith.constant 1 : index
    %c0_82 = arith.constant 0 : index
    %69 = vector.load %arg1[%c1_79, %c1_80, %c1_81, %c0_82] : memref<4x5x5x64xbf16, #tpu.memory_space<vmem>>, vector<1x1x4x64xbf16>
    %70 = vector.shape_cast %69 : vector<1x1x4x64xbf16> to vector<4x64xbf16>
    %c11 = arith.constant 11 : index
    %c0_83 = arith.constant 0 : index
    %c0_84 = arith.constant 0 : index
    %71 = vector.load %arg2[%c11, %c0_83, %c0_84] : memref<16x64x128xbf16, #tpu.memory_space<vmem>>, vector<1x64x128xbf16>
    %72 = vector.shape_cast %71 : vector<1x64x128xbf16> to vector<64x128xbf16>
    %cst_85 = arith.constant dense<0.000000e+00> : vector<4x128xf32>
    %73 = tpu.matmul %70, %72, %cst_85 {dimension_numbers = #tpu.dot_dimension_numbers<[1], [0], [0], [1], [0, 0, 1, 1], [], []>} : vector<4x64xbf16>, vector<64x128xbf16>, vector<4x128xf32> -> vector<4x128xf32>
    %74 = arith.addf %68, %73 : vector<4x128xf32>
    %c2_86 = arith.constant 2 : index
    %c1_87 = arith.constant 1 : index
    %c0_88 = arith.constant 0 : index
    %c0_89 = arith.constant 0 : index
    %75 = vector.load %arg1[%c2_86, %c1_87, %c0_88, %c0_89] : memref<4x5x5x64xbf16, #tpu.memory_space<vmem>>, vector<1x1x4x64xbf16>
    %76 = vector.shape_cast %75 : vector<1x1x4x64xbf16> to vector<4x64xbf16>
    %c12 = arith.constant 12 : index
    %c0_90 = arith.constant 0 : index
    %c0_91 = arith.constant 0 : index
    %77 = vector.load %arg2[%c12, %c0_90, %c0_91] : memref<16x64x128xbf16, #tpu.memory_space<vmem>>, vector<1x64x128xbf16>
    %78 = vector.shape_cast %77 : vector<1x64x128xbf16> to vector<64x128xbf16>
    %cst_92 = arith.constant dense<0.000000e+00> : vector<4x128xf32>
    %79 = tpu.matmul %76, %78, %cst_92 {dimension_numbers = #tpu.dot_dimension_numbers<[1], [0], [0], [1], [0, 0, 1, 1], [], []>} : vector<4x64xbf16>, vector<64x128xbf16>, vector<4x128xf32> -> vector<4x128xf32>
    %80 = arith.addf %74, %79 : vector<4x128xf32>
    %c3_93 = arith.constant 3 : index
    %c1_94 = arith.constant 1 : index
    %c0_95 = arith.constant 0 : index
    %c0_96 = arith.constant 0 : index
    %81 = vector.load %arg1[%c3_93, %c1_94, %c0_95, %c0_96] : memref<4x5x5x64xbf16, #tpu.memory_space<vmem>>, vector<1x1x4x64xbf16>
    %82 = vector.shape_cast %81 : vector<1x1x4x64xbf16> to vector<4x64xbf16>
    %c13 = arith.constant 13 : index
    %c0_97 = arith.constant 0 : index
    %c0_98 = arith.constant 0 : index
    %83 = vector.load %arg2[%c13, %c0_97, %c0_98] : memref<16x64x128xbf16, #tpu.memory_space<vmem>>, vector<1x64x128xbf16>
    %84 = vector.shape_cast %83 : vector<1x64x128xbf16> to vector<64x128xbf16>
    %cst_99 = arith.constant dense<0.000000e+00> : vector<4x128xf32>
    %85 = tpu.matmul %82, %84, %cst_99 {dimension_numbers = #tpu.dot_dimension_numbers<[1], [0], [0], [1], [0, 0, 1, 1], [], []>} : vector<4x64xbf16>, vector<64x128xbf16>, vector<4x128xf32> -> vector<4x128xf32>
    %86 = arith.addf %80, %85 : vector<4x128xf32>
    %c2_100 = arith.constant 2 : index
    %c1_101 = arith.constant 1 : index
    %c1_102 = arith.constant 1 : index
    %c0_103 = arith.constant 0 : index
    %87 = vector.load %arg1[%c2_100, %c1_101, %c1_102, %c0_103] : memref<4x5x5x64xbf16, #tpu.memory_space<vmem>>, vector<1x1x4x64xbf16>
    %88 = vector.shape_cast %87 : vector<1x1x4x64xbf16> to vector<4x64xbf16>
    %c14 = arith.constant 14 : index
    %c0_104 = arith.constant 0 : index
    %c0_105 = arith.constant 0 : index
    %89 = vector.load %arg2[%c14, %c0_104, %c0_105] : memref<16x64x128xbf16, #tpu.memory_space<vmem>>, vector<1x64x128xbf16>
    %90 = vector.shape_cast %89 : vector<1x64x128xbf16> to vector<64x128xbf16>
    %cst_106 = arith.constant dense<0.000000e+00> : vector<4x128xf32>
    %91 = tpu.matmul %88, %90, %cst_106 {dimension_numbers = #tpu.dot_dimension_numbers<[1], [0], [0], [1], [0, 0, 1, 1], [], []>} : vector<4x64xbf16>, vector<64x128xbf16>, vector<4x128xf32> -> vector<4x128xf32>
    %92 = arith.addf %86, %91 : vector<4x128xf32>
    %c3_107 = arith.constant 3 : index
    %c1_108 = arith.constant 1 : index
    %c1_109 = arith.constant 1 : index
    %c0_110 = arith.constant 0 : index
    %93 = vector.load %arg1[%c3_107, %c1_108, %c1_109, %c0_110] : memref<4x5x5x64xbf16, #tpu.memory_space<vmem>>, vector<1x1x4x64xbf16>
    %94 = vector.shape_cast %93 : vector<1x1x4x64xbf16> to vector<4x64xbf16>
    %c15 = arith.constant 15 : index
    %c0_111 = arith.constant 0 : index
    %c0_112 = arith.constant 0 : index
    %95 = vector.load %arg2[%c15, %c0_111, %c0_112] : memref<16x64x128xbf16, #tpu.memory_space<vmem>>, vector<1x64x128xbf16>
    %96 = vector.shape_cast %95 : vector<1x64x128xbf16> to vector<64x128xbf16>
    %cst_113 = arith.constant dense<0.000000e+00> : vector<4x128xf32>
    %97 = tpu.matmul %94, %96, %cst_113 {dimension_numbers = #tpu.dot_dimension_numbers<[1], [0], [0], [1], [0, 0, 1, 1], [], []>} : vector<4x64xbf16>, vector<64x128xbf16>, vector<4x128xf32> -> vector<4x128xf32>
    %98 = arith.addf %92, %97 : vector<4x128xf32>
    %99 = arith.truncf %98 : vector<4x128xf32> to vector<4x128xbf16>
    %c0_114 = arith.constant 0 : index
    %c0_115 = arith.constant 0 : index
    %c0_116 = arith.constant 0 : index
    %c0_117 = arith.constant 0 : index
    %100 = vector.load %arg3[%c0_114, %c0_115, %c0_116, %c0_117] : memref<1x4x4x128xbf16, #tpu.memory_space<vmem>>, vector<1x1x4x128xbf16>
    %101 = vector.shape_cast %100 : vector<1x1x4x128xbf16> to vector<4x128xbf16>
    %102 = vector.shape_cast %99 : vector<4x128xbf16> to vector<1x1x4x128xbf16>
    tpu.vector_store %arg3[%c0_114, %c0_115, %c0_116, %c0_117], %102 {strides = array<i32>} : memref<1x4x4x128xbf16, #tpu.memory_space<vmem>>, vector<1x1x4x128xbf16>,
    %cst_118 = arith.constant dense<0.000000e+00> : vector<128xf32>
    %103 = vector.multi_reduction <add>, %98, %cst_118 [0] : vector<4x128xf32> to vector<128xf32>
    %104 = vector.shape_cast %103 : vector<128xf32> to vector<1x128xf32>
    %105 = arith.addf %0, %104 : vector<1x128xf32>
    %106 = arith.mulf %98, %98 : vector<4x128xf32>
    %cst_119 = arith.constant dense<0.000000e+00> : vector<128xf32>
    %107 = vector.multi_reduction <add>, %106, %cst_119 [0] : vector<4x128xf32> to vector<128xf32>
    %108 = vector.shape_cast %107 : vector<128xf32> to vector<1x128xf32>
    %109 = arith.addf %1, %108 : vector<1x128xf32>
    %cst_120 = arith.constant 0.000000e+00 : f32
    %110 = vector.broadcast %cst_120 : f32 to vector<4x128xf32>
    %c0_121 = arith.constant 0 : index
    %c1_122 = arith.constant 1 : index
    %c0_123 = arith.constant 0 : index
    %c0_124 = arith.constant 0 : index
    %111 = vector.load %arg1[%c0_121, %c1_122, %c0_123, %c0_124] : memref<4x5x5x64xbf16, #tpu.memory_space<vmem>>, vector<1x1x4x64xbf16>
    %112 = vector.shape_cast %111 : vector<1x1x4x64xbf16> to vector<4x64xbf16>
    %c0_125 = arith.constant 0 : index
    %c0_126 = arith.constant 0 : index
    %c0_127 = arith.constant 0 : index
    %113 = vector.load %arg2[%c0_125, %c0_126, %c0_127] : memref<16x64x128xbf16, #tpu.memory_space<vmem>>, vector<1x64x128xbf16>
    %114 = vector.shape_cast %113 : vector<1x64x128xbf16> to vector<64x128xbf16>
    %cst_128 = arith.constant dense<0.000000e+00> : vector<4x128xf32>
    %115 = tpu.matmul %112, %114, %cst_128 {dimension_numbers = #tpu.dot_dimension_numbers<[1], [0], [0], [1], [0, 0, 1, 1], [], []>} : vector<4x64xbf16>, vector<64x128xbf16>, vector<4x128xf32> -> vector<4x128xf32>
    %116 = arith.addf %110, %115 : vector<4x128xf32>
    %c1_129 = arith.constant 1 : index
    %c1_130 = arith.constant 1 : index
    %c0_131 = arith.constant 0 : index
    %c0_132 = arith.constant 0 : index
    %117 = vector.load %arg1[%c1_129, %c1_130, %c0_131, %c0_132] : memref<4x5x5x64xbf16, #tpu.memory_space<vmem>>, vector<1x1x4x64xbf16>
    %118 = vector.shape_cast %117 : vector<1x1x4x64xbf16> to vector<4x64xbf16>
    %c1_133 = arith.constant 1 : index
    %c0_134 = arith.constant 0 : index
    %c0_135 = arith.constant 0 : index
    %119 = vector.load %arg2[%c1_133, %c0_134, %c0_135] : memref<16x64x128xbf16, #tpu.memory_space<vmem>>, vector<1x64x128xbf16>
    %120 = vector.shape_cast %119 : vector<1x64x128xbf16> to vector<64x128xbf16>
    %cst_136 = arith.constant dense<0.000000e+00> : vector<4x128xf32>
    %121 = tpu.matmul %118, %120, %cst_136 {dimension_numbers = #tpu.dot_dimension_numbers<[1], [0], [0], [1], [0, 0, 1, 1], [], []>} : vector<4x64xbf16>, vector<64x128xbf16>, vector<4x128xf32> -> vector<4x128xf32>
    %122 = arith.addf %116, %121 : vector<4x128xf32>
    %c0_137 = arith.constant 0 : index
    %c1_138 = arith.constant 1 : index
    %c1_139 = arith.constant 1 : index
    %c0_140 = arith.constant 0 : index
    %123 = vector.load %arg1[%c0_137, %c1_138, %c1_139, %c0_140] : memref<4x5x5x64xbf16, #tpu.memory_space<vmem>>, vector<1x1x4x64xbf16>
    %124 = vector.shape_cast %123 : vector<1x1x4x64xbf16> to vector<4x64xbf16>
    %c2_141 = arith.constant 2 : index
    %c0_142 = arith.constant 0 : index
    %c0_143 = arith.constant 0 : index
    %125 = vector.load %arg2[%c2_141, %c0_142, %c0_143] : memref<16x64x128xbf16, #tpu.memory_space<vmem>>, vector<1x64x128xbf16>
    %126 = vector.shape_cast %125 : vector<1x64x128xbf16> to vector<64x128xbf16>
    %cst_144 = arith.constant dense<0.000000e+00> : vector<4x128xf32>
    %127 = tpu.matmul %124, %126, %cst_144 {dimension_numbers = #tpu.dot_dimension_numbers<[1], [0], [0], [1], [0, 0, 1, 1], [], []>} : vector<4x64xbf16>, vector<64x128xbf16>, vector<4x128xf32> -> vector<4x128xf32>
    %128 = arith.addf %122, %127 : vector<4x128xf32>
    %c1_145 = arith.constant 1 : index
    %c1_146 = arith.constant 1 : index
    %c1_147 = arith.constant 1 : index
    %c0_148 = arith.constant 0 : index
    %129 = vector.load %arg1[%c1_145, %c1_146, %c1_147, %c0_148] : memref<4x5x5x64xbf16, #tpu.memory_space<vmem>>, vector<1x1x4x64xbf16>
    %130 = vector.shape_cast %129 : vector<1x1x4x64xbf16> to vector<4x64xbf16>
    %c3_149 = arith.constant 3 : index
    %c0_150 = arith.constant 0 : index
    %c0_151 = arith.constant 0 : index
    %131 = vector.load %arg2[%c3_149, %c0_150, %c0_151] : memref<16x64x128xbf16, #tpu.memory_space<vmem>>, vector<1x64x128xbf16>
    %132 = vector.shape_cast %131 : vector<1x64x128xbf16> to vector<64x128xbf16>
    %cst_152 = arith.constant dense<0.000000e+00> : vector<4x128xf32>
    %133 = tpu.matmul %130, %132, %cst_152 {dimension_numbers = #tpu.dot_dimension_numbers<[1], [0], [0], [1], [0, 0, 1, 1], [], []>} : vector<4x64xbf16>, vector<64x128xbf16>, vector<4x128xf32> -> vector<4x128xf32>
    %134 = arith.addf %128, %133 : vector<4x128xf32>
    %c2_153 = arith.constant 2 : index
    %c1_154 = arith.constant 1 : index
    %c0_155 = arith.constant 0 : index
    %c0_156 = arith.constant 0 : index
    %135 = vector.load %arg1[%c2_153, %c1_154, %c0_155, %c0_156] : memref<4x5x5x64xbf16, #tpu.memory_space<vmem>>, vector<1x1x4x64xbf16>
    %136 = vector.shape_cast %135 : vector<1x1x4x64xbf16> to vector<4x64xbf16>
    %c4_157 = arith.constant 4 : index
    %c0_158 = arith.constant 0 : index
    %c0_159 = arith.constant 0 : index
    %137 = vector.load %arg2[%c4_157, %c0_158, %c0_159] : memref<16x64x128xbf16, #tpu.memory_space<vmem>>, vector<1x64x128xbf16>
    %138 = vector.shape_cast %137 : vector<1x64x128xbf16> to vector<64x128xbf16>
    %cst_160 = arith.constant dense<0.000000e+00> : vector<4x128xf32>
    %139 = tpu.matmul %136, %138, %cst_160 {dimension_numbers = #tpu.dot_dimension_numbers<[1], [0], [0], [1], [0, 0, 1, 1], [], []>} : vector<4x64xbf16>, vector<64x128xbf16>, vector<4x128xf32> -> vector<4x128xf32>
    %140 = arith.addf %134, %139 : vector<4x128xf32>
    %c3_161 = arith.constant 3 : index
    %c1_162 = arith.constant 1 : index
    %c0_163 = arith.constant 0 : index
    %c0_164 = arith.constant 0 : index
    %141 = vector.load %arg1[%c3_161, %c1_162, %c0_163, %c0_164] : memref<4x5x5x64xbf16, #tpu.memory_space<vmem>>, vector<1x1x4x64xbf16>
    %142 = vector.shape_cast %141 : vector<1x1x4x64xbf16> to vector<4x64xbf16>
    %c5_165 = arith.constant 5 : index
    %c0_166 = arith.constant 0 : index
    %c0_167 = arith.constant 0 : index
    %143 = vector.load %arg2[%c5_165, %c0_166, %c0_167] : memref<16x64x128xbf16, #tpu.memory_space<vmem>>, vector<1x64x128xbf16>
    %144 = vector.shape_cast %143 : vector<1x64x128xbf16> to vector<64x128xbf16>
    %cst_168 = arith.constant dense<0.000000e+00> : vector<4x128xf32>
    %145 = tpu.matmul %142, %144, %cst_168 {dimension_numbers = #tpu.dot_dimension_numbers<[1], [0], [0], [1], [0, 0, 1, 1], [], []>} : vector<4x64xbf16>, vector<64x128xbf16>, vector<4x128xf32> -> vector<4x128xf32>
    %146 = arith.addf %140, %145 : vector<4x128xf32>
    %c2_169 = arith.constant 2 : index
    %c1_170 = arith.constant 1 : index
    %c1_171 = arith.constant 1 : index
    %c0_172 = arith.constant 0 : index
    %147 = vector.load %arg1[%c2_169, %c1_170, %c1_171, %c0_172] : memref<4x5x5x64xbf16, #tpu.memory_space<vmem>>, vector<1x1x4x64xbf16>
    %148 = vector.shape_cast %147 : vector<1x1x4x64xbf16> to vector<4x64xbf16>
    %c6_173 = arith.constant 6 : index
    %c0_174 = arith.constant 0 : index
    %c0_175 = arith.constant 0 : index
    %149 = vector.load %arg2[%c6_173, %c0_174, %c0_175] : memref<16x64x128xbf16, #tpu.memory_space<vmem>>, vector<1x64x128xbf16>
    %150 = vector.shape_cast %149 : vector<1x64x128xbf16> to vector<64x128xbf16>
    %cst_176 = arith.constant dense<0.000000e+00> : vector<4x128xf32>
    %151 = tpu.matmul %148, %150, %cst_176 {dimension_numbers = #tpu.dot_dimension_numbers<[1], [0], [0], [1], [0, 0, 1, 1], [], []>} : vector<4x64xbf16>, vector<64x128xbf16>, vector<4x128xf32> -> vector<4x128xf32>
    %152 = arith.addf %146, %151 : vector<4x128xf32>
    %c3_177 = arith.constant 3 : index
    %c1_178 = arith.constant 1 : index
    %c1_179 = arith.constant 1 : index
    %c0_180 = arith.constant 0 : index
    %153 = vector.load %arg1[%c3_177, %c1_178, %c1_179, %c0_180] : memref<4x5x5x64xbf16, #tpu.memory_space<vmem>>, vector<1x1x4x64xbf16>
    %154 = vector.shape_cast %153 : vector<1x1x4x64xbf16> to vector<4x64xbf16>
    %c7_181 = arith.constant 7 : index
    %c0_182 = arith.constant 0 : index
    %c0_183 = arith.constant 0 : index
    %155 = vector.load %arg2[%c7_181, %c0_182, %c0_183] : memref<16x64x128xbf16, #tpu.memory_space<vmem>>, vector<1x64x128xbf16>
    %156 = vector.shape_cast %155 : vector<1x64x128xbf16> to vector<64x128xbf16>
    %cst_184 = arith.constant dense<0.000000e+00> : vector<4x128xf32>
    %157 = tpu.matmul %154, %156, %cst_184 {dimension_numbers = #tpu.dot_dimension_numbers<[1], [0], [0], [1], [0, 0, 1, 1], [], []>} : vector<4x64xbf16>, vector<64x128xbf16>, vector<4x128xf32> -> vector<4x128xf32>
    %158 = arith.addf %152, %157 : vector<4x128xf32>
    %c0_185 = arith.constant 0 : index
    %c2_186 = arith.constant 2 : index
    %c0_187 = arith.constant 0 : index
    %c0_188 = arith.constant 0 : index
    %159 = vector.load %arg1[%c0_185, %c2_186, %c0_187, %c0_188] : memref<4x5x5x64xbf16, #tpu.memory_space<vmem>>, vector<1x1x4x64xbf16>
    %160 = vector.shape_cast %159 : vector<1x1x4x64xbf16> to vector<4x64xbf16>
    %c8_189 = arith.constant 8 : index
    %c0_190 = arith.constant 0 : index
    %c0_191 = arith.constant 0 : index
    %161 = vector.load %arg2[%c8_189, %c0_190, %c0_191] : memref<16x64x128xbf16, #tpu.memory_space<vmem>>, vector<1x64x128xbf16>
    %162 = vector.shape_cast %161 : vector<1x64x128xbf16> to vector<64x128xbf16>
    %cst_192 = arith.constant dense<0.000000e+00> : vector<4x128xf32>
    %163 = tpu.matmul %160, %162, %cst_192 {dimension_numbers = #tpu.dot_dimension_numbers<[1], [0], [0], [1], [0, 0, 1, 1], [], []>} : vector<4x64xbf16>, vector<64x128xbf16>, vector<4x128xf32> -> vector<4x128xf32>
    %164 = arith.addf %158, %163 : vector<4x128xf32>
    %c1_193 = arith.constant 1 : index
    %c2_194 = arith.constant 2 : index
    %c0_195 = arith.constant 0 : index
    %c0_196 = arith.constant 0 : index
    %165 = vector.load %arg1[%c1_193, %c2_194, %c0_195, %c0_196] : memref<4x5x5x64xbf16, #tpu.memory_space<vmem>>, vector<1x1x4x64xbf16>
    %166 = vector.shape_cast %165 : vector<1x1x4x64xbf16> to vector<4x64xbf16>
    %c9_197 = arith.constant 9 : index
    %c0_198 = arith.constant 0 : index
    %c0_199 = arith.constant 0 : index
    %167 = vector.load %arg2[%c9_197, %c0_198, %c0_199] : memref<16x64x128xbf16, #tpu.memory_space<vmem>>, vector<1x64x128xbf16>
    %168 = vector.shape_cast %167 : vector<1x64x128xbf16> to vector<64x128xbf16>
    %cst_200 = arith.constant dense<0.000000e+00> : vector<4x128xf32>
    %169 = tpu.matmul %166, %168, %cst_200 {dimension_numbers = #tpu.dot_dimension_numbers<[1], [0], [0], [1], [0, 0, 1, 1], [], []>} : vector<4x64xbf16>, vector<64x128xbf16>, vector<4x128xf32> -> vector<4x128xf32>
    %170 = arith.addf %164, %169 : vector<4x128xf32>
    %c0_201 = arith.constant 0 : index
    %c2_202 = arith.constant 2 : index
    %c1_203 = arith.constant 1 : index
    %c0_204 = arith.constant 0 : index
    %171 = vector.load %arg1[%c0_201, %c2_202, %c1_203, %c0_204] : memref<4x5x5x64xbf16, #tpu.memory_space<vmem>>, vector<1x1x4x64xbf16>
    %172 = vector.shape_cast %171 : vector<1x1x4x64xbf16> to vector<4x64xbf16>
    %c10_205 = arith.constant 10 : index
    %c0_206 = arith.constant 0 : index
    %c0_207 = arith.constant 0 : index
    %173 = vector.load %arg2[%c10_205, %c0_206, %c0_207] : memref<16x64x128xbf16, #tpu.memory_space<vmem>>, vector<1x64x128xbf16>
    %174 = vector.shape_cast %173 : vector<1x64x128xbf16> to vector<64x128xbf16>
    %cst_208 = arith.constant dense<0.000000e+00> : vector<4x128xf32>
    %175 = tpu.matmul %172, %174, %cst_208 {dimension_numbers = #tpu.dot_dimension_numbers<[1], [0], [0], [1], [0, 0, 1, 1], [], []>} : vector<4x64xbf16>, vector<64x128xbf16>, vector<4x128xf32> -> vector<4x128xf32>
    %176 = arith.addf %170, %175 : vector<4x128xf32>
    %c1_209 = arith.constant 1 : index
    %c2_210 = arith.constant 2 : index
    %c1_211 = arith.constant 1 : index
    %c0_212 = arith.constant 0 : index
    %177 = vector.load %arg1[%c1_209, %c2_210, %c1_211, %c0_212] : memref<4x5x5x64xbf16, #tpu.memory_space<vmem>>, vector<1x1x4x64xbf16>
    %178 = vector.shape_cast %177 : vector<1x1x4x64xbf16> to vector<4x64xbf16>
    %c11_213 = arith.constant 11 : index
    %c0_214 = arith.constant 0 : index
    %c0_215 = arith.constant 0 : index
    %179 = vector.load %arg2[%c11_213, %c0_214, %c0_215] : memref<16x64x128xbf16, #tpu.memory_space<vmem>>, vector<1x64x128xbf16>
    %180 = vector.shape_cast %179 : vector<1x64x128xbf16> to vector<64x128xbf16>
    %cst_216 = arith.constant dense<0.000000e+00> : vector<4x128xf32>
    %181 = tpu.matmul %178, %180, %cst_216 {dimension_numbers = #tpu.dot_dimension_numbers<[1], [0], [0], [1], [0, 0, 1, 1], [], []>} : vector<4x64xbf16>, vector<64x128xbf16>, vector<4x128xf32> -> vector<4x128xf32>
    %182 = arith.addf %176, %181 : vector<4x128xf32>
    %c2_217 = arith.constant 2 : index
    %c2_218 = arith.constant 2 : index
    %c0_219 = arith.constant 0 : index
    %c0_220 = arith.constant 0 : index
    %183 = vector.load %arg1[%c2_217, %c2_218, %c0_219, %c0_220] : memref<4x5x5x64xbf16, #tpu.memory_space<vmem>>, vector<1x1x4x64xbf16>
    %184 = vector.shape_cast %183 : vector<1x1x4x64xbf16> to vector<4x64xbf16>
    %c12_221 = arith.constant 12 : index
    %c0_222 = arith.constant 0 : index
    %c0_223 = arith.constant 0 : index
    %185 = vector.load %arg2[%c12_221, %c0_222, %c0_223] : memref<16x64x128xbf16, #tpu.memory_space<vmem>>, vector<1x64x128xbf16>
    %186 = vector.shape_cast %185 : vector<1x64x128xbf16> to vector<64x128xbf16>
    %cst_224 = arith.constant dense<0.000000e+00> : vector<4x128xf32>
    %187 = tpu.matmul %184, %186, %cst_224 {dimension_numbers = #tpu.dot_dimension_numbers<[1], [0], [0], [1], [0, 0, 1, 1], [], []>} : vector<4x64xbf16>, vector<64x128xbf16>, vector<4x128xf32> -> vector<4x128xf32>
    %188 = arith.addf %182, %187 : vector<4x128xf32>
    %c3_225 = arith.constant 3 : index
    %c2_226 = arith.constant 2 : index
    %c0_227 = arith.constant 0 : index
    %c0_228 = arith.constant 0 : index
    %189 = vector.load %arg1[%c3_225, %c2_226, %c0_227, %c0_228] : memref<4x5x5x64xbf16, #tpu.memory_space<vmem>>, vector<1x1x4x64xbf16>
    %190 = vector.shape_cast %189 : vector<1x1x4x64xbf16> to vector<4x64xbf16>
    %c13_229 = arith.constant 13 : index
    %c0_230 = arith.constant 0 : index
    %c0_231 = arith.constant 0 : index
    %191 = vector.load %arg2[%c13_229, %c0_230, %c0_231] : memref<16x64x128xbf16, #tpu.memory_space<vmem>>, vector<1x64x128xbf16>
    %192 = vector.shape_cast %191 : vector<1x64x128xbf16> to vector<64x128xbf16>
    %cst_232 = arith.constant dense<0.000000e+00> : vector<4x128xf32>
    %193 = tpu.matmul %190, %192, %cst_232 {dimension_numbers = #tpu.dot_dimension_numbers<[1], [0], [0], [1], [0, 0, 1, 1], [], []>} : vector<4x64xbf16>, vector<64x128xbf16>, vector<4x128xf32> -> vector<4x128xf32>
    %194 = arith.addf %188, %193 : vector<4x128xf32>
    %c2_233 = arith.constant 2 : index
    %c2_234 = arith.constant 2 : index
    %c1_235 = arith.constant 1 : index
    %c0_236 = arith.constant 0 : index
    %195 = vector.load %arg1[%c2_233, %c2_234, %c1_235, %c0_236] : memref<4x5x5x64xbf16, #tpu.memory_space<vmem>>, vector<1x1x4x64xbf16>
    %196 = vector.shape_cast %195 : vector<1x1x4x64xbf16> to vector<4x64xbf16>
    %c14_237 = arith.constant 14 : index
    %c0_238 = arith.constant 0 : index
    %c0_239 = arith.constant 0 : index
    %197 = vector.load %arg2[%c14_237, %c0_238, %c0_239] : memref<16x64x128xbf16, #tpu.memory_space<vmem>>, vector<1x64x128xbf16>
    %198 = vector.shape_cast %197 : vector<1x64x128xbf16> to vector<64x128xbf16>
    %cst_240 = arith.constant dense<0.000000e+00> : vector<4x128xf32>
    %199 = tpu.matmul %196, %198, %cst_240 {dimension_numbers = #tpu.dot_dimension_numbers<[1], [0], [0], [1], [0, 0, 1, 1], [], []>} : vector<4x64xbf16>, vector<64x128xbf16>, vector<4x128xf32> -> vector<4x128xf32>
    %200 = arith.addf %194, %199 : vector<4x128xf32>
    %c3_241 = arith.constant 3 : index
    %c2_242 = arith.constant 2 : index
    %c1_243 = arith.constant 1 : index
    %c0_244 = arith.constant 0 : index
    %201 = vector.load %arg1[%c3_241, %c2_242, %c1_243, %c0_244] : memref<4x5x5x64xbf16, #tpu.memory_space<vmem>>, vector<1x1x4x64xbf16>
    %202 = vector.shape_cast %201 : vector<1x1x4x64xbf16> to vector<4x64xbf16>
    %c15_245 = arith.constant 15 : index
    %c0_246 = arith.constant 0 : index
    %c0_247 = arith.constant 0 : index
    %203 = vector.load %arg2[%c15_245, %c0_246, %c0_247] : memref<16x64x128xbf16, #tpu.memory_space<vmem>>, vector<1x64x128xbf16>
    %204 = vector.shape_cast %203 : vector<1x64x128xbf16> to vector<64x128xbf16>
    %cst_248 = arith.constant dense<0.000000e+00> : vector<4x128xf32>
    %205 = tpu.matmul %202, %204, %cst_248 {dimension_numbers = #tpu.dot_dimension_numbers<[1], [0], [0], [1], [0, 0, 1, 1], [], []>} : vector<4x64xbf16>, vector<64x128xbf16>, vector<4x128xf32> -> vector<4x128xf32>
    %206 = arith.addf %200, %205 : vector<4x128xf32>
    %207 = arith.truncf %206 : vector<4x128xf32> to vector<4x128xbf16>
    %c0_249 = arith.constant 0 : index
    %c1_250 = arith.constant 1 : index
    %c0_251 = arith.constant 0 : index
    %c0_252 = arith.constant 0 : index
    %208 = vector.load %arg3[%c0_249, %c1_250, %c0_251, %c0_252] : memref<1x4x4x128xbf16, #tpu.memory_space<vmem>>, vector<1x1x4x128xbf16>
    %209 = vector.shape_cast %208 : vector<1x1x4x128xbf16> to vector<4x128xbf16>
    %210 = vector.shape_cast %207 : vector<4x128xbf16> to vector<1x1x4x128xbf16>
    tpu.vector_store %arg3[%c0_249, %c1_250, %c0_251, %c0_252], %210 {strides = array<i32>} : memref<1x4x4x128xbf16, #tpu.memory_space<vmem>>, vector<1x1x4x128xbf16>,
    %cst_253 = arith.constant dense<0.000000e+00> : vector<128xf32>
    %211 = vector.multi_reduction <add>, %206, %cst_253 [0] : vector<4x128xf32> to vector<128xf32>
    %212 = vector.shape_cast %211 : vector<128xf32> to vector<1x128xf32>
    %213 = arith.addf %105, %212 : vector<1x128xf32>
    %214 = arith.mulf %206, %206 : vector<4x128xf32>
    %cst_254 = arith.constant dense<0.000000e+00> : vector<128xf32>
    %215 = vector.multi_reduction <add>, %214, %cst_254 [0] : vector<4x128xf32> to vector<128xf32>
    %216 = vector.shape_cast %215 : vector<128xf32> to vector<1x128xf32>
    %217 = arith.addf %109, %216 : vector<1x128xf32>
    %cst_255 = arith.constant 0.000000e+00 : f32
    %218 = vector.broadcast %cst_255 : f32 to vector<4x128xf32>
    %c0_256 = arith.constant 0 : index
    %c2_257 = arith.constant 2 : index
    %c0_258 = arith.constant 0 : index
    %c0_259 = arith.constant 0 : index
    %219 = vector.load %arg1[%c0_256, %c2_257, %c0_258, %c0_259] : memref<4x5x5x64xbf16, #tpu.memory_space<vmem>>, vector<1x1x4x64xbf16>
    %220 = vector.shape_cast %219 : vector<1x1x4x64xbf16> to vector<4x64xbf16>
    %c0_260 = arith.constant 0 : index
    %c0_261 = arith.constant 0 : index
    %c0_262 = arith.constant 0 : index
    %221 = vector.load %arg2[%c0_260, %c0_261, %c0_262] : memref<16x64x128xbf16, #tpu.memory_space<vmem>>, vector<1x64x128xbf16>
    %222 = vector.shape_cast %221 : vector<1x64x128xbf16> to vector<64x128xbf16>
    %cst_263 = arith.constant dense<0.000000e+00> : vector<4x128xf32>
    %223 = tpu.matmul %220, %222, %cst_263 {dimension_numbers = #tpu.dot_dimension_numbers<[1], [0], [0], [1], [0, 0, 1, 1], [], []>} : vector<4x64xbf16>, vector<64x128xbf16>, vector<4x128xf32> -> vector<4x128xf32>
    %224 = arith.addf %218, %223 : vector<4x128xf32>
    %c1_264 = arith.constant 1 : index
    %c2_265 = arith.constant 2 : index
    %c0_266 = arith.constant 0 : index
    %c0_267 = arith.constant 0 : index
    %225 = vector.load %arg1[%c1_264, %c2_265, %c0_266, %c0_267] : memref<4x5x5x64xbf16, #tpu.memory_space<vmem>>, vector<1x1x4x64xbf16>
    %226 = vector.shape_cast %225 : vector<1x1x4x64xbf16> to vector<4x64xbf16>
    %c1_268 = arith.constant 1 : index
    %c0_269 = arith.constant 0 : index
    %c0_270 = arith.constant 0 : index
    %227 = vector.load %arg2[%c1_268, %c0_269, %c0_270] : memref<16x64x128xbf16, #tpu.memory_space<vmem>>, vector<1x64x128xbf16>
    %228 = vector.shape_cast %227 : vector<1x64x128xbf16> to vector<64x128xbf16>
    %cst_271 = arith.constant dense<0.000000e+00> : vector<4x128xf32>
    %229 = tpu.matmul %226, %228, %cst_271 {dimension_numbers = #tpu.dot_dimension_numbers<[1], [0], [0], [1], [0, 0, 1, 1], [], []>} : vector<4x64xbf16>, vector<64x128xbf16>, vector<4x128xf32> -> vector<4x128xf32>
    %230 = arith.addf %224, %229 : vector<4x128xf32>
    %c0_272 = arith.constant 0 : index
    %c2_273 = arith.constant 2 : index
    %c1_274 = arith.constant 1 : index
    %c0_275 = arith.constant 0 : index
    %231 = vector.load %arg1[%c0_272, %c2_273, %c1_274, %c0_275] : memref<4x5x5x64xbf16, #tpu.memory_space<vmem>>, vector<1x1x4x64xbf16>
    %232 = vector.shape_cast %231 : vector<1x1x4x64xbf16> to vector<4x64xbf16>
    %c2_276 = arith.constant 2 : index
    %c0_277 = arith.constant 0 : index
    %c0_278 = arith.constant 0 : index
    %233 = vector.load %arg2[%c2_276, %c0_277, %c0_278] : memref<16x64x128xbf16, #tpu.memory_space<vmem>>, vector<1x64x128xbf16>
    %234 = vector.shape_cast %233 : vector<1x64x128xbf16> to vector<64x128xbf16>
    %cst_279 = arith.constant dense<0.000000e+00> : vector<4x128xf32>
    %235 = tpu.matmul %232, %234, %cst_279 {dimension_numbers = #tpu.dot_dimension_numbers<[1], [0], [0], [1], [0, 0, 1, 1], [], []>} : vector<4x64xbf16>, vector<64x128xbf16>, vector<4x128xf32> -> vector<4x128xf32>
    %236 = arith.addf %230, %235 : vector<4x128xf32>
    %c1_280 = arith.constant 1 : index
    %c2_281 = arith.constant 2 : index
    %c1_282 = arith.constant 1 : index
    %c0_283 = arith.constant 0 : index
    %237 = vector.load %arg1[%c1_280, %c2_281, %c1_282, %c0_283] : memref<4x5x5x64xbf16, #tpu.memory_space<vmem>>, vector<1x1x4x64xbf16>
    %238 = vector.shape_cast %237 : vector<1x1x4x64xbf16> to vector<4x64xbf16>
    %c3_284 = arith.constant 3 : index
    %c0_285 = arith.constant 0 : index
    %c0_286 = arith.constant 0 : index
    %239 = vector.load %arg2[%c3_284, %c0_285, %c0_286] : memref<16x64x128xbf16, #tpu.memory_space<vmem>>, vector<1x64x128xbf16>
    %240 = vector.shape_cast %239 : vector<1x64x128xbf16> to vector<64x128xbf16>
    %cst_287 = arith.constant dense<0.000000e+00> : vector<4x128xf32>
    %241 = tpu.matmul %238, %240, %cst_287 {dimension_numbers = #tpu.dot_dimension_numbers<[1], [0], [0], [1], [0, 0, 1, 1], [], []>} : vector<4x64xbf16>, vector<64x128xbf16>, vector<4x128xf32> -> vector<4x128xf32>
    %242 = arith.addf %236, %241 : vector<4x128xf32>
    %c2_288 = arith.constant 2 : index
    %c2_289 = arith.constant 2 : index
    %c0_290 = arith.constant 0 : index
    %c0_291 = arith.constant 0 : index
    %243 = vector.load %arg1[%c2_288, %c2_289, %c0_290, %c0_291] : memref<4x5x5x64xbf16, #tpu.memory_space<vmem>>, vector<1x1x4x64xbf16>
    %244 = vector.shape_cast %243 : vector<1x1x4x64xbf16> to vector<4x64xbf16>
    %c4_292 = arith.constant 4 : index
    %c0_293 = arith.constant 0 : index
    %c0_294 = arith.constant 0 : index
    %245 = vector.load %arg2[%c4_292, %c0_293, %c0_294] : memref<16x64x128xbf16, #tpu.memory_space<vmem>>, vector<1x64x128xbf16>
    %246 = vector.shape_cast %245 : vector<1x64x128xbf16> to vector<64x128xbf16>
    %cst_295 = arith.constant dense<0.000000e+00> : vector<4x128xf32>
    %247 = tpu.matmul %244, %246, %cst_295 {dimension_numbers = #tpu.dot_dimension_numbers<[1], [0], [0], [1], [0, 0, 1, 1], [], []>} : vector<4x64xbf16>, vector<64x128xbf16>, vector<4x128xf32> -> vector<4x128xf32>
    %248 = arith.addf %242, %247 : vector<4x128xf32>
    %c3_296 = arith.constant 3 : index
    %c2_297 = arith.constant 2 : index
    %c0_298 = arith.constant 0 : index
    %c0_299 = arith.constant 0 : index
    %249 = vector.load %arg1[%c3_296, %c2_297, %c0_298, %c0_299] : memref<4x5x5x64xbf16, #tpu.memory_space<vmem>>, vector<1x1x4x64xbf16>
    %250 = vector.shape_cast %249 : vector<1x1x4x64xbf16> to vector<4x64xbf16>
    %c5_300 = arith.constant 5 : index
    %c0_301 = arith.constant 0 : index
    %c0_302 = arith.constant 0 : index
    %251 = vector.load %arg2[%c5_300, %c0_301, %c0_302] : memref<16x64x128xbf16, #tpu.memory_space<vmem>>, vector<1x64x128xbf16>
    %252 = vector.shape_cast %251 : vector<1x64x128xbf16> to vector<64x128xbf16>
    %cst_303 = arith.constant dense<0.000000e+00> : vector<4x128xf32>
    %253 = tpu.matmul %250, %252, %cst_303 {dimension_numbers = #tpu.dot_dimension_numbers<[1], [0], [0], [1], [0, 0, 1, 1], [], []>} : vector<4x64xbf16>, vector<64x128xbf16>, vector<4x128xf32> -> vector<4x128xf32>
    %254 = arith.addf %248, %253 : vector<4x128xf32>
    %c2_304 = arith.constant 2 : index
    %c2_305 = arith.constant 2 : index
    %c1_306 = arith.constant 1 : index
    %c0_307 = arith.constant 0 : index
    %255 = vector.load %arg1[%c2_304, %c2_305, %c1_306, %c0_307] : memref<4x5x5x64xbf16, #tpu.memory_space<vmem>>, vector<1x1x4x64xbf16>
    %256 = vector.shape_cast %255 : vector<1x1x4x64xbf16> to vector<4x64xbf16>
    %c6_308 = arith.constant 6 : index
    %c0_309 = arith.constant 0 : index
    %c0_310 = arith.constant 0 : index
    %257 = vector.load %arg2[%c6_308, %c0_309, %c0_310] : memref<16x64x128xbf16, #tpu.memory_space<vmem>>, vector<1x64x128xbf16>
    %258 = vector.shape_cast %257 : vector<1x64x128xbf16> to vector<64x128xbf16>
    %cst_311 = arith.constant dense<0.000000e+00> : vector<4x128xf32>
    %259 = tpu.matmul %256, %258, %cst_311 {dimension_numbers = #tpu.dot_dimension_numbers<[1], [0], [0], [1], [0, 0, 1, 1], [], []>} : vector<4x64xbf16>, vector<64x128xbf16>, vector<4x128xf32> -> vector<4x128xf32>
    %260 = arith.addf %254, %259 : vector<4x128xf32>
    %c3_312 = arith.constant 3 : index
    %c2_313 = arith.constant 2 : index
    %c1_314 = arith.constant 1 : index
    %c0_315 = arith.constant 0 : index
    %261 = vector.load %arg1[%c3_312, %c2_313, %c1_314, %c0_315] : memref<4x5x5x64xbf16, #tpu.memory_space<vmem>>, vector<1x1x4x64xbf16>
    %262 = vector.shape_cast %261 : vector<1x1x4x64xbf16> to vector<4x64xbf16>
    %c7_316 = arith.constant 7 : index
    %c0_317 = arith.constant 0 : index
    %c0_318 = arith.constant 0 : index
    %263 = vector.load %arg2[%c7_316, %c0_317, %c0_318] : memref<16x64x128xbf16, #tpu.memory_space<vmem>>, vector<1x64x128xbf16>
    %264 = vector.shape_cast %263 : vector<1x64x128xbf16> to vector<64x128xbf16>
    %cst_319 = arith.constant dense<0.000000e+00> : vector<4x128xf32>
    %265 = tpu.matmul %262, %264, %cst_319 {dimension_numbers = #tpu.dot_dimension_numbers<[1], [0], [0], [1], [0, 0, 1, 1], [], []>} : vector<4x64xbf16>, vector<64x128xbf16>, vector<4x128xf32> -> vector<4x128xf32>
    %266 = arith.addf %260, %265 : vector<4x128xf32>
    %c0_320 = arith.constant 0 : index
    %c3_321 = arith.constant 3 : index
    %c0_322 = arith.constant 0 : index
    %c0_323 = arith.constant 0 : index
    %267 = vector.load %arg1[%c0_320, %c3_321, %c0_322, %c0_323] : memref<4x5x5x64xbf16, #tpu.memory_space<vmem>>, vector<1x1x4x64xbf16>
    %268 = vector.shape_cast %267 : vector<1x1x4x64xbf16> to vector<4x64xbf16>
    %c8_324 = arith.constant 8 : index
    %c0_325 = arith.constant 0 : index
    %c0_326 = arith.constant 0 : index
    %269 = vector.load %arg2[%c8_324, %c0_325, %c0_326] : memref<16x64x128xbf16, #tpu.memory_space<vmem>>, vector<1x64x128xbf16>
    %270 = vector.shape_cast %269 : vector<1x64x128xbf16> to vector<64x128xbf16>
    %cst_327 = arith.constant dense<0.000000e+00> : vector<4x128xf32>
    %271 = tpu.matmul %268, %270, %cst_327 {dimension_numbers = #tpu.dot_dimension_numbers<[1], [0], [0], [1], [0, 0, 1, 1], [], []>} : vector<4x64xbf16>, vector<64x128xbf16>, vector<4x128xf32> -> vector<4x128xf32>
    %272 = arith.addf %266, %271 : vector<4x128xf32>
    %c1_328 = arith.constant 1 : index
    %c3_329 = arith.constant 3 : index
    %c0_330 = arith.constant 0 : index
    %c0_331 = arith.constant 0 : index
    %273 = vector.load %arg1[%c1_328, %c3_329, %c0_330, %c0_331] : memref<4x5x5x64xbf16, #tpu.memory_space<vmem>>, vector<1x1x4x64xbf16>
    %274 = vector.shape_cast %273 : vector<1x1x4x64xbf16> to vector<4x64xbf16>
    %c9_332 = arith.constant 9 : index
    %c0_333 = arith.constant 0 : index
    %c0_334 = arith.constant 0 : index
    %275 = vector.load %arg2[%c9_332, %c0_333, %c0_334] : memref<16x64x128xbf16, #tpu.memory_space<vmem>>, vector<1x64x128xbf16>
    %276 = vector.shape_cast %275 : vector<1x64x128xbf16> to vector<64x128xbf16>
    %cst_335 = arith.constant dense<0.000000e+00> : vector<4x128xf32>
    %277 = tpu.matmul %274, %276, %cst_335 {dimension_numbers = #tpu.dot_dimension_numbers<[1], [0], [0], [1], [0, 0, 1, 1], [], []>} : vector<4x64xbf16>, vector<64x128xbf16>, vector<4x128xf32> -> vector<4x128xf32>
    %278 = arith.addf %272, %277 : vector<4x128xf32>
    %c0_336 = arith.constant 0 : index
    %c3_337 = arith.constant 3 : index
    %c1_338 = arith.constant 1 : index
    %c0_339 = arith.constant 0 : index
    %279 = vector.load %arg1[%c0_336, %c3_337, %c1_338, %c0_339] : memref<4x5x5x64xbf16, #tpu.memory_space<vmem>>, vector<1x1x4x64xbf16>
    %280 = vector.shape_cast %279 : vector<1x1x4x64xbf16> to vector<4x64xbf16>
    %c10_340 = arith.constant 10 : index
    %c0_341 = arith.constant 0 : index
    %c0_342 = arith.constant 0 : index
    %281 = vector.load %arg2[%c10_340, %c0_341, %c0_342] : memref<16x64x128xbf16, #tpu.memory_space<vmem>>, vector<1x64x128xbf16>
    %282 = vector.shape_cast %281 : vector<1x64x128xbf16> to vector<64x128xbf16>
    %cst_343 = arith.constant dense<0.000000e+00> : vector<4x128xf32>
    %283 = tpu.matmul %280, %282, %cst_343 {dimension_numbers = #tpu.dot_dimension_numbers<[1], [0], [0], [1], [0, 0, 1, 1], [], []>} : vector<4x64xbf16>, vector<64x128xbf16>, vector<4x128xf32> -> vector<4x128xf32>
    %284 = arith.addf %278, %283 : vector<4x128xf32>
    %c1_344 = arith.constant 1 : index
    %c3_345 = arith.constant 3 : index
    %c1_346 = arith.constant 1 : index
    %c0_347 = arith.constant 0 : index
    %285 = vector.load %arg1[%c1_344, %c3_345, %c1_346, %c0_347] : memref<4x5x5x64xbf16, #tpu.memory_space<vmem>>, vector<1x1x4x64xbf16>
    %286 = vector.shape_cast %285 : vector<1x1x4x64xbf16> to vector<4x64xbf16>
    %c11_348 = arith.constant 11 : index
    %c0_349 = arith.constant 0 : index
    %c0_350 = arith.constant 0 : index
    %287 = vector.load %arg2[%c11_348, %c0_349, %c0_350] : memref<16x64x128xbf16, #tpu.memory_space<vmem>>, vector<1x64x128xbf16>
    %288 = vector.shape_cast %287 : vector<1x64x128xbf16> to vector<64x128xbf16>
    %cst_351 = arith.constant dense<0.000000e+00> : vector<4x128xf32>
    %289 = tpu.matmul %286, %288, %cst_351 {dimension_numbers = #tpu.dot_dimension_numbers<[1], [0], [0], [1], [0, 0, 1, 1], [], []>} : vector<4x64xbf16>, vector<64x128xbf16>, vector<4x128xf32> -> vector<4x128xf32>
    %290 = arith.addf %284, %289 : vector<4x128xf32>
    %c2_352 = arith.constant 2 : index
    %c3_353 = arith.constant 3 : index
    %c0_354 = arith.constant 0 : index
    %c0_355 = arith.constant 0 : index
    %291 = vector.load %arg1[%c2_352, %c3_353, %c0_354, %c0_355] : memref<4x5x5x64xbf16, #tpu.memory_space<vmem>>, vector<1x1x4x64xbf16>
    %292 = vector.shape_cast %291 : vector<1x1x4x64xbf16> to vector<4x64xbf16>
    %c12_356 = arith.constant 12 : index
    %c0_357 = arith.constant 0 : index
    %c0_358 = arith.constant 0 : index
    %293 = vector.load %arg2[%c12_356, %c0_357, %c0_358] : memref<16x64x128xbf16, #tpu.memory_space<vmem>>, vector<1x64x128xbf16>
    %294 = vector.shape_cast %293 : vector<1x64x128xbf16> to vector<64x128xbf16>
    %cst_359 = arith.constant dense<0.000000e+00> : vector<4x128xf32>
    %295 = tpu.matmul %292, %294, %cst_359 {dimension_numbers = #tpu.dot_dimension_numbers<[1], [0], [0], [1], [0, 0, 1, 1], [], []>} : vector<4x64xbf16>, vector<64x128xbf16>, vector<4x128xf32> -> vector<4x128xf32>
    %296 = arith.addf %290, %295 : vector<4x128xf32>
    %c3_360 = arith.constant 3 : index
    %c3_361 = arith.constant 3 : index
    %c0_362 = arith.constant 0 : index
    %c0_363 = arith.constant 0 : index
    %297 = vector.load %arg1[%c3_360, %c3_361, %c0_362, %c0_363] : memref<4x5x5x64xbf16, #tpu.memory_space<vmem>>, vector<1x1x4x64xbf16>
    %298 = vector.shape_cast %297 : vector<1x1x4x64xbf16> to vector<4x64xbf16>
    %c13_364 = arith.constant 13 : index
    %c0_365 = arith.constant 0 : index
    %c0_366 = arith.constant 0 : index
    %299 = vector.load %arg2[%c13_364, %c0_365, %c0_366] : memref<16x64x128xbf16, #tpu.memory_space<vmem>>, vector<1x64x128xbf16>
    %300 = vector.shape_cast %299 : vector<1x64x128xbf16> to vector<64x128xbf16>
    %cst_367 = arith.constant dense<0.000000e+00> : vector<4x128xf32>
    %301 = tpu.matmul %298, %300, %cst_367 {dimension_numbers = #tpu.dot_dimension_numbers<[1], [0], [0], [1], [0, 0, 1, 1], [], []>} : vector<4x64xbf16>, vector<64x128xbf16>, vector<4x128xf32> -> vector<4x128xf32>
    %302 = arith.addf %296, %301 : vector<4x128xf32>
    %c2_368 = arith.constant 2 : index
    %c3_369 = arith.constant 3 : index
    %c1_370 = arith.constant 1 : index
    %c0_371 = arith.constant 0 : index
    %303 = vector.load %arg1[%c2_368, %c3_369, %c1_370, %c0_371] : memref<4x5x5x64xbf16, #tpu.memory_space<vmem>>, vector<1x1x4x64xbf16>
    %304 = vector.shape_cast %303 : vector<1x1x4x64xbf16> to vector<4x64xbf16>
    %c14_372 = arith.constant 14 : index
    %c0_373 = arith.constant 0 : index
    %c0_374 = arith.constant 0 : index
    %305 = vector.load %arg2[%c14_372, %c0_373, %c0_374] : memref<16x64x128xbf16, #tpu.memory_space<vmem>>, vector<1x64x128xbf16>
    %306 = vector.shape_cast %305 : vector<1x64x128xbf16> to vector<64x128xbf16>
    %cst_375 = arith.constant dense<0.000000e+00> : vector<4x128xf32>
    %307 = tpu.matmul %304, %306, %cst_375 {dimension_numbers = #tpu.dot_dimension_numbers<[1], [0], [0], [1], [0, 0, 1, 1], [], []>} : vector<4x64xbf16>, vector<64x128xbf16>, vector<4x128xf32> -> vector<4x128xf32>
    %308 = arith.addf %302, %307 : vector<4x128xf32>
    %c3_376 = arith.constant 3 : index
    %c3_377 = arith.constant 3 : index
    %c1_378 = arith.constant 1 : index
    %c0_379 = arith.constant 0 : index
    %309 = vector.load %arg1[%c3_376, %c3_377, %c1_378, %c0_379] : memref<4x5x5x64xbf16, #tpu.memory_space<vmem>>, vector<1x1x4x64xbf16>
    %310 = vector.shape_cast %309 : vector<1x1x4x64xbf16> to vector<4x64xbf16>
    %c15_380 = arith.constant 15 : index
    %c0_381 = arith.constant 0 : index
    %c0_382 = arith.constant 0 : index
    %311 = vector.load %arg2[%c15_380, %c0_381, %c0_382] : memref<16x64x128xbf16, #tpu.memory_space<vmem>>, vector<1x64x128xbf16>
    %312 = vector.shape_cast %311 : vector<1x64x128xbf16> to vector<64x128xbf16>
    %cst_383 = arith.constant dense<0.000000e+00> : vector<4x128xf32>
    %313 = tpu.matmul %310, %312, %cst_383 {dimension_numbers = #tpu.dot_dimension_numbers<[1], [0], [0], [1], [0, 0, 1, 1], [], []>} : vector<4x64xbf16>, vector<64x128xbf16>, vector<4x128xf32> -> vector<4x128xf32>
    %314 = arith.addf %308, %313 : vector<4x128xf32>
    %315 = arith.truncf %314 : vector<4x128xf32> to vector<4x128xbf16>
    %c0_384 = arith.constant 0 : index
    %c2_385 = arith.constant 2 : index
    %c0_386 = arith.constant 0 : index
    %c0_387 = arith.constant 0 : index
    %316 = vector.load %arg3[%c0_384, %c2_385, %c0_386, %c0_387] : memref<1x4x4x128xbf16, #tpu.memory_space<vmem>>, vector<1x1x4x128xbf16>
    %317 = vector.shape_cast %316 : vector<1x1x4x128xbf16> to vector<4x128xbf16>
    %318 = vector.shape_cast %315 : vector<4x128xbf16> to vector<1x1x4x128xbf16>
    tpu.vector_store %arg3[%c0_384, %c2_385, %c0_386, %c0_387], %318 {strides = array<i32>} : memref<1x4x4x128xbf16, #tpu.memory_space<vmem>>, vector<1x1x4x128xbf16>,
    %cst_388 = arith.constant dense<0.000000e+00> : vector<128xf32>
    %319 = vector.multi_reduction <add>, %314, %cst_388 [0] : vector<4x128xf32> to vector<128xf32>
    %320 = vector.shape_cast %319 : vector<128xf32> to vector<1x128xf32>
    %321 = arith.addf %213, %320 : vector<1x128xf32>
    %322 = arith.mulf %314, %314 : vector<4x128xf32>
    %cst_389 = arith.constant dense<0.000000e+00> : vector<128xf32>
    %323 = vector.multi_reduction <add>, %322, %cst_389 [0] : vector<4x128xf32> to vector<128xf32>
    %324 = vector.shape_cast %323 : vector<128xf32> to vector<1x128xf32>
    %325 = arith.addf %217, %324 : vector<1x128xf32>
    %cst_390 = arith.constant 0.000000e+00 : f32
    %326 = vector.broadcast %cst_390 : f32 to vector<4x128xf32>
    %c0_391 = arith.constant 0 : index
    %c3_392 = arith.constant 3 : index
    %c0_393 = arith.constant 0 : index
    %c0_394 = arith.constant 0 : index
    %327 = vector.load %arg1[%c0_391, %c3_392, %c0_393, %c0_394] : memref<4x5x5x64xbf16, #tpu.memory_space<vmem>>, vector<1x1x4x64xbf16>
    %328 = vector.shape_cast %327 : vector<1x1x4x64xbf16> to vector<4x64xbf16>
    %c0_395 = arith.constant 0 : index
    %c0_396 = arith.constant 0 : index
    %c0_397 = arith.constant 0 : index
    %329 = vector.load %arg2[%c0_395, %c0_396, %c0_397] : memref<16x64x128xbf16, #tpu.memory_space<vmem>>, vector<1x64x128xbf16>
    %330 = vector.shape_cast %329 : vector<1x64x128xbf16> to vector<64x128xbf16>
    %cst_398 = arith.constant dense<0.000000e+00> : vector<4x128xf32>
    %331 = tpu.matmul %328, %330, %cst_398 {dimension_numbers = #tpu.dot_dimension_numbers<[1], [0], [0], [1], [0, 0, 1, 1], [], []>} : vector<4x64xbf16>, vector<64x128xbf16>, vector<4x128xf32> -> vector<4x128xf32>
    %332 = arith.addf %326, %331 : vector<4x128xf32>
    %c1_399 = arith.constant 1 : index
    %c3_400 = arith.constant 3 : index
    %c0_401 = arith.constant 0 : index
    %c0_402 = arith.constant 0 : index
    %333 = vector.load %arg1[%c1_399, %c3_400, %c0_401, %c0_402] : memref<4x5x5x64xbf16, #tpu.memory_space<vmem>>, vector<1x1x4x64xbf16>
    %334 = vector.shape_cast %333 : vector<1x1x4x64xbf16> to vector<4x64xbf16>
    %c1_403 = arith.constant 1 : index
    %c0_404 = arith.constant 0 : index
    %c0_405 = arith.constant 0 : index
    %335 = vector.load %arg2[%c1_403, %c0_404, %c0_405] : memref<16x64x128xbf16, #tpu.memory_space<vmem>>, vector<1x64x128xbf16>
    %336 = vector.shape_cast %335 : vector<1x64x128xbf16> to vector<64x128xbf16>
    %cst_406 = arith.constant dense<0.000000e+00> : vector<4x128xf32>
    %337 = tpu.matmul %334, %336, %cst_406 {dimension_numbers = #tpu.dot_dimension_numbers<[1], [0], [0], [1], [0, 0, 1, 1], [], []>} : vector<4x64xbf16>, vector<64x128xbf16>, vector<4x128xf32> -> vector<4x128xf32>
    %338 = arith.addf %332, %337 : vector<4x128xf32>
    %c0_407 = arith.constant 0 : index
    %c3_408 = arith.constant 3 : index
    %c1_409 = arith.constant 1 : index
    %c0_410 = arith.constant 0 : index
    %339 = vector.load %arg1[%c0_407, %c3_408, %c1_409, %c0_410] : memref<4x5x5x64xbf16, #tpu.memory_space<vmem>>, vector<1x1x4x64xbf16>
    %340 = vector.shape_cast %339 : vector<1x1x4x64xbf16> to vector<4x64xbf16>
    %c2_411 = arith.constant 2 : index
    %c0_412 = arith.constant 0 : index
    %c0_413 = arith.constant 0 : index
    %341 = vector.load %arg2[%c2_411, %c0_412, %c0_413] : memref<16x64x128xbf16, #tpu.memory_space<vmem>>, vector<1x64x128xbf16>
    %342 = vector.shape_cast %341 : vector<1x64x128xbf16> to vector<64x128xbf16>
    %cst_414 = arith.constant dense<0.000000e+00> : vector<4x128xf32>
    %343 = tpu.matmul %340, %342, %cst_414 {dimension_numbers = #tpu.dot_dimension_numbers<[1], [0], [0], [1], [0, 0, 1, 1], [], []>} : vector<4x64xbf16>, vector<64x128xbf16>, vector<4x128xf32> -> vector<4x128xf32>
    %344 = arith.addf %338, %343 : vector<4x128xf32>
    %c1_415 = arith.constant 1 : index
    %c3_416 = arith.constant 3 : index
    %c1_417 = arith.constant 1 : index
    %c0_418 = arith.constant 0 : index
    %345 = vector.load %arg1[%c1_415, %c3_416, %c1_417, %c0_418] : memref<4x5x5x64xbf16, #tpu.memory_space<vmem>>, vector<1x1x4x64xbf16>
    %346 = vector.shape_cast %345 : vector<1x1x4x64xbf16> to vector<4x64xbf16>
    %c3_419 = arith.constant 3 : index
    %c0_420 = arith.constant 0 : index
    %c0_421 = arith.constant 0 : index
    %347 = vector.load %arg2[%c3_419, %c0_420, %c0_421] : memref<16x64x128xbf16, #tpu.memory_space<vmem>>, vector<1x64x128xbf16>
    %348 = vector.shape_cast %347 : vector<1x64x128xbf16> to vector<64x128xbf16>
    %cst_422 = arith.constant dense<0.000000e+00> : vector<4x128xf32>
    %349 = tpu.matmul %346, %348, %cst_422 {dimension_numbers = #tpu.dot_dimension_numbers<[1], [0], [0], [1], [0, 0, 1, 1], [], []>} : vector<4x64xbf16>, vector<64x128xbf16>, vector<4x128xf32> -> vector<4x128xf32>
    %350 = arith.addf %344, %349 : vector<4x128xf32>
    %c2_423 = arith.constant 2 : index
    %c3_424 = arith.constant 3 : index
    %c0_425 = arith.constant 0 : index
    %c0_426 = arith.constant 0 : index
    %351 = vector.load %arg1[%c2_423, %c3_424, %c0_425, %c0_426] : memref<4x5x5x64xbf16, #tpu.memory_space<vmem>>, vector<1x1x4x64xbf16>
    %352 = vector.shape_cast %351 : vector<1x1x4x64xbf16> to vector<4x64xbf16>
    %c4_427 = arith.constant 4 : index
    %c0_428 = arith.constant 0 : index
    %c0_429 = arith.constant 0 : index
    %353 = vector.load %arg2[%c4_427, %c0_428, %c0_429] : memref<16x64x128xbf16, #tpu.memory_space<vmem>>, vector<1x64x128xbf16>
    %354 = vector.shape_cast %353 : vector<1x64x128xbf16> to vector<64x128xbf16>
    %cst_430 = arith.constant dense<0.000000e+00> : vector<4x128xf32>
    %355 = tpu.matmul %352, %354, %cst_430 {dimension_numbers = #tpu.dot_dimension_numbers<[1], [0], [0], [1], [0, 0, 1, 1], [], []>} : vector<4x64xbf16>, vector<64x128xbf16>, vector<4x128xf32> -> vector<4x128xf32>
    %356 = arith.addf %350, %355 : vector<4x128xf32>
    %c3_431 = arith.constant 3 : index
    %c3_432 = arith.constant 3 : index
    %c0_433 = arith.constant 0 : index
    %c0_434 = arith.constant 0 : index
    %357 = vector.load %arg1[%c3_431, %c3_432, %c0_433, %c0_434] : memref<4x5x5x64xbf16, #tpu.memory_space<vmem>>, vector<1x1x4x64xbf16>
    %358 = vector.shape_cast %357 : vector<1x1x4x64xbf16> to vector<4x64xbf16>
    %c5_435 = arith.constant 5 : index
    %c0_436 = arith.constant 0 : index
    %c0_437 = arith.constant 0 : index
    %359 = vector.load %arg2[%c5_435, %c0_436, %c0_437] : memref<16x64x128xbf16, #tpu.memory_space<vmem>>, vector<1x64x128xbf16>
    %360 = vector.shape_cast %359 : vector<1x64x128xbf16> to vector<64x128xbf16>
    %cst_438 = arith.constant dense<0.000000e+00> : vector<4x128xf32>
    %361 = tpu.matmul %358, %360, %cst_438 {dimension_numbers = #tpu.dot_dimension_numbers<[1], [0], [0], [1], [0, 0, 1, 1], [], []>} : vector<4x64xbf16>, vector<64x128xbf16>, vector<4x128xf32> -> vector<4x128xf32>
    %362 = arith.addf %356, %361 : vector<4x128xf32>
    %c2_439 = arith.constant 2 : index
    %c3_440 = arith.constant 3 : index
    %c1_441 = arith.constant 1 : index
    %c0_442 = arith.constant 0 : index
    %363 = vector.load %arg1[%c2_439, %c3_440, %c1_441, %c0_442] : memref<4x5x5x64xbf16, #tpu.memory_space<vmem>>, vector<1x1x4x64xbf16>
    %364 = vector.shape_cast %363 : vector<1x1x4x64xbf16> to vector<4x64xbf16>
    %c6_443 = arith.constant 6 : index
    %c0_444 = arith.constant 0 : index
    %c0_445 = arith.constant 0 : index
    %365 = vector.load %arg2[%c6_443, %c0_444, %c0_445] : memref<16x64x128xbf16, #tpu.memory_space<vmem>>, vector<1x64x128xbf16>
    %366 = vector.shape_cast %365 : vector<1x64x128xbf16> to vector<64x128xbf16>
    %cst_446 = arith.constant dense<0.000000e+00> : vector<4x128xf32>
    %367 = tpu.matmul %364, %366, %cst_446 {dimension_numbers = #tpu.dot_dimension_numbers<[1], [0], [0], [1], [0, 0, 1, 1], [], []>} : vector<4x64xbf16>, vector<64x128xbf16>, vector<4x128xf32> -> vector<4x128xf32>
    %368 = arith.addf %362, %367 : vector<4x128xf32>
    %c3_447 = arith.constant 3 : index
    %c3_448 = arith.constant 3 : index
    %c1_449 = arith.constant 1 : index
    %c0_450 = arith.constant 0 : index
    %369 = vector.load %arg1[%c3_447, %c3_448, %c1_449, %c0_450] : memref<4x5x5x64xbf16, #tpu.memory_space<vmem>>, vector<1x1x4x64xbf16>
    %370 = vector.shape_cast %369 : vector<1x1x4x64xbf16> to vector<4x64xbf16>
    %c7_451 = arith.constant 7 : index
    %c0_452 = arith.constant 0 : index
    %c0_453 = arith.constant 0 : index
    %371 = vector.load %arg2[%c7_451, %c0_452, %c0_453] : memref<16x64x128xbf16, #tpu.memory_space<vmem>>, vector<1x64x128xbf16>
    %372 = vector.shape_cast %371 : vector<1x64x128xbf16> to vector<64x128xbf16>
    %cst_454 = arith.constant dense<0.000000e+00> : vector<4x128xf32>
    %373 = tpu.matmul %370, %372, %cst_454 {dimension_numbers = #tpu.dot_dimension_numbers<[1], [0], [0], [1], [0, 0, 1, 1], [], []>} : vector<4x64xbf16>, vector<64x128xbf16>, vector<4x128xf32> -> vector<4x128xf32>
    %374 = arith.addf %368, %373 : vector<4x128xf32>
    %c0_455 = arith.constant 0 : index
    %c4_456 = arith.constant 4 : index
    %c0_457 = arith.constant 0 : index
    %c0_458 = arith.constant 0 : index
    %375 = vector.load %arg1[%c0_455, %c4_456, %c0_457, %c0_458] : memref<4x5x5x64xbf16, #tpu.memory_space<vmem>>, vector<1x1x4x64xbf16>
    %376 = vector.shape_cast %375 : vector<1x1x4x64xbf16> to vector<4x64xbf16>
    %c8_459 = arith.constant 8 : index
    %c0_460 = arith.constant 0 : index
    %c0_461 = arith.constant 0 : index
    %377 = vector.load %arg2[%c8_459, %c0_460, %c0_461] : memref<16x64x128xbf16, #tpu.memory_space<vmem>>, vector<1x64x128xbf16>
    %378 = vector.shape_cast %377 : vector<1x64x128xbf16> to vector<64x128xbf16>
    %cst_462 = arith.constant dense<0.000000e+00> : vector<4x128xf32>
    %379 = tpu.matmul %376, %378, %cst_462 {dimension_numbers = #tpu.dot_dimension_numbers<[1], [0], [0], [1], [0, 0, 1, 1], [], []>} : vector<4x64xbf16>, vector<64x128xbf16>, vector<4x128xf32> -> vector<4x128xf32>
    %380 = arith.addf %374, %379 : vector<4x128xf32>
    %c1_463 = arith.constant 1 : index
    %c4_464 = arith.constant 4 : index
    %c0_465 = arith.constant 0 : index
    %c0_466 = arith.constant 0 : index
    %381 = vector.load %arg1[%c1_463, %c4_464, %c0_465, %c0_466] : memref<4x5x5x64xbf16, #tpu.memory_space<vmem>>, vector<1x1x4x64xbf16>
    %382 = vector.shape_cast %381 : vector<1x1x4x64xbf16> to vector<4x64xbf16>
    %c9_467 = arith.constant 9 : index
    %c0_468 = arith.constant 0 : index
    %c0_469 = arith.constant 0 : index
    %383 = vector.load %arg2[%c9_467, %c0_468, %c0_469] : memref<16x64x128xbf16, #tpu.memory_space<vmem>>, vector<1x64x128xbf16>
    %384 = vector.shape_cast %383 : vector<1x64x128xbf16> to vector<64x128xbf16>
    %cst_470 = arith.constant dense<0.000000e+00> : vector<4x128xf32>
    %385 = tpu.matmul %382, %384, %cst_470 {dimension_numbers = #tpu.dot_dimension_numbers<[1], [0], [0], [1], [0, 0, 1, 1], [], []>} : vector<4x64xbf16>, vector<64x128xbf16>, vector<4x128xf32> -> vector<4x128xf32>
    %386 = arith.addf %380, %385 : vector<4x128xf32>
    %c0_471 = arith.constant 0 : index
    %c4_472 = arith.constant 4 : index
    %c1_473 = arith.constant 1 : index
    %c0_474 = arith.constant 0 : index
    %387 = vector.load %arg1[%c0_471, %c4_472, %c1_473, %c0_474] : memref<4x5x5x64xbf16, #tpu.memory_space<vmem>>, vector<1x1x4x64xbf16>
    %388 = vector.shape_cast %387 : vector<1x1x4x64xbf16> to vector<4x64xbf16>
    %c10_475 = arith.constant 10 : index
    %c0_476 = arith.constant 0 : index
    %c0_477 = arith.constant 0 : index
    %389 = vector.load %arg2[%c10_475, %c0_476, %c0_477] : memref<16x64x128xbf16, #tpu.memory_space<vmem>>, vector<1x64x128xbf16>
    %390 = vector.shape_cast %389 : vector<1x64x128xbf16> to vector<64x128xbf16>
    %cst_478 = arith.constant dense<0.000000e+00> : vector<4x128xf32>
    %391 = tpu.matmul %388, %390, %cst_478 {dimension_numbers = #tpu.dot_dimension_numbers<[1], [0], [0], [1], [0, 0, 1, 1], [], []>} : vector<4x64xbf16>, vector<64x128xbf16>, vector<4x128xf32> -> vector<4x128xf32>
    %392 = arith.addf %386, %391 : vector<4x128xf32>
    %c1_479 = arith.constant 1 : index
    %c4_480 = arith.constant 4 : index
    %c1_481 = arith.constant 1 : index
    %c0_482 = arith.constant 0 : index
    %393 = vector.load %arg1[%c1_479, %c4_480, %c1_481, %c0_482] : memref<4x5x5x64xbf16, #tpu.memory_space<vmem>>, vector<1x1x4x64xbf16>
    %394 = vector.shape_cast %393 : vector<1x1x4x64xbf16> to vector<4x64xbf16>
    %c11_483 = arith.constant 11 : index
    %c0_484 = arith.constant 0 : index
    %c0_485 = arith.constant 0 : index
    %395 = vector.load %arg2[%c11_483, %c0_484, %c0_485] : memref<16x64x128xbf16, #tpu.memory_space<vmem>>, vector<1x64x128xbf16>
    %396 = vector.shape_cast %395 : vector<1x64x128xbf16> to vector<64x128xbf16>
    %cst_486 = arith.constant dense<0.000000e+00> : vector<4x128xf32>
    %397 = tpu.matmul %394, %396, %cst_486 {dimension_numbers = #tpu.dot_dimension_numbers<[1], [0], [0], [1], [0, 0, 1, 1], [], []>} : vector<4x64xbf16>, vector<64x128xbf16>, vector<4x128xf32> -> vector<4x128xf32>
    %398 = arith.addf %392, %397 : vector<4x128xf32>
    %c2_487 = arith.constant 2 : index
    %c4_488 = arith.constant 4 : index
    %c0_489 = arith.constant 0 : index
    %c0_490 = arith.constant 0 : index
    %399 = vector.load %arg1[%c2_487, %c4_488, %c0_489, %c0_490] : memref<4x5x5x64xbf16, #tpu.memory_space<vmem>>, vector<1x1x4x64xbf16>
    %400 = vector.shape_cast %399 : vector<1x1x4x64xbf16> to vector<4x64xbf16>
    %c12_491 = arith.constant 12 : index
    %c0_492 = arith.constant 0 : index
    %c0_493 = arith.constant 0 : index
    %401 = vector.load %arg2[%c12_491, %c0_492, %c0_493] : memref<16x64x128xbf16, #tpu.memory_space<vmem>>, vector<1x64x128xbf16>
    %402 = vector.shape_cast %401 : vector<1x64x128xbf16> to vector<64x128xbf16>
    %cst_494 = arith.constant dense<0.000000e+00> : vector<4x128xf32>
    %403 = tpu.matmul %400, %402, %cst_494 {dimension_numbers = #tpu.dot_dimension_numbers<[1], [0], [0], [1], [0, 0, 1, 1], [], []>} : vector<4x64xbf16>, vector<64x128xbf16>, vector<4x128xf32> -> vector<4x128xf32>
    %404 = arith.addf %398, %403 : vector<4x128xf32>
    %c3_495 = arith.constant 3 : index
    %c4_496 = arith.constant 4 : index
    %c0_497 = arith.constant 0 : index
    %c0_498 = arith.constant 0 : index
    %405 = vector.load %arg1[%c3_495, %c4_496, %c0_497, %c0_498] : memref<4x5x5x64xbf16, #tpu.memory_space<vmem>>, vector<1x1x4x64xbf16>
    %406 = vector.shape_cast %405 : vector<1x1x4x64xbf16> to vector<4x64xbf16>
    %c13_499 = arith.constant 13 : index
    %c0_500 = arith.constant 0 : index
    %c0_501 = arith.constant 0 : index
    %407 = vector.load %arg2[%c13_499, %c0_500, %c0_501] : memref<16x64x128xbf16, #tpu.memory_space<vmem>>, vector<1x64x128xbf16>
    %408 = vector.shape_cast %407 : vector<1x64x128xbf16> to vector<64x128xbf16>
    %cst_502 = arith.constant dense<0.000000e+00> : vector<4x128xf32>
    %409 = tpu.matmul %406, %408, %cst_502 {dimension_numbers = #tpu.dot_dimension_numbers<[1], [0], [0], [1], [0, 0, 1, 1], [], []>} : vector<4x64xbf16>, vector<64x128xbf16>, vector<4x128xf32> -> vector<4x128xf32>
    %410 = arith.addf %404, %409 : vector<4x128xf32>
    %c2_503 = arith.constant 2 : index
    %c4_504 = arith.constant 4 : index
    %c1_505 = arith.constant 1 : index
    %c0_506 = arith.constant 0 : index
    %411 = vector.load %arg1[%c2_503, %c4_504, %c1_505, %c0_506] : memref<4x5x5x64xbf16, #tpu.memory_space<vmem>>, vector<1x1x4x64xbf16>
    %412 = vector.shape_cast %411 : vector<1x1x4x64xbf16> to vector<4x64xbf16>
    %c14_507 = arith.constant 14 : index
    %c0_508 = arith.constant 0 : index
    %c0_509 = arith.constant 0 : index
    %413 = vector.load %arg2[%c14_507, %c0_508, %c0_509] : memref<16x64x128xbf16, #tpu.memory_space<vmem>>, vector<1x64x128xbf16>
    %414 = vector.shape_cast %413 : vector<1x64x128xbf16> to vector<64x128xbf16>
    %cst_510 = arith.constant dense<0.000000e+00> : vector<4x128xf32>
    %415 = tpu.matmul %412, %414, %cst_510 {dimension_numbers = #tpu.dot_dimension_numbers<[1], [0], [0], [1], [0, 0, 1, 1], [], []>} : vector<4x64xbf16>, vector<64x128xbf16>, vector<4x128xf32> -> vector<4x128xf32>
    %416 = arith.addf %410, %415 : vector<4x128xf32>
    %c3_511 = arith.constant 3 : index
    %c4_512 = arith.constant 4 : index
    %c1_513 = arith.constant 1 : index
    %c0_514 = arith.constant 0 : index
    %417 = vector.load %arg1[%c3_511, %c4_512, %c1_513, %c0_514] : memref<4x5x5x64xbf16, #tpu.memory_space<vmem>>, vector<1x1x4x64xbf16>
    %418 = vector.shape_cast %417 : vector<1x1x4x64xbf16> to vector<4x64xbf16>
    %c15_515 = arith.constant 15 : index
    %c0_516 = arith.constant 0 : index
    %c0_517 = arith.constant 0 : index
    %419 = vector.load %arg2[%c15_515, %c0_516, %c0_517] : memref<16x64x128xbf16, #tpu.memory_space<vmem>>, vector<1x64x128xbf16>
    %420 = vector.shape_cast %419 : vector<1x64x128xbf16> to vector<64x128xbf16>
    %cst_518 = arith.constant dense<0.000000e+00> : vector<4x128xf32>
    %421 = tpu.matmul %418, %420, %cst_518 {dimension_numbers = #tpu.dot_dimension_numbers<[1], [0], [0], [1], [0, 0, 1, 1], [], []>} : vector<4x64xbf16>, vector<64x128xbf16>, vector<4x128xf32> -> vector<4x128xf32>
    %422 = arith.addf %416, %421 : vector<4x128xf32>
    %423 = arith.truncf %422 : vector<4x128xf32> to vector<4x128xbf16>
    %c0_519 = arith.constant 0 : index
    %c3_520 = arith.constant 3 : index
    %c0_521 = arith.constant 0 : index
    %c0_522 = arith.constant 0 : index
    %424 = vector.load %arg3[%c0_519, %c3_520, %c0_521, %c0_522] : memref<1x4x4x128xbf16, #tpu.memory_space<vmem>>, vector<1x1x4x128xbf16>
    %425 = vector.shape_cast %424 : vector<1x1x4x128xbf16> to vector<4x128xbf16>
    %426 = vector.shape_cast %423 : vector<4x128xbf16> to vector<1x1x4x128xbf16>
    tpu.vector_store %arg3[%c0_519, %c3_520, %c0_521, %c0_522], %426 {strides = array<i32>} : memref<1x4x4x128xbf16, #tpu.memory_space<vmem>>, vector<1x1x4x128xbf16>,
    %cst_523 = arith.constant dense<0.000000e+00> : vector<128xf32>
    %427 = vector.multi_reduction <add>, %422, %cst_523 [0] : vector<4x128xf32> to vector<128xf32>
    %428 = vector.shape_cast %427 : vector<128xf32> to vector<1x128xf32>
    %429 = arith.addf %321, %428 : vector<1x128xf32>
    %430 = arith.mulf %422, %422 : vector<4x128xf32>
    %cst_524 = arith.constant dense<0.000000e+00> : vector<128xf32>
    %431 = vector.multi_reduction <add>, %430, %cst_524 [0] : vector<4x128xf32> to vector<128xf32>
    %432 = vector.shape_cast %431 : vector<128xf32> to vector<1x128xf32>
    %433 = arith.addf %325, %432 : vector<1x128xf32>
    %c0_525 = arith.constant 0 : index
    %c0_526 = arith.constant 0 : index
    %c0_527 = arith.constant 0 : index
    %434 = vector.load %arg4[%c0_525, %c0_526, %c0_527] : memref<1x1x128xf32, #tpu.memory_space<vmem>>, vector<1x1x128xf32>
    %435 = vector.shape_cast %434 : vector<1x1x128xf32> to vector<1x128xf32>
    %436 = vector.shape_cast %429 : vector<1x128xf32> to vector<1x1x128xf32>
    tpu.vector_store %arg4[%c0_525, %c0_526, %c0_527], %436 {strides = array<i32>} : memref<1x1x128xf32, #tpu.memory_space<vmem>>, vector<1x1x128xf32>,
    %c0_528 = arith.constant 0 : index
    %c0_529 = arith.constant 0 : index
    %c0_530 = arith.constant 0 : index
    %437 = vector.load %arg5[%c0_528, %c0_529, %c0_530] : memref<1x1x128xf32, #tpu.memory_space<vmem>>, vector<1x1x128xf32>
    %438 = vector.shape_cast %437 : vector<1x1x128xf32> to vector<1x128xf32>
    %439 = vector.shape_cast %433 : vector<1x128xf32> to vector<1x1x128xf32>
    tpu.vector_store %arg5[%c0_528, %c0_529, %c0_530], %439 {strides = array<i32>} : memref<1x1x128xf32, #tpu.memory_space<vmem>>, vector<1x1x128xf32>,
    return
  }
  func.func @transform_0(%arg0: i32) -> (i32, i32, i32, i32) {
    %c0_i32 = arith.constant 0 : i32
    %c0_i32_0 = arith.constant 0 : i32
    %c0_i32_1 = arith.constant 0 : i32
    %c0_i32_2 = arith.constant 0 : i32
    return %arg0, %c0_i32, %c0_i32_0, %c0_i32_1 : i32, i32, i32, i32
  }
  func.func @transform_1(%arg0: i32) -> (i32, i32, i32) {
    %c0_i32 = arith.constant 0 : i32
    %c0_i32_0 = arith.constant 0 : i32
    %c0_i32_1 = arith.constant 0 : i32
    %c0_i32_2 = arith.constant 0 : i32
    return %c0_i32, %c0_i32_0, %c0_i32_1 : i32, i32, i32
  }
  func.func @transform_2(%arg0: i32) -> (i32, i32, i32, i32) {
    %c0_i32 = arith.constant 0 : i32
    %c0_i32_0 = arith.constant 0 : i32
    %c0_i32_1 = arith.constant 0 : i32
    %c0_i32_2 = arith.constant 0 : i32
    return %arg0, %c0_i32, %c0_i32_0, %c0_i32_1 : i32, i32, i32, i32
  }
  func.func @transform_3(%arg0: i32) -> (i32, i32, i32) {
    %c0_i32 = arith.constant 0 : i32
    %c0_i32_0 = arith.constant 0 : i32
    %c0_i32_1 = arith.constant 0 : i32
    return %arg0, %c0_i32, %c0_i32_0 : i32, i32, i32
  }
  func.func @transform_4(%arg0: i32) -> (i32, i32, i32) {
    %c0_i32 = arith.constant 0 : i32
    %c0_i32_0 = arith.constant 0 : i32
    %c0_i32_1 = arith.constant 0 : i32
    return %arg0, %c0_i32, %c0_i32_0 : i32, i32, i32
  }
}

module attributes {stable_mosaic.version = 11 : i64} {
  func.func @_bn_relu_pool_kernel(%arg0: i32, %arg1: i32, %arg2: memref<1x16x128xbf16, #tpu.memory_space<vmem>>, %arg3: memref<1x1x128xf32, #tpu.memory_space<vmem>>, %arg4: memref<1x1x128xf32, #tpu.memory_space<vmem>>, %arg5: memref<1x16x128xbf16, #tpu.memory_space<vmem>>, %arg6: memref<1x1x128xf32, #tpu.memory_space<vmem>>) attributes {dimension_semantics = [#tpu.dimension_semantics<parallel>, #tpu.dimension_semantics<arbitrary>], iteration_bounds = array<i64: 2, 1>, scalar_prefetch = 0 : i64, scratch_operands = 0 : i64, tpu.core_type = #tpu.core_type<tc>, window_params = [{transform_indices = @transform_0, window_bounds = array<i64: 1, 16, 128>}, {pipeline_mode = #tpu.pipeline_mode<synchronous>, transform_indices = @transform_1, window_bounds = array<i64: 1, 1, 128>}, {pipeline_mode = #tpu.pipeline_mode<synchronous>, transform_indices = @transform_2, window_bounds = array<i64: 1, 1, 128>}, {transform_indices = @transform_3, window_bounds = array<i64: 1, 16, 128>}, {transform_indices = @transform_4, window_bounds = array<i64: 1, 1, 128>}]} {
    %c0 = arith.constant 0 : index
    %c0_0 = arith.constant 0 : index
    %c0_1 = arith.constant 0 : index
    %0 = vector.load %arg2[%c0, %c0_0, %c0_1] : memref<1x16x128xbf16, #tpu.memory_space<vmem>>, vector<1x16x128xbf16>
    %1 = arith.extf %0 : vector<1x16x128xbf16> to vector<1x16x128xf32>
    %c0_2 = arith.constant 0 : index
    %c0_3 = arith.constant 0 : index
    %c0_4 = arith.constant 0 : index
    %2 = vector.load %arg3[%c0_2, %c0_3, %c0_4] : memref<1x1x128xf32, #tpu.memory_space<vmem>>, vector<1x1x128xf32>
    %3 = vector.broadcast %2 : vector<1x1x128xf32> to vector<1x16x128xf32>
    %4 = arith.mulf %1, %3 : vector<1x16x128xf32>
    %c0_5 = arith.constant 0 : index
    %c0_6 = arith.constant 0 : index
    %c0_7 = arith.constant 0 : index
    %5 = vector.load %arg4[%c0_5, %c0_6, %c0_7] : memref<1x1x128xf32, #tpu.memory_space<vmem>>, vector<1x1x128xf32>
    %6 = vector.broadcast %5 : vector<1x1x128xf32> to vector<1x16x128xf32>
    %7 = arith.addf %4, %6 : vector<1x16x128xf32>
    %cst = arith.constant 0.000000e+00 : f32
    %8 = vector.broadcast %cst : f32 to vector<1x16x128xf32>
    %9 = arith.maximumf %7, %8 : vector<1x16x128xf32>
    %10 = arith.truncf %9 : vector<1x16x128xf32> to vector<1x16x128xbf16>
    %c0_8 = arith.constant 0 : index
    %c0_9 = arith.constant 0 : index
    %c0_10 = arith.constant 0 : index
    %11 = vector.load %arg5[%c0_8, %c0_9, %c0_10] : memref<1x16x128xbf16, #tpu.memory_space<vmem>>, vector<1x16x128xbf16>
    tpu.vector_store %arg5[%c0_8, %c0_9, %c0_10], %10 {strides = array<i32>} : memref<1x16x128xbf16, #tpu.memory_space<vmem>>, vector<1x16x128xbf16>,
    %c0_i32 = arith.constant 0 : i32
    %12 = arith.cmpi eq, %arg1, %c0_i32 : i32
    %13 = arith.extui %12 : i1 to i32
    %c0_i32_11 = arith.constant 0 : i32
    %14 = arith.cmpi ne, %13, %c0_i32_11 : i32
    scf.if %14 {
      %cst_20 = arith.constant 0.000000e+00 : f32
      %22 = vector.broadcast %cst_20 : f32 to vector<1x1x128xf32>
      %c0_21 = arith.constant 0 : index
      %c0_22 = arith.constant 0 : index
      %c0_23 = arith.constant 0 : index
      %23 = vector.load %arg6[%c0_21, %c0_22, %c0_23] : memref<1x1x128xf32, #tpu.memory_space<vmem>>, vector<1x1x128xf32>
      tpu.vector_store %arg6[%c0_21, %c0_22, %c0_23], %22 {strides = array<i32>} : memref<1x1x128xf32, #tpu.memory_space<vmem>>, vector<1x1x128xf32>,
    } else {
    }
    %c0_12 = arith.constant 0 : index
    %c0_13 = arith.constant 0 : index
    %c0_14 = arith.constant 0 : index
    %15 = vector.load %arg6[%c0_12, %c0_13, %c0_14] : memref<1x1x128xf32, #tpu.memory_space<vmem>>, vector<1x1x128xf32>
    %cst_15 = arith.constant dense<0.000000e+00> : vector<1x128xf32>
    %16 = vector.multi_reduction <add>, %9, %cst_15 [1] : vector<1x16x128xf32> to vector<1x128xf32>
    %17 = vector.shape_cast %16 : vector<1x128xf32> to vector<1x1x128xf32>
    %cst_16 = arith.constant 6.250000e-02 : f32
    %18 = vector.broadcast %cst_16 : f32 to vector<1x1x128xf32>
    %19 = arith.mulf %17, %18 : vector<1x1x128xf32>
    %20 = arith.addf %15, %19 : vector<1x1x128xf32>
    %c0_17 = arith.constant 0 : index
    %c0_18 = arith.constant 0 : index
    %c0_19 = arith.constant 0 : index
    %21 = vector.load %arg6[%c0_17, %c0_18, %c0_19] : memref<1x1x128xf32, #tpu.memory_space<vmem>>, vector<1x1x128xf32>
    tpu.vector_store %arg6[%c0_17, %c0_18, %c0_19], %20 {strides = array<i32>} : memref<1x1x128xf32, #tpu.memory_space<vmem>>, vector<1x1x128xf32>,
    return
  }
  func.func @transform_0(%arg0: i32, %arg1: i32) -> (i32, i32, i32) {
    %c0_i32 = arith.constant 0 : i32
    %c0_i32_0 = arith.constant 0 : i32
    return %arg0, %arg1, %c0_i32 : i32, i32, i32
  }
  func.func @transform_1(%arg0: i32, %arg1: i32) -> (i32, i32, i32) {
    %c0_i32 = arith.constant 0 : i32
    %c0_i32_0 = arith.constant 0 : i32
    %c0_i32_1 = arith.constant 0 : i32
    %c0_i32_2 = arith.constant 0 : i32
    return %c0_i32, %c0_i32_0, %c0_i32_1 : i32, i32, i32
  }
  func.func @transform_2(%arg0: i32, %arg1: i32) -> (i32, i32, i32) {
    %c0_i32 = arith.constant 0 : i32
    %c0_i32_0 = arith.constant 0 : i32
    %c0_i32_1 = arith.constant 0 : i32
    %c0_i32_2 = arith.constant 0 : i32
    return %c0_i32, %c0_i32_0, %c0_i32_1 : i32, i32, i32
  }
  func.func @transform_3(%arg0: i32, %arg1: i32) -> (i32, i32, i32) {
    %c0_i32 = arith.constant 0 : i32
    %c0_i32_0 = arith.constant 0 : i32
    return %arg0, %arg1, %c0_i32 : i32, i32, i32
  }
  func.func @transform_4(%arg0: i32, %arg1: i32) -> (i32, i32, i32) {
    %c0_i32 = arith.constant 0 : i32
    %c0_i32_0 = arith.constant 0 : i32
    %c0_i32_1 = arith.constant 0 : i32
    return %arg0, %c0_i32, %c0_i32_0 : i32, i32, i32
  }
}

module attributes {stable_mosaic.version = 11 : i64} {
  func.func @_mm_bias_add_kernel(%arg0: i32, %arg1: i32, %arg2: memref<8x128xf32, #tpu.memory_space<vmem>>, %arg3: memref<128x2048xf32, #tpu.memory_space<vmem>>, %arg4: memref<1x2048xf32, #tpu.memory_space<vmem>>, %arg5: memref<8x2048xbf16, #tpu.memory_space<vmem>>, %arg6: memref<8x2048xf32, #tpu.memory_space<vmem>>) attributes {dimension_semantics = [#tpu.dimension_semantics<parallel>, #tpu.dimension_semantics<parallel>], iteration_bounds = array<i64: 1, 1>, scalar_prefetch = 0 : i64, scratch_operands = 0 : i64, tpu.core_type = #tpu.core_type<tc>, window_params = [{transform_indices = @transform_0, window_bounds = array<i64: 8, 128>}, {transform_indices = @transform_1, window_bounds = array<i64: 128, 2048>}, {transform_indices = @transform_2, window_bounds = array<i64: 1, 2048>}, {transform_indices = @transform_3, window_bounds = array<i64: 8, 2048>}, {transform_indices = @transform_4, window_bounds = array<i64: 8, 2048>}]} {
    %c0 = arith.constant 0 : index
    %c0_0 = arith.constant 0 : index
    %0 = vector.load %arg2[%c0, %c0_0] : memref<8x128xf32, #tpu.memory_space<vmem>>, vector<8x128xf32>
    %c0_1 = arith.constant 0 : index
    %c0_2 = arith.constant 0 : index
    %1 = vector.load %arg3[%c0_1, %c0_2] : memref<128x2048xf32, #tpu.memory_space<vmem>>, vector<128x2048xf32>
    %cst = arith.constant dense<0.000000e+00> : vector<8x2048xf32>
    %2 = tpu.matmul %0, %1, %cst {dimension_numbers = #tpu.dot_dimension_numbers<[1], [0], [0], [1], [0, 0, 1, 1], [], []>} : vector<8x128xf32>, vector<128x2048xf32>, vector<8x2048xf32> -> vector<8x2048xf32>
    %c0_3 = arith.constant 0 : index
    %c0_4 = arith.constant 0 : index
    %3 = vector.load %arg4[%c0_3, %c0_4] : memref<1x2048xf32, #tpu.memory_space<vmem>>, vector<1x2048xf32>
    %4 = vector.broadcast %3 : vector<1x2048xf32> to vector<8x2048xf32>
    %5 = arith.addf %2, %4 : vector<8x2048xf32>
    %c0_5 = arith.constant 0 : index
    %c0_6 = arith.constant 0 : index
    %6 = vector.load %arg5[%c0_5, %c0_6] : memref<8x2048xbf16, #tpu.memory_space<vmem>>, vector<8x2048xbf16>
    %7 = arith.extf %6 : vector<8x2048xbf16> to vector<8x2048xf32>
    %8 = arith.addf %5, %7 : vector<8x2048xf32>
    %cst_7 = arith.constant 0.000000e+00 : f32
    %9 = vector.broadcast %cst_7 : f32 to vector<8x2048xf32>
    %10 = arith.maximumf %8, %9 : vector<8x2048xf32>
    %c0_8 = arith.constant 0 : index
    %c0_9 = arith.constant 0 : index
    %11 = vector.load %arg6[%c0_8, %c0_9] : memref<8x2048xf32, #tpu.memory_space<vmem>>, vector<8x2048xf32>
    tpu.vector_store %arg6[%c0_8, %c0_9], %10 {strides = array<i32>} : memref<8x2048xf32, #tpu.memory_space<vmem>>, vector<8x2048xf32>,
    return
  }
  func.func @transform_0(%arg0: i32, %arg1: i32) -> (i32, i32) {
    %c0_i32 = arith.constant 0 : i32
    %c0_i32_0 = arith.constant 0 : i32
    return %arg0, %c0_i32 : i32, i32
  }
  func.func @transform_1(%arg0: i32, %arg1: i32) -> (i32, i32) {
    %c0_i32 = arith.constant 0 : i32
    %c0_i32_0 = arith.constant 0 : i32
    return %c0_i32, %arg1 : i32, i32
  }
  func.func @transform_2(%arg0: i32, %arg1: i32) -> (i32, i32) {
    %c0_i32 = arith.constant 0 : i32
    %c0_i32_0 = arith.constant 0 : i32
    return %c0_i32, %arg1 : i32, i32
  }
  func.func @transform_3(%arg0: i32, %arg1: i32) -> (i32, i32) {
    %c0_i32 = arith.constant 0 : i32
    return %arg0, %arg1 : i32, i32
  }
  func.func @transform_4(%arg0: i32, %arg1: i32) -> (i32, i32) {
    %c0_i32 = arith.constant 0 : i32
    return %arg0, %arg1 : i32, i32
  }
}

module attributes {stable_mosaic.version = 11 : i64} {
  func.func @_fused_deconv_kernel(%arg0: i32, %arg1: memref<32x128xf32, #tpu.memory_space<vmem>>, %arg2: memref<128x256xf32, #tpu.memory_space<vmem>>, %arg3: memref<1x256xf32, #tpu.memory_space<vmem>>, %arg4: memref<32x256xbf16, #tpu.memory_space<vmem>>, %arg5: memref<256x64xf32, #tpu.memory_space<vmem>>, %arg6: memref<1x64xf32, #tpu.memory_space<vmem>>, %arg7: memref<32x64xf32, #tpu.memory_space<vmem>>, %arg8: memref<32x64xf32, #tpu.memory_space<vmem>>) attributes {dimension_semantics = [#tpu.dimension_semantics<parallel>], iteration_bounds = array<i64: 1>, scalar_prefetch = 0 : i64, scratch_operands = 0 : i64, tpu.core_type = #tpu.core_type<tc>, window_params = [{transform_indices = @transform_0, window_bounds = array<i64: 32, 128>}, {pipeline_mode = #tpu.pipeline_mode<synchronous>, transform_indices = @transform_1, window_bounds = array<i64: 128, 256>}, {pipeline_mode = #tpu.pipeline_mode<synchronous>, transform_indices = @transform_2, window_bounds = array<i64: 1, 256>}, {transform_indices = @transform_3, window_bounds = array<i64: 32, 256>}, {pipeline_mode = #tpu.pipeline_mode<synchronous>, transform_indices = @transform_4, window_bounds = array<i64: 256, 64>}, {pipeline_mode = #tpu.pipeline_mode<synchronous>, transform_indices = @transform_5, window_bounds = array<i64: 1, 64>}, {transform_indices = @transform_6, window_bounds = array<i64: 32, 64>}, {transform_indices = @transform_7, window_bounds = array<i64: 32, 64>}]} {
    %c0 = arith.constant 0 : index
    %c0_0 = arith.constant 0 : index
    %0 = vector.load %arg1[%c0, %c0_0] : memref<32x128xf32, #tpu.memory_space<vmem>>, vector<32x128xf32>
    %c0_1 = arith.constant 0 : index
    %c0_2 = arith.constant 0 : index
    %1 = vector.load %arg2[%c0_1, %c0_2] : memref<128x256xf32, #tpu.memory_space<vmem>>, vector<128x256xf32>
    %cst = arith.constant dense<0.000000e+00> : vector<32x256xf32>
    %2 = tpu.matmul %0, %1, %cst {dimension_numbers = #tpu.dot_dimension_numbers<[1], [0], [0], [1], [0, 0, 1, 1], [], []>} : vector<32x128xf32>, vector<128x256xf32>, vector<32x256xf32> -> vector<32x256xf32>
    %c0_3 = arith.constant 0 : index
    %c0_4 = arith.constant 0 : index
    %3 = vector.load %arg3[%c0_3, %c0_4] : memref<1x256xf32, #tpu.memory_space<vmem>>, vector<1x256xf32>
    %4 = vector.broadcast %3 : vector<1x256xf32> to vector<32x256xf32>
    %5 = arith.addf %2, %4 : vector<32x256xf32>
    %c0_5 = arith.constant 0 : index
    %c0_6 = arith.constant 0 : index
    %6 = vector.load %arg4[%c0_5, %c0_6] : memref<32x256xbf16, #tpu.memory_space<vmem>>, vector<32x256xbf16>
    %7 = arith.extf %6 : vector<32x256xbf16> to vector<32x256xf32>
    %8 = arith.addf %5, %7 : vector<32x256xf32>
    %cst_7 = arith.constant 0.000000e+00 : f32
    %9 = vector.broadcast %cst_7 : f32 to vector<32x256xf32>
    %10 = arith.maximumf %8, %9 : vector<32x256xf32>
    %c0_8 = arith.constant 0 : index
    %c0_9 = arith.constant 0 : index
    %11 = vector.load %arg5[%c0_8, %c0_9] : memref<256x64xf32, #tpu.memory_space<vmem>>, vector<256x64xf32>
    %cst_10 = arith.constant dense<0.000000e+00> : vector<32x64xf32>
    %12 = tpu.matmul %10, %11, %cst_10 {dimension_numbers = #tpu.dot_dimension_numbers<[1], [0], [0], [1], [0, 0, 1, 1], [], []>} : vector<32x256xf32>, vector<256x64xf32>, vector<32x64xf32> -> vector<32x64xf32>
    %c0_11 = arith.constant 0 : index
    %c0_12 = arith.constant 0 : index
    %13 = vector.load %arg6[%c0_11, %c0_12] : memref<1x64xf32, #tpu.memory_space<vmem>>, vector<1x64xf32>
    %14 = vector.broadcast %13 : vector<1x64xf32> to vector<32x64xf32>
    %15 = arith.addf %12, %14 : vector<32x64xf32>
    %c0_13 = arith.constant 0 : index
    %c0_14 = arith.constant 0 : index
    %16 = vector.load %arg7[%c0_13, %c0_14] : memref<32x64xf32, #tpu.memory_space<vmem>>, vector<32x64xf32>
    %17 = arith.addf %15, %16 : vector<32x64xf32>
    %c0_15 = arith.constant 0 : index
    %c0_16 = arith.constant 0 : index
    %18 = vector.load %arg8[%c0_15, %c0_16] : memref<32x64xf32, #tpu.memory_space<vmem>>, vector<32x64xf32>
    tpu.vector_store %arg8[%c0_15, %c0_16], %17 {strides = array<i32>} : memref<32x64xf32, #tpu.memory_space<vmem>>, vector<32x64xf32>,
    return
  }
  func.func @transform_0(%arg0: i32) -> (i32, i32) {
    %c0_i32 = arith.constant 0 : i32
    %c0_i32_0 = arith.constant 0 : i32
    return %arg0, %c0_i32 : i32, i32
  }
  func.func @transform_1(%arg0: i32) -> (i32, i32) {
    %c0_i32 = arith.constant 0 : i32
    %c0_i32_0 = arith.constant 0 : i32
    %c0_i32_1 = arith.constant 0 : i32
    return %c0_i32, %c0_i32_0 : i32, i32
  }
  func.func @transform_2(%arg0: i32) -> (i32, i32) {
    %c0_i32 = arith.constant 0 : i32
    %c0_i32_0 = arith.constant 0 : i32
    %c0_i32_1 = arith.constant 0 : i32
    return %c0_i32, %c0_i32_0 : i32, i32
  }
  func.func @transform_3(%arg0: i32) -> (i32, i32) {
    %c0_i32 = arith.constant 0 : i32
    %c0_i32_0 = arith.constant 0 : i32
    return %arg0, %c0_i32 : i32, i32
  }
  func.func @transform_4(%arg0: i32) -> (i32, i32) {
    %c0_i32 = arith.constant 0 : i32
    %c0_i32_0 = arith.constant 0 : i32
    %c0_i32_1 = arith.constant 0 : i32
    return %c0_i32, %c0_i32_0 : i32, i32
  }
  func.func @transform_5(%arg0: i32) -> (i32, i32) {
    %c0_i32 = arith.constant 0 : i32
    %c0_i32_0 = arith.constant 0 : i32
    %c0_i32_1 = arith.constant 0 : i32
    return %c0_i32, %c0_i32_0 : i32, i32
  }
  func.func @transform_6(%arg0: i32) -> (i32, i32) {
    %c0_i32 = arith.constant 0 : i32
    %c0_i32_0 = arith.constant 0 : i32
    return %arg0, %c0_i32 : i32, i32
  }
  func.func @transform_7(%arg0: i32) -> (i32, i32) {
    %c0_i32 = arith.constant 0 : i32
    %c0_i32_0 = arith.constant 0 : i32
    return %arg0, %c0_i32 : i32, i32
  }
}

</mosaic_0001>

<bundles_post_ra>
// kernel: rednet_forward.7
= control target key start
LH: loop header
LB: loop body
LE: loop exit
PB: predicated region body
PF: predicated region fallthrough
CT: control target
= control target key end

     0   :  { %s222_s0 = inlined_call_operand.vmem [shape: bf16[64,128], index: 0, kind: input, shape index: {}]   ;;  %s223_s1 = inlined_call_operand.vmem [shape: f32[1,128], index: 1, kind: input, shape index: {}]   ;;  %s224_s2 = inlined_call_operand.vmem [shape: f32[1,128], index: 2, kind: input, shape index: {}]   ;;  %s225_s3 = inlined_call_operand.vmem [shape: bf16[64,128], index: 3, kind: output, shape index: {}]  }
   0x1   :  { %v131_v0 = vld [vmem:[%s222_s0] sm:$0xff]   ;;  %v166_v4 = vld [vmem:[%s222_s0 + $0x8] sm:$0xff]   ;;  %v167_v5 = vld [vmem:[%s222_s0 + $0x10] sm:$0xff]  }
   0x2   :  { %v112_v1 = vld [vmem:[%s223_s1] ss:$0 sm:$0xff]  ;;  %v132_v2 = vunpack.c.l.bf16 %v131_v0  ;;  %v133_v3 = vunpack.c.h.bf16 %v131_v0  ;;  %v168_v6 = vld [vmem:[%s222_s0 + $0x18] sm:$0xff]   ;;  %v136_v8 = vunpack.c.l.bf16 %v166_v4  ;;  %v137_v9 = vunpack.c.h.bf16 %v166_v4 }
   0x3   :  { %v113_v7 = vld [vmem:[%s224_s2] ss:$0 sm:$0xff]  ;;  %v140_v10 = vunpack.c.l.bf16 %v167_v5  ;;  %v141_v11 = vunpack.c.h.bf16 %v167_v5  ;;  %v144_v14 = vunpack.c.l.bf16 %v168_v6  ;;  %v145_v15 = vunpack.c.h.bf16 %v168_v6 }
   0x4   :  { %v37_v12 = vmul.f32 %v132_v2, %v112_v1  ;;  %v38_v13 = vmul.f32 %v133_v3, %v112_v1  ;;  %v39_v16 = vmul.f32 %v136_v8, %v112_v1  ;;  %v40_v17 = vmul.f32 %v137_v9, %v112_v1 }
   0x5   :  { %v41_v18 = vmul.f32 %v140_v10, %v112_v1  ;;  %v42_v19 = vmul.f32 %v141_v11, %v112_v1  ;;  %v43_v22 = vmul.f32 %v144_v14, %v112_v1  ;;  %v44_v23 = vmul.f32 %v145_v15, %v112_v1 }
   0x6   :  { %v52_v20 = vadd.f32 %v113_v7, %v37_v12  ;;  %v53_v21 = vadd.f32 %v113_v7, %v38_v13  ;;  %v54_v24 = vadd.f32 %v113_v7, %v39_v16  ;;  %v55_v25 = vadd.f32 %v113_v7, %v40_v17 }
   0x7   :  { %v56_v26 = vadd.f32 %v113_v7, %v41_v18  ;;  %v57_v27 = vadd.f32 %v113_v7, %v42_v19  ;;  %v58_v30 = vadd.f32 %v113_v7, %v43_v22  ;;  %v59_v31 = vadd.f32 %v113_v7, %v44_v23 }
   0x8   :  { %v60_v28 = vmax.f32 %v52_v20, 0.0  ;;  %v61_v29 = vmax.f32 %v53_v21, 0.0  ;;  %v62_v32 = vmax.f32 %v54_v24, 0.0  ;;  %v63_v33 = vmax.f32 %v55_v25, 0.0 }
   0x9   :  { %v64_v34 = vmax.f32 %v56_v26, 0.0  ;;  %v65_v35 = vmax.f32 %v57_v27, 0.0  ;;  %v66_v37 = vmax.f32 %v58_v30, 0.0  ;;  %v67_v38 = vmax.f32 %v59_v31, 0.0 }
   0xa   :  { %v149_v36 = vpack.c.bf16 %v61_v29, %v60_v28  ;;  %v154_v39 = vpack.c.bf16 %v63_v33, %v62_v32 }
   0xb   :  { %v159_v40 = vpack.c.bf16 %v65_v35, %v64_v34  ;;  %v164_v41 = vpack.c.bf16 %v67_v38, %v66_v37 }
   0xc   :  { %150 = vst [vmem:[%s225_s3] sm:$0xff] %v149_v36   ;;  %169 = vst [vmem:[%s225_s3 + $0x8] sm:$0xff] %v154_v39  }
   0xd   :  { %170 = vst [vmem:[%s225_s3 + $0x10] sm:$0xff] %v159_v40   ;;  %171 = vst [vmem:[%s225_s3 + $0x18] sm:$0xff] %v164_v41  }

// kernel: rednet_forward.6
= control target key start
LH: loop header
LB: loop body
LE: loop exit
PB: predicated region body
PF: predicated region fallthrough
CT: control target
= control target key end

     0   :  { %v601_v0 = vmov 0   ;;  %vm175_vm0 = vcmask 130048   ;;  %vm361_vm1 = vcmask 519168   ;;  %vm378_vm2 = vcmask 523264   ;;  %s854_s1 = inlined_call_operand.vmem [shape: bf16[144,64], index: 1, kind: input, shape index: {}]   ;;  %s855_s0 = inlined_call_operand.vmem [shape: bf16[128,144], index: 0, kind: input, shape index: {}]   ;;  %s856_s2 = inlined_call_operand.vmem [shape: bf16[128,64], index: 2, kind: output, shape index: {0}]   ;;  %s857_s3 = inlined_call_operand.vmem [shape: f32[1,1,64], index: 3, kind: output, shape index: {1}]   ;;  %s858_s4 = inlined_call_operand.vmem [shape: f32[1,1,64], index: 4, kind: output, shape index: {2}]  }
   0x1   :  { %200 = vmatprep.subr.bf16.mxu0 %v601_v0  ;;  %v568_v1 = vld [vmem:[%s854_s1] sm:$0xff]   ;;  %549 = vmatprep.subr.bf16.mxu1 %v601_v0  ;;  %v569_v2 = vld [vmem:[%s854_s1 + $0x8] sm:$0xff]   ;;  %v570_v3 = vld [vmem:[%s854_s1 + $0x10] sm:$0xff]   ;;  %vm416_vm3 = vcmask 516096  }
   0x2   :  { %201 = vmatpush1.bf16.msra.mxu0 %v568_v1  ;;  %558 = vmatpush1.bf16.msra.mxu1 %v568_v1  ;;  %v571_v4 = vld [vmem:[%s854_s1 + $0x18] sm:$0xff]   ;;  %v579_v5 = vld [vmem:[%s855_s0 + $0x4] ss:$8 sps:$4 sm:$0xff]   ;;  %v574_v9 = vld [vmem:[%s854_s1 + $0x30] sm:$0xff]  }
   0x3   :  { %202 = vmatprep.subr.bf16.mxu0 %v601_v0  ;;  %550 = vmatprep.subr.bf16.mxu1 %v601_v0  ;;  %v585_v6 = vld [vmem:[%s855_s0 + $0x44] ss:$8 sps:$4 sm:$0xff]   ;;  %v575_v10 = vld [vmem:[%s854_s1 + $0x38] sm:$0xff]   ;;  %v577_v12 = vld [vmem:[%s855_s0] ss:$8 sps:$4 sm:$0xff]  }
   0x4   :  { %509 = vmatprep.mubr.msk.bf16.mxu0 %vm175_vm0, %v579_v5  ;;  %v572_v7 = vld [vmem:[%s854_s1 + $0x20] sm:$0xff]   ;;  %513 = vmatprep.mubr.msk.bf16.mxu1 %vm175_vm0, %v585_v6  ;;  %v573_v8 = vld [vmem:[%s854_s1 + $0x28] sm:$0xff]   ;;  %v580_v14 = vld [vmem:[%s855_s0 + $0x14] ss:$8 sps:$4 sm:$0xff]  }
   0x5   :  { %v576_v11 = vld [vmem:[%s854_s1 + $0x40] sm:$0xff]   ;;  %v589_v15 = vld [vmem:[%s855_s0 + $0x54] ss:$8 sps:$4 sm:$0xff]   ;;  %v582_v16 = vld [vmem:[%s855_s0 + $0x10] ss:$8 sps:$4 sm:$0xff]  }
   0x6   :  { %203 = vmatpush1.bf16.msra.mxu0 %v569_v2  ;;  %559 = vmatpush1.bf16.msra.mxu1 %v569_v2  ;;  %v583_v13 = vld [vmem:[%s855_s0 + $0x40] ss:$8 sps:$4 sm:$0xff]   ;;  %v591_v17 = vld [vmem:[%s855_s0 + $0x50] ss:$8 sps:$4 sm:$0xff]   ;;  %v586_v18 = vld [vmem:[%s855_s0 + $0x24] ss:$8 sps:$4 sm:$0xff]  }
   0x7   :  { %204 = vmatprep.subr.bf16.mxu0 %v601_v0  ;;  %551 = vmatprep.subr.bf16.mxu1 %v601_v0  ;;  %v595_v19 = vld [vmem:[%s855_s0 + $0x64] ss:$8 sps:$4 sm:$0xff]   ;;  %v588_v20 = vld [vmem:[%s855_s0 + $0x20] ss:$8 sps:$4 sm:$0xff]   ;;  %v592_v22 = vld [vmem:[%s855_s0 + $0x34] ss:$8 sps:$4 sm:$0xff]  }
   0x8   :  { %v597_v21 = vld [vmem:[%s855_s0 + $0x60] ss:$8 sps:$4 sm:$0xff]   ;;  %v598_v23 = vld [vmem:[%s855_s0 + $0x74] ss:$8 sps:$4 sm:$0xff]   ;;  %v594_v24 = vld [vmem:[%s855_s0 + $0x30] ss:$8 sps:$4 sm:$0xff]  }
   0x9   :  { %v600_v25 = vld [vmem:[%s855_s0 + $0x70] ss:$8 sps:$4 sm:$0xff]  }
   0xa   :  { %205 = vmatpush1.bf16.msra.mxu0 %v570_v3  ;;  %560 = vmatpush1.bf16.msra.mxu1 %v570_v3 }
   0xb   :  { %206 = vmatprep.subr.bf16.mxu0 %v601_v0  ;;  %552 = vmatprep.subr.bf16.mxu1 %v601_v0 }
   0xe   :  { %207 = vmatpush1.bf16.msra.mxu0 %v571_v4  ;;  %561 = vmatpush1.bf16.msra.mxu1 %v571_v4 }
   0xf   :  { %208 = vmatprep.subr.bf16.mxu0 %v601_v0  ;;  %553 = vmatprep.subr.bf16.mxu1 %v601_v0 }
  0x12   :  { %209 = vmatpush1.bf16.msra.mxu0 %v572_v7  ;;  %562 = vmatpush1.bf16.msra.mxu1 %v572_v7 }
  0x13   :  { %210 = vmatprep.subr.bf16.mxu0 %v601_v0  ;;  %554 = vmatprep.subr.bf16.mxu1 %v601_v0 }
  0x16   :  { %211 = vmatpush1.bf16.msra.mxu0 %v573_v8  ;;  %563 = vmatpush1.bf16.msra.mxu1 %v573_v8 }
  0x17   :  { %212 = vmatprep.subr.bf16.mxu0 %v601_v0  ;;  %555 = vmatprep.subr.bf16.mxu1 %v601_v0 }
  0x1a   :  { %213 = vmatpush1.bf16.msra.mxu0 %v574_v9  ;;  %564 = vmatpush1.bf16.msra.mxu1 %v574_v9 }
  0x1b   :  { %214 = vmatprep.subr.bf16.mxu0 %v601_v0  ;;  %556 = vmatprep.subr.bf16.mxu1 %v601_v0 }
  0x1e   :  { %215 = vmatpush1.bf16.msra.mxu0 %v575_v10  ;;  %565 = vmatpush1.bf16.msra.mxu1 %v575_v10 }
  0x1f   :  { %216 = vmatprep.subr.bf16.mxu0 %v601_v0  ;;  %557 = vmatprep.subr.bf16.mxu1 %v601_v0 }
  0x22   :  { %217 = vmatpush1.bf16.msra.mxu0 %v576_v11  ;;  %566 = vmatpush1.bf16.msra.mxu1 %v576_v11 }
  0x25   :  { %233 = vmatmul.mubr.bf16.vlgmr.msra.gmra.mrb[0].mxu0 %v577_v12  ;;  %265 = vmatmul.mubr.bf16.vlgmr.msra.gmra.mrb[0].mxu1 %v583_v13 }
  0x26   :  { %510 = vmatprep.mubr.msk.bf16.mxu0 %vm175_vm0, %v580_v14  ;;  %514 = vmatprep.mubr.msk.bf16.mxu1 %vm175_vm0, %v589_v15 }
  0x2d   :  { %241 = vmatmul.mubr.bf16.gmra.mrb[4].mxu0 %v582_v16  ;;  %273 = vmatmul.mubr.bf16.gmra.mrb[4].mxu1 %v591_v17 }
  0x2e   :  { %511 = vmatprep.mubr.msk.bf16.mxu0 %vm175_vm0, %v586_v18  ;;  %515 = vmatprep.mubr.msk.bf16.mxu1 %vm175_vm0, %v595_v19 }
  0x35   :  { %249 = vmatmul.mubr.bf16.gmra.mrb[8].mxu0 %v588_v20  ;;  %281 = vmatmul.mubr.bf16.gmra.mrb[8].mxu1 %v597_v21 }
  0x36   :  { %512 = vmatprep.mubr.msk.bf16.mxu0 %vm175_vm0, %v592_v22  ;;  %516 = vmatprep.mubr.msk.bf16.mxu1 %vm175_vm0, %v598_v23 }
  0x3d   :  { %257 = vmatmul.mubr.bf16.gmra.mrb[12].mxu0 %v594_v24  ;;  %289 = vmatmul.mubr.bf16.gmra.mrb[12].mxu1 %v600_v25 }
  0xf8   :  { %v234_v26 = vpop.f32.mrb[0].mxu0  ;;  %v710_v27 = vpop.f32.mrb[0].mxu1 }
  0xf9   :  { %v533_v28 = vpack.c.bf16 %v234_v26, %v234_v26  ;;  %v418_v29 = vmul.f32 %v234_v26, %v234_v26  ;;  %v236_v30 = vpop.f32.mrb[1].mxu0  ;;  %v541_v31 = vpack.c.bf16 %v710_v27, %v710_v27  ;;  %v268_v32 = vpop.f32.mrb[1].mxu1  ;;  %v379_v35 = vsel %vm378_vm2, %v234_v26, 0.0 }
  0xfa   :  { %v237_v33 = vpop.f32.mrb[2].mxu0  ;;  %v714_v34 = vpop.f32.mrb[2].mxu1 }
  0xfb   :  { %362 = vst.msk [vmem:[%s856_s2] sm:$0xf] %vm361_vm1, %v533_v28  ;;  %v534_v36 = vpack.c.bf16 %v237_v33, %v237_v33  ;;  %v380_v37 = vsel %vm378_vm2, %v237_v33, 0.0  ;;  %v419_v38 = vmul.f32 %v237_v33, %v237_v33  ;;  %v239_v39 = vpop.f32.mrb[3].mxu0  ;;  %370 = vst.msk [vmem:[%s856_s2 + $0x20] sm:$0xf] %vm361_vm1, %v541_v31  ;;  %v542_v42 = vpack.c.bf16 %v714_v34, %v714_v34 }
  0xfc   :  { %v271_v40 = vpop.f32.mrb[3].mxu1  ;;  %v381_v41 = vadd.f32 %v380_v37, %v379_v35  ;;  %v434_v43 = vsel %vm378_vm2, %v418_v29, 0.0 }
  0xfd   :  { %363 = vst.msk [vmem:[%s856_s2 + $0x4] sm:$0xf] %vm361_vm1, %v534_v36  ;;  %v435_v44 = vsel %vm378_vm2, %v419_v38, 0.0  ;;  %371 = vst.msk [vmem:[%s856_s2 + $0x24] sm:$0xf] %vm361_vm1, %v542_v42  ;;  %v426_v36 = vmul.f32 %v710_v27, %v710_v27 }
  0xfe   :  { %v436_v45 = vadd.f32 %v435_v44, %v434_v43 }
 0x100   :  { %v242_v46 = vpop.f32.mrb[4].mxu0  ;;  %v738_v47 = vpop.f32.mrb[4].mxu1 }
 0x101   :  { %v535_v48 = vpack.c.bf16 %v242_v46, %v242_v46  ;;  %v382_v49 = vsel %vm378_vm2, %v242_v46, 0.0  ;;  %v420_v50 = vmul.f32 %v242_v46, %v242_v46  ;;  %v244_v51 = vpop.f32.mrb[5].mxu0  ;;  %v543_v52 = vpack.c.bf16 %v738_v47, %v738_v47  ;;  %v276_v53 = vpop.f32.mrb[5].mxu1 }
 0x102   :  { %v383_v54 = vadd.f32 %v382_v49, %v381_v41  ;;  %v245_v55 = vpop.f32.mrb[6].mxu0  ;;  %v743_v56 = vpop.f32.mrb[6].mxu1  ;;  %v427_v51 = vmul.f32 %v714_v34, %v714_v34 }
 0x103   :  { %364 = vst.msk [vmem:[%s856_s2 + $0x8] sm:$0xf] %vm361_vm1, %v535_v48  ;;  %v437_v57 = vsel %vm378_vm2, %v420_v50, 0.0  ;;  %v536_v58 = vpack.c.bf16 %v245_v55, %v245_v55  ;;  %v384_v59 = vsel %vm378_vm2, %v245_v55, 0.0  ;;  %v421_v60 = vmul.f32 %v245_v55, %v245_v55  ;;  %v247_v61 = vpop.f32.mrb[7].mxu0  ;;  %v279_v62 = vpop.f32.mrb[7].mxu1 }
 0x104   :  { %372 = vst.msk [vmem:[%s856_s2 + $0x28] sm:$0xf] %vm361_vm1, %v543_v52  ;;  %v438_v63 = vadd.f32 %v437_v57, %v436_v45  ;;  %v385_v0 = vadd.f32 %v384_v59, %v383_v54  ;;  %v544_v1 = vpack.c.bf16 %v743_v56, %v743_v56  ;;  %v394_v50 = vsel %vm378_vm2, %v710_v27, 0.0 }
 0x105   :  { %365 = vst.msk [vmem:[%s856_s2 + $0xc] sm:$0xf] %vm361_vm1, %v536_v58  ;;  %v439_v2 = vsel %vm378_vm2, %v421_v60, 0.0  ;;  %v449_v55 = vsel %vm378_vm2, %v426_v36, 0.0  ;;  %v396_v27 = vsel %vm378_vm2, %v714_v34, 0.0  ;;  %v428_v57 = vmul.f32 %v738_v47, %v738_v47 }
 0x106   :  { %v440_v3 = vadd.f32 %v439_v2, %v438_v63  ;;  %373 = vst.msk [vmem:[%s856_s2 + $0x2c] sm:$0xf] %vm361_vm1, %v544_v1  ;;  %v451_v60 = vsel %vm378_vm2, %v427_v51, 0.0  ;;  %v398_v61 = vsel %vm378_vm2, %v738_v47, 0.0  ;;  %v429_v62 = vmul.f32 %v743_v56, %v743_v56 }
 0x107   :  { %v453_v1 = vsel %vm378_vm2, %v428_v57, 0.0  ;;  %v400_v34 = vsel %vm378_vm2, %v743_v56, 0.0 }
 0x108   :  { %v250_v4 = vpop.f32.mrb[8].mxu0  ;;  %v766_v5 = vpop.f32.mrb[8].mxu1 }
 0x109   :  { %v537_v6 = vpack.c.bf16 %v250_v4, %v250_v4  ;;  %v386_v7 = vsel %vm378_vm2, %v250_v4, 0.0  ;;  %v422_v8 = vmul.f32 %v250_v4, %v250_v4  ;;  %v252_v9 = vpop.f32.mrb[9].mxu0  ;;  %v545_v10 = vpack.c.bf16 %v766_v5, %v766_v5  ;;  %v284_v11 = vpop.f32.mrb[9].mxu1 }
 0x10a   :  { %v387_v12 = vadd.f32 %v386_v7, %v385_v0  ;;  %v253_v13 = vpop.f32.mrb[10].mxu0  ;;  %v771_v14 = vpop.f32.mrb[10].mxu1  ;;  %v430_v2 = vmul.f32 %v766_v5, %v766_v5  ;;  %v402_v47 = vsel %vm378_vm2, %v766_v5, 0.0 }
 0x10b   :  { %366 = vst.msk [vmem:[%s856_s2 + $0x10] sm:$0xf] %vm361_vm1, %v537_v6  ;;  %v441_v15 = vsel %vm378_vm2, %v422_v8, 0.0  ;;  %v538_v16 = vpack.c.bf16 %v253_v13, %v253_v13  ;;  %v388_v17 = vsel %vm378_vm2, %v253_v13, 0.0  ;;  %v423_v18 = vmul.f32 %v253_v13, %v253_v13  ;;  %v255_v19 = vpop.f32.mrb[11].mxu0  ;;  %v287_v20 = vpop.f32.mrb[11].mxu1 }
 0x10c   :  { %374 = vst.msk [vmem:[%s856_s2 + $0x30] sm:$0xf] %vm361_vm1, %v545_v10  ;;  %v442_v21 = vadd.f32 %v441_v15, %v440_v3  ;;  %v389_v22 = vadd.f32 %v388_v17, %v387_v12  ;;  %v546_v23 = vpack.c.bf16 %v771_v14, %v771_v14  ;;  %v455_v6 = vsel %vm378_vm2, %v429_v62, 0.0 }
 0x10d   :  { %367 = vst.msk [vmem:[%s856_s2 + $0x14] sm:$0xf] %vm361_vm1, %v538_v16  ;;  %v443_v24 = vsel %vm378_vm2, %v423_v18, 0.0  ;;  %v431_v7 = vmul.f32 %v771_v14, %v771_v14  ;;  %v457_v11 = vsel %vm378_vm2, %v430_v2, 0.0  ;;  %v404_v56 = vsel %vm378_vm2, %v771_v14, 0.0 }
 0x10e   :  { %v444_v25 = vadd.f32 %v443_v24, %v442_v21  ;;  %375 = vst.msk [vmem:[%s856_s2 + $0x34] sm:$0xf] %vm361_vm1, %v546_v23 }
 0x10f   :  { %v459_v16 = vsel %vm378_vm2, %v431_v7, 0.0 }
 0x110   :  { %v258_v26 = vpop.f32.mrb[12].mxu0  ;;  %v290_v28 = vpop.f32.mrb[12].mxu1 }
 0x111   :  { %v539_v29 = vpack.c.bf16 %v258_v26, %v258_v26  ;;  %v390_v30 = vsel %vm378_vm2, %v258_v26, 0.0  ;;  %v424_v31 = vmul.f32 %v258_v26, %v258_v26  ;;  %v260_v32 = vpop.f32.mrb[13].mxu0  ;;  %v547_v33 = vpack.c.bf16 %v290_v28, %v290_v28  ;;  %v292_v35 = vpop.f32.mrb[13].mxu1 }
 0x112   :  { %v391_v37 = vadd.f32 %v390_v30, %v389_v22  ;;  %v261_v38 = vpop.f32.mrb[14].mxu0  ;;  %v293_v39 = vpop.f32.mrb[14].mxu1  ;;  %v432_v8 = vmul.f32 %v290_v28, %v290_v28  ;;  %v406_v12 = vsel %vm378_vm2, %v290_v28, 0.0 }
 0x113   :  { %368 = vst.msk [vmem:[%s856_s2 + $0x18] sm:$0xf] %vm361_vm1, %v539_v29  ;;  %v445_v40 = vsel %vm378_vm2, %v424_v31, 0.0  ;;  %v540_v41 = vpack.c.bf16 %v261_v38, %v261_v38  ;;  %v392_v42 = vsel %vm378_vm2, %v261_v38, 0.0  ;;  %v425_v43 = vmul.f32 %v261_v38, %v261_v38  ;;  %v263_v44 = vpop.f32.mrb[15].mxu0  ;;  %v295_v45 = vpop.f32.mrb[15].mxu1 }
 0x114   :  { %376 = vst.msk [vmem:[%s856_s2 + $0x38] sm:$0xf] %vm361_vm1, %v547_v33  ;;  %v446_v46 = vadd.f32 %v445_v40, %v444_v25  ;;  %v393_v48 = vadd.f32 %v392_v42, %v391_v37  ;;  %v548_v49 = vpack.c.bf16 %v293_v39, %v293_v39  ;;  %v461_v17 = vsel %vm378_vm2, %v432_v8, 0.0 }
 0x115   :  { %369 = vst.msk [vmem:[%s856_s2 + $0x1c] sm:$0xf] %vm361_vm1, %v540_v41  ;;  %v447_v52 = vsel %vm378_vm2, %v425_v43, 0.0  ;;  %v433_v5 = vmul.f32 %v293_v39, %v293_v39  ;;  %v408_v20 = vsel %vm378_vm2, %v293_v39, 0.0 }
 0x116   :  { %v395_v53 = vadd.f32 %v394_v50, %v393_v48  ;;  %v448_v54 = vadd.f32 %v447_v52, %v446_v46  ;;  %377 = vst.msk [vmem:[%s856_s2 + $0x3c] sm:$0xf] %vm361_vm1, %v548_v49 }
 0x117   :  { %v463_v23 = vsel %vm378_vm2, %v433_v5, 0.0 }
 0x118   :  { %v397_v58 = vadd.f32 %v396_v27, %v395_v53  ;;  %v450_v59 = vadd.f32 %v449_v55, %v448_v54 }
 0x11a   :  { %v452_v63 = vadd.f32 %v451_v60, %v450_v59  ;;  %v399_v0 = vadd.f32 %v398_v61, %v397_v58 }
 0x11c   :  { %v401_v3 = vadd.f32 %v400_v34, %v399_v0  ;;  %v454_v4 = vadd.f32 %v453_v1, %v452_v63 }
 0x11e   :  { %v403_v9 = vadd.f32 %v402_v47, %v401_v3  ;;  %v456_v10 = vadd.f32 %v455_v6, %v454_v4 }
 0x120   :  { %v458_v13 = vadd.f32 %v457_v11, %v456_v10  ;;  %v405_v15 = vadd.f32 %v404_v56, %v403_v9 }
 0x122   :  { %v460_v18 = vadd.f32 %v459_v16, %v458_v13  ;;  %v407_v19 = vadd.f32 %v406_v12, %v405_v15 }
 0x124   :  { %v462_v21 = vadd.f32 %v461_v17, %v460_v18  ;;  %v409_v22 = vadd.f32 %v408_v20, %v407_v19 }
 0x126   :  { %v410_v24 = vrot.slane %v409_v22, 4  ;;  %v464_v25 = vadd.f32 %v463_v23, %v462_v21 }
 0x128   :  { %v411_v14 = vadd.f32 %v410_v24, %v409_v22  ;;  %v465_v26 = vrot.slane %v464_v25, 4 }
 0x12a   :  { %v412_v28 = vrot.slane %v411_v14, 2  ;;  %v466_v29 = vadd.f32 %v465_v26, %v464_v25 }
 0x12c   :  { %v413_v30 = vadd.f32 %v412_v28, %v411_v14  ;;  %v467_v31 = vrot.slane %v466_v29, 2 }
 0x12e   :  { %v414_v32 = vrot.slane %v413_v30, 1  ;;  %v468_v33 = vadd.f32 %v467_v31, %v466_v29 }
 0x130   :  { %v415_v35 = vadd.f32 %v414_v32, %v413_v30  ;;  %v469_v36 = vrot.slane %v468_v33, 1 }
 0x132   :  { %417 = vst.msk [vmem:[%s857_s3] sm:$0x1] %vm416_vm3, %v415_v35  ;;  %v470_v37 = vadd.f32 %v469_v36, %v468_v33 }
 0x134   :  { %471 = vst.msk [vmem:[%s858_s4] sm:$0x1] %vm416_vm3, %v470_v37 }

// kernel: rednet_forward.9
= control target key start
LH: loop header
LB: loop body
LE: loop exit
PB: predicated region body
PF: predicated region fallthrough
CT: control target
= control target key end

     0   :  { %s511_s15 = smov 0   ;;  %s513_s16 = smov 0   ;;  %s553_s0 = inlined_call_operand.vmem [shape: bf16[2,16,128], index: 0, kind: input, shape index: {}]   ;;  %s554_s1 = inlined_call_operand.vmem [shape: f32[1,1,128], index: 1, kind: input, shape index: {}]   ;;  %s555_s2 = inlined_call_operand.vmem [shape: f32[1,1,128], index: 2, kind: input, shape index: {}]   ;;  %s556_s3 = inlined_call_operand.vmem [shape: bf16[2,16,128], index: 3, kind: output, shape index: {0}]   ;;  %s557_s4 = inlined_call_operand.vmem [shape: f32[2,1,128], index: 4, kind: output, shape index: {1}]  }
   0x1   :  { %s515_s17 = smov 0  }
   0x2 LB: > { %s27_s18 = sadd.s32 1, %s479_s16  ;;  %p412_p0 = scmp.ge.s32.totalorder %s483_s17, 1  ;;  %s483_s17 = sphi %s515_s17, %s15_s17   ;;  %s479_s16 = sphi %s513_s16, %s559_s16   ;;  %s475_s15 = sphi %s511_s15, %s558_s15  }
   0x3   : > { %p29_p1 = scmp.ge.s32.totalorder %s27_s18, 2  ;;  %p186_p2 = scmp.lt.s32.totalorder %s483_s17, 3 }
   0x5   : > { %s561_s18 = smov (%p29_p1, %s27_s18), 0  ;;  %p187_p3 = pnand %p412_p0, %p186_p2 }
   0x6   : > { %p224_p4 = scmp.lt.s32.totalorder (!%p187_p3), %s475_s15, 1  ;;  %v485_v0 = vmov (!%p187_p3), 0.0   ;;  %v417_v2 = vld [vmem:[%s554_s1] ss:$0 sm:$0xff] (!%p187_p3) }
   0x7   : > { %190 = sbr.rel (%p187_p3) target bundleno = 45 (0x2d), region = 32  ;;  %v418_v5 = vld [vmem:[%s555_s2] ss:$0 sm:$0xff] (!%p187_p3) }
   0xe   : > { %s563_s15 = smov (!%p224_p4, %s475_s15), 1 }
   0xf   : > { %s245_s21 = scalar_lea.vmem %s557_s4, %s563_s15  ;;  %s423_s22 = sshll.u32 %s563_s15, 3 }
  0x10   : > { %284 = vst [vmem:[%s245_s21] sm:$0x1] %v485_v0  ;;  %s231_s25 = scalar_lea.vmem %s553_s0, %s423_s22  ;;  %s241_s6 = scalar_lea.vmem %s556_s3, %s423_s22 }
  0x11   : > { %v428_v1 = vld [vmem:[%s231_s25] sm:$0xff]  }
  0x12   : > { %v429_v3 = vunpack.c.l.bf16 %v428_v1  ;;  %v430_v4 = vunpack.c.h.bf16 %v428_v1 }
  0x14   : > { %v257_v6 = vmul.f32 %v429_v3, %v417_v2  ;;  %v258_v7 = vmul.f32 %v430_v4, %v417_v2 }
  0x16   : > { %v266_v8 = vadd.f32 %v418_v5, %v257_v6  ;;  %v267_v9 = vadd.f32 %v418_v5, %v258_v7 }
  0x17   : > { %v285_v20 = vld [vmem:[%s245_s21] sm:$0x1] }
  0x18   : > { %v268_v10 = vmax.f32 %v266_v8, 0.0  ;;  %v269_v11 = vmax.f32 %v267_v9, 0.0 }
  0x1a   : > { %v434_v12 = vpack.c.bf16 %v269_v11, %v268_v10  ;;  %v286_v13 = vadd.f32 %v269_v11, %v268_v10 }
  0x1c   : > { %435 = vst [vmem:[%s241_s6] sm:$0xff] %v434_v12   ;;  %v287_v14 = vrot.slane %v286_v13, 4 }
  0x1e   : > { %v288_v15 = vadd.f32 %v287_v14, %v286_v13 }
  0x20   : > { %v289_v16 = vrot.slane %v288_v15, 2 }
  0x22   : > { %v290_v17 = vadd.f32 %v289_v16, %v288_v15 }
  0x24   : > { %v291_v18 = vrot.slane %v290_v17, 1 }
  0x26   : > { %v292_v19 = vadd.f32 %v291_v18, %v290_v17 }
  0x28   : > { %v293_v21 = vmul.f32 0.0625, %v292_v19 }
  0x2a   : > { %v294_v22 = vadd.f32 %v293_v21, %v285_v20 }
  0x2c   : > { %295 = vst [vmem:[%s245_s21] sm:$0x1] %v294_v22 }
  0x2d PF: > { %s15_s17 = sadd.s32 1, %s483_s17   ;;  %s558_s15 = smov %s479_s16 }
  0x2e   : > { %p12_p5 = scmp.ge.s32.totalorder %s15_s17, 4   ;;  %s559_s16 = smov %s561_s18 }
  0x30   :  { %14 = sbr.rel (!%p12_p5) target bundleno = 2 (0x2), region = 78 }

// kernel: rednet_forward.10
= control target key start
LH: loop header
LB: loop body
LE: loop exit
PB: predicated region body
PF: predicated region fallthrough
CT: control target
= control target key end

     0   :  { %v1259_v3 = vmov 0.0   ;;  %s2176_s1 = inlined_call_operand.vmem [shape: f32[128,2048], index: 1, kind: input, shape index: {}]   ;;  %s2177_s0 = inlined_call_operand.vmem [shape: f32[8,128], index: 0, kind: input, shape index: {}]   ;;  %s2178_s2 = inlined_call_operand.vmem [shape: f32[1,2048], index: 2, kind: input, shape index: {}]   ;;  %s2179_s3 = inlined_call_operand.vmem [shape: bf16[8,2048], index: 3, kind: input, shape index: {}]   ;;  %s2180_s4 = inlined_call_operand.vmem [shape: f32[8,2048], index: 4, kind: output, shape index: {}]  }
   0x1   :  { %v19_v0 = vld [vmem:[%s2176_s1 + $0x8] sm:$0xff]  ;;  %v21_v2 = vld [vmem:[%s2176_s1 + $0x18] sm:$0xff]  ;;  %422 = vmatprep.mubr.f32.mxu0 %v1259_v3  ;;  %493 = vmatprep.mubr.f32.mxu1 %v1259_v3  ;;  %v18_v6 = vld [vmem:[%s2176_s1] sm:$0xff] }
   0x2   :  { %v35_v1 = vld [vmem:[%s2176_s1 + $0x88] sm:$0xff]  ;;  %v37_v5 = vld [vmem:[%s2176_s1 + $0x98] sm:$0xff]  ;;  %v34_v7 = vld [vmem:[%s2176_s1 + $0x80] sm:$0xff] }
   0x3   :  { %v1002_v4 = vpack.c.bf16 %v35_v1, %v19_v0  ;;  %v1034_v8 = vpack.c.bf16 %v37_v5, %v21_v2  ;;  %v1004_v9 = vpack.c.bf16 %v34_v7, %v18_v6  ;;  %v20_v10 = vld [vmem:[%s2176_s1 + $0x10] sm:$0xff]  ;;  %v51_v12 = vld [vmem:[%s2176_s1 + $0x108] sm:$0xff]  ;;  %v53_v15 = vld [vmem:[%s2176_s1 + $0x118] sm:$0xff] }
   0x4   :  { %v36_v11 = vld [vmem:[%s2176_s1 + $0x90] sm:$0xff]  ;;  %v67_v14 = vld [vmem:[%s2176_s1 + $0x188] sm:$0xff]  ;;  %v69_v16 = vld [vmem:[%s2176_s1 + $0x198] sm:$0xff] }
   0x5   :  { %1003 = vmatprep.subr.bf16.mxu0 %v1002_v4  ;;  %v1036_v13 = vpack.c.bf16 %v36_v11, %v20_v10  ;;  %1035 = vmatprep.subr.bf16.mxu1 %v1034_v8  ;;  %v1006_v17 = vpack.c.bf16 %v67_v14, %v51_v12  ;;  %v1038_v18 = vpack.c.bf16 %v69_v16, %v53_v15  ;;  %v50_v19 = vld [vmem:[%s2176_s1 + $0x100] sm:$0xff]  ;;  %v52_v21 = vld [vmem:[%s2176_s1 + $0x110] sm:$0xff]  ;;  %v83_v24 = vld [vmem:[%s2176_s1 + $0x208] sm:$0xff] }
   0x6   :  { %1005 = vmatpush1.bf16.msra.mxu0 %v1004_v9  ;;  %v66_v20 = vld [vmem:[%s2176_s1 + $0x180] sm:$0xff]  ;;  %v68_v23 = vld [vmem:[%s2176_s1 + $0x190] sm:$0xff]  ;;  %v99_v25 = vld [vmem:[%s2176_s1 + $0x288] sm:$0xff] }
   0x7   :  { %1037 = vmatpush1.bf16.msra.mxu1 %v1036_v13  ;;  %v1008_v22 = vpack.c.bf16 %v66_v20, %v50_v19  ;;  %1007 = vmatprep.subr.bf16.mxu0 %v1006_v17  ;;  %v1040_v26 = vpack.c.bf16 %v68_v23, %v52_v21  ;;  %v1010_v27 = vpack.c.bf16 %v99_v25, %v83_v24  ;;  %v85_v28 = vld [vmem:[%s2176_s1 + $0x218] sm:$0xff]  ;;  %v82_v30 = vld [vmem:[%s2176_s1 + $0x200] sm:$0xff]  ;;  %v84_v33 = vld [vmem:[%s2176_s1 + $0x210] sm:$0xff] }
   0x8   :  { %1039 = vmatprep.subr.bf16.mxu1 %v1038_v18  ;;  %v101_v29 = vld [vmem:[%s2176_s1 + $0x298] sm:$0xff]  ;;  %v98_v32 = vld [vmem:[%s2176_s1 + $0x280] sm:$0xff]  ;;  %v100_v34 = vld [vmem:[%s2176_s1 + $0x290] sm:$0xff] }
   0x9   :  { %v1042_v31 = vpack.c.bf16 %v101_v29, %v85_v28  ;;  %v1012_v35 = vpack.c.bf16 %v98_v32, %v82_v30  ;;  %v115_v36 = vld [vmem:[%s2176_s1 + $0x308] sm:$0xff]  ;;  %v117_v38 = vld [vmem:[%s2176_s1 + $0x318] sm:$0xff]  ;;  %v1044_v39 = vpack.c.bf16 %v100_v34, %v84_v33  ;;  %v114_v42 = vld [vmem:[%s2176_s1 + $0x300] sm:$0xff] }
   0xa   :  { %1009 = vmatpush1.bf16.msra.mxu0 %v1008_v22  ;;  %v131_v37 = vld [vmem:[%s2176_s1 + $0x388] sm:$0xff]  ;;  %v133_v41 = vld [vmem:[%s2176_s1 + $0x398] sm:$0xff]  ;;  %v130_v43 = vld [vmem:[%s2176_s1 + $0x380] sm:$0xff] }
   0xb   :  { %1041 = vmatpush1.bf16.msra.mxu1 %v1040_v26  ;;  %1011 = vmatprep.subr.bf16.mxu0 %v1010_v27  ;;  %v1014_v40 = vpack.c.bf16 %v131_v37, %v115_v36  ;;  %v1046_v44 = vpack.c.bf16 %v133_v41, %v117_v38  ;;  %v116_v45 = vld [vmem:[%s2176_s1 + $0x310] sm:$0xff]  ;;  %v147_v47 = vld [vmem:[%s2176_s1 + $0x408] sm:$0xff]  ;;  %v149_v49 = vld [vmem:[%s2176_s1 + $0x418] sm:$0xff]  ;;  %v1016_v51 = vpack.c.bf16 %v130_v43, %v114_v42 }
   0xc   :  { %1043 = vmatprep.subr.bf16.mxu1 %v1042_v31  ;;  %v132_v46 = vld [vmem:[%s2176_s1 + $0x390] sm:$0xff]  ;;  %v163_v48 = vld [vmem:[%s2176_s1 + $0x488] sm:$0xff]  ;;  %v165_v50 = vld [vmem:[%s2176_s1 + $0x498] sm:$0xff] }
   0xd   :  { %v1048_v52 = vpack.c.bf16 %v132_v46, %v116_v45  ;;  %v1018_v53 = vpack.c.bf16 %v163_v48, %v147_v47  ;;  %v146_v54 = vld [vmem:[%s2176_s1 + $0x400] sm:$0xff]  ;;  %v148_v56 = vld [vmem:[%s2176_s1 + $0x410] sm:$0xff]  ;;  %v1050_v57 = vpack.c.bf16 %v165_v50, %v149_v49  ;;  %v179_v59 = vld [vmem:[%s2176_s1 + $0x508] sm:$0xff] }
   0xe   :  { %1013 = vmatpush1.bf16.msra.mxu0 %v1012_v35  ;;  %v162_v55 = vld [vmem:[%s2176_s1 + $0x480] sm:$0xff]  ;;  %v164_v58 = vld [vmem:[%s2176_s1 + $0x490] sm:$0xff]  ;;  %v195_v60 = vld [vmem:[%s2176_s1 + $0x588] sm:$0xff] }
   0xf   :  { %1045 = vmatpush1.bf16.msra.mxu1 %v1044_v39  ;;  %1015 = vmatprep.subr.bf16.mxu0 %v1014_v40  ;;  %v181_v61 = vld [vmem:[%s2176_s1 + $0x518] sm:$0xff]  ;;  %v1020_v63 = vpack.c.bf16 %v162_v55, %v146_v54  ;;  %v1052_v0 = vpack.c.bf16 %v164_v58, %v148_v56  ;;  %v1022_v1 = vpack.c.bf16 %v195_v60, %v179_v59  ;;  %v178_v2 = vld [vmem:[%s2176_s1 + $0x500] sm:$0xff]  ;;  %v180_v5 = vld [vmem:[%s2176_s1 + $0x510] sm:$0xff] }
  0x10   :  { %1047 = vmatprep.subr.bf16.mxu1 %v1046_v44  ;;  %v197_v62 = vld [vmem:[%s2176_s1 + $0x598] sm:$0xff]  ;;  %v194_v4 = vld [vmem:[%s2176_s1 + $0x580] sm:$0xff]  ;;  %v196_v7 = vld [vmem:[%s2176_s1 + $0x590] sm:$0xff] }
  0x11   :  { %v1054_v6 = vpack.c.bf16 %v197_v62, %v181_v61  ;;  %v211_v8 = vld [vmem:[%s2176_s1 + $0x608] sm:$0xff]  ;;  %v213_v10 = vld [vmem:[%s2176_s1 + $0x618] sm:$0xff]  ;;  %v1024_v12 = vpack.c.bf16 %v194_v4, %v178_v2  ;;  %v1056_v13 = vpack.c.bf16 %v196_v7, %v180_v5  ;;  %v210_v15 = vld [vmem:[%s2176_s1 + $0x600] sm:$0xff] }
  0x12   :  { %1017 = vmatpush1.bf16.msra.mxu0 %v1016_v51  ;;  %v227_v9 = vld [vmem:[%s2176_s1 + $0x688] sm:$0xff]  ;;  %v229_v11 = vld [vmem:[%s2176_s1 + $0x698] sm:$0xff]  ;;  %v226_v16 = vld [vmem:[%s2176_s1 + $0x680] sm:$0xff] }
  0x13   :  { %1049 = vmatpush1.bf16.msra.mxu1 %v1048_v52  ;;  %1019 = vmatprep.subr.bf16.mxu0 %v1018_v53  ;;  %v1026_v14 = vpack.c.bf16 %v227_v9, %v211_v8  ;;  %v212_v17 = vld [vmem:[%s2176_s1 + $0x610] sm:$0xff]  ;;  %v1058_v18 = vpack.c.bf16 %v229_v11, %v213_v10  ;;  %v243_v20 = vld [vmem:[%s2176_s1 + $0x708] sm:$0xff]  ;;  %v245_v22 = vld [vmem:[%s2176_s1 + $0x718] sm:$0xff]  ;;  %v1028_v24 = vpack.c.bf16 %v226_v16, %v210_v15 }
  0x14   :  { %1051 = vmatprep.subr.bf16.mxu1 %v1050_v57  ;;  %v228_v19 = vld [vmem:[%s2176_s1 + $0x690] sm:$0xff]  ;;  %v259_v21 = vld [vmem:[%s2176_s1 + $0x788] sm:$0xff]  ;;  %v261_v23 = vld [vmem:[%s2176_s1 + $0x798] sm:$0xff] }
  0x15   :  { %v1060_v25 = vpack.c.bf16 %v228_v19, %v212_v17  ;;  %v1030_v26 = vpack.c.bf16 %v259_v21, %v243_v20  ;;  %v242_v27 = vld [vmem:[%s2176_s1 + $0x700] sm:$0xff]  ;;  %v244_v29 = vld [vmem:[%s2176_s1 + $0x710] sm:$0xff]  ;;  %v1062_v30 = vpack.c.bf16 %v261_v23, %v245_v22  ;;  %v23_v32 = vld [vmem:[%s2176_s1 + $0x28] sm:$0xff] }
  0x16   :  { %1021 = vmatpush1.bf16.msra.mxu0 %v1020_v63  ;;  %v258_v28 = vld [vmem:[%s2176_s1 + $0x780] sm:$0xff]  ;;  %v260_v31 = vld [vmem:[%s2176_s1 + $0x790] sm:$0xff]  ;;  %v39_v33 = vld [vmem:[%s2176_s1 + $0xa8] sm:$0xff] }
  0x17   :  { %1053 = vmatpush1.bf16.msra.mxu1 %v1052_v0  ;;  %1023 = vmatprep.subr.bf16.mxu0 %v1022_v1  ;;  %v25_v34 = vld [vmem:[%s2176_s1 + $0x38] sm:$0xff]  ;;  %v1032_v36 = vpack.c.bf16 %v258_v28, %v242_v27  ;;  %v1064_v37 = vpack.c.bf16 %v260_v31, %v244_v29  ;;  %v1066_v38 = vpack.c.bf16 %v39_v33, %v23_v32  ;;  %v22_v39 = vld [vmem:[%s2176_s1 + $0x20] sm:$0xff]  ;;  %v24_v41 = vld [vmem:[%s2176_s1 + $0x30] sm:$0xff] }
  0x18   :  { %1055 = vmatprep.subr.bf16.mxu1 %v1054_v6  ;;  %v41_v35 = vld [vmem:[%s2176_s1 + $0xb8] sm:$0xff]  ;;  %v38_v40 = vld [vmem:[%s2176_s1 + $0xa0] sm:$0xff]  ;;  %v40_v43 = vld [vmem:[%s2176_s1 + $0xb0] sm:$0xff] }
  0x19   :  { %v1098_v42 = vpack.c.bf16 %v41_v35, %v25_v34  ;;  %v55_v44 = vld [vmem:[%s2176_s1 + $0x128] sm:$0xff]  ;;  %v57_v46 = vld [vmem:[%s2176_s1 + $0x138] sm:$0xff]  ;;  %v1518_v48 = vld [vmem:[%s2177_s0] sm:$0xff]  ;;  %v1068_v49 = vpack.c.bf16 %v38_v40, %v22_v39  ;;  %v1100_v50 = vpack.c.bf16 %v40_v43, %v24_v41 }
  0x1a   :  { %1025 = vmatpush1.bf16.msra.mxu0 %v1024_v12  ;;  %v71_v45 = vld [vmem:[%s2176_s1 + $0x1a8] sm:$0xff]  ;;  %v73_v47 = vld [vmem:[%s2176_s1 + $0x1b8] sm:$0xff]  ;;  %v54_v52 = vld [vmem:[%s2176_s1 + $0x120] sm:$0xff] }
  0x1b   :  { %1057 = vmatpush1.bf16.msra.mxu1 %v1056_v13  ;;  %1027 = vmatprep.subr.bf16.mxu0 %v1026_v14  ;;  %v1070_v51 = vpack.c.bf16 %v71_v45, %v55_v44  ;;  %v70_v53 = vld [vmem:[%s2176_s1 + $0x1a0] sm:$0xff]  ;;  %v56_v54 = vld [vmem:[%s2176_s1 + $0x130] sm:$0xff]  ;;  %v1102_v55 = vpack.c.bf16 %v73_v47, %v57_v46  ;;  %v87_v57 = vld [vmem:[%s2176_s1 + $0x228] sm:$0xff] }
  0x1c   :  { %1059 = vmatprep.subr.bf16.mxu1 %v1058_v18  ;;  %v72_v56 = vld [vmem:[%s2176_s1 + $0x1b0] sm:$0xff]  ;;  %v103_v58 = vld [vmem:[%s2176_s1 + $0x2a8] sm:$0xff]  ;;  %v89_v59 = vld [vmem:[%s2176_s1 + $0x238] sm:$0xff]  ;;  %v1072_v61 = vpack.c.bf16 %v70_v53, %v54_v52 }
  0x1d   :  { %v105_v60 = vld [vmem:[%s2176_s1 + $0x2b8] sm:$0xff]  ;;  %v1104_v62 = vpack.c.bf16 %v72_v56, %v56_v54  ;;  %v1074_v63 = vpack.c.bf16 %v103_v58, %v87_v57  ;;  %v86_v0 = vld [vmem:[%s2176_s1 + $0x220] sm:$0xff]  ;;  %v88_v2 = vld [vmem:[%s2176_s1 + $0x230] sm:$0xff] }
  0x1e   :  { %1029 = vmatpush1.bf16.msra.mxu0 %v1028_v24  ;;  %v102_v1 = vld [vmem:[%s2176_s1 + $0x2a0] sm:$0xff]  ;;  %v1106_v4 = vpack.c.bf16 %v105_v60, %v89_v59  ;;  %v104_v5 = vld [vmem:[%s2176_s1 + $0x2b0] sm:$0xff]  ;;  %v119_v6 = vld [vmem:[%s2176_s1 + $0x328] sm:$0xff] }
  0x1f   :  { %1061 = vmatpush1.bf16.msra.mxu1 %v1060_v25  ;;  %1031 = vmatprep.subr.bf16.mxu0 %v1030_v26  ;;  %v135_v7 = vld [vmem:[%s2176_s1 + $0x3a8] sm:$0xff]  ;;  %v121_v8 = vld [vmem:[%s2176_s1 + $0x338] sm:$0xff]  ;;  %v1076_v10 = vpack.c.bf16 %v102_v1, %v86_v0  ;;  %v1108_v11 = vpack.c.bf16 %v104_v5, %v88_v2  ;;  %v118_v13 = vld [vmem:[%s2176_s1 + $0x320] sm:$0xff] }
  0x20   :  { %1063 = vmatprep.subr.bf16.mxu1 %v1062_v30  ;;  %v137_v9 = vld [vmem:[%s2176_s1 + $0x3b8] sm:$0xff]  ;;  %v1078_v12 = vpack.c.bf16 %v135_v7, %v119_v6  ;;  %v134_v14 = vld [vmem:[%s2176_s1 + $0x3a0] sm:$0xff]  ;;  %v120_v15 = vld [vmem:[%s2176_s1 + $0x330] sm:$0xff] }
  0x21   :  { %v1110_v16 = vpack.c.bf16 %v137_v9, %v121_v8  ;;  %v136_v17 = vld [vmem:[%s2176_s1 + $0x3b0] sm:$0xff]  ;;  %v151_v18 = vld [vmem:[%s2176_s1 + $0x428] sm:$0xff]  ;;  %v153_v20 = vld [vmem:[%s2176_s1 + $0x438] sm:$0xff]  ;;  %v1080_v22 = vpack.c.bf16 %v134_v14, %v118_v13 }
  0x22   :  { %1033 = vmatpush1.bf16.msra.mxu0 %v1032_v36  ;;  %v167_v19 = vld [vmem:[%s2176_s1 + $0x4a8] sm:$0xff]  ;;  %v169_v21 = vld [vmem:[%s2176_s1 + $0x4b8] sm:$0xff]  ;;  %v1112_v23 = vpack.c.bf16 %v136_v17, %v120_v15  ;;  %v150_v25 = vld [vmem:[%s2176_s1 + $0x420] sm:$0xff] }
  0x23   :  { %1065 = vmatpush1.bf16.msra.mxu1 %v1064_v37  ;;  %1067 = vmatprep.subr.bf16.mxu0 %v1066_v38  ;;  %v1082_v24 = vpack.c.bf16 %v167_v19, %v151_v18  ;;  %v166_v26 = vld [vmem:[%s2176_s1 + $0x4a0] sm:$0xff]  ;;  %v152_v27 = vld [vmem:[%s2176_s1 + $0x430] sm:$0xff]  ;;  %v1114_v28 = vpack.c.bf16 %v169_v21, %v153_v20  ;;  %v183_v30 = vld [vmem:[%s2176_s1 + $0x528] sm:$0xff] }
  0x24   :  { %1099 = vmatprep.subr.bf16.mxu1 %v1098_v42  ;;  %v168_v29 = vld [vmem:[%s2176_s1 + $0x4b0] sm:$0xff]  ;;  %v199_v31 = vld [vmem:[%s2176_s1 + $0x5a8] sm:$0xff]  ;;  %v185_v32 = vld [vmem:[%s2176_s1 + $0x538] sm:$0xff]  ;;  %v1084_v34 = vpack.c.bf16 %v166_v26, %v150_v25 }
  0x25   :  { %423 = vmatmul.mubr.f32.vlgmr.msra.gmra.mrb[0].mxu0 %v1518_v48  ;;  %v201_v33 = vld [vmem:[%s2176_s1 + $0x5b8] sm:$0xff]  ;;  %v1116_v35 = vpack.c.bf16 %v168_v29, %v152_v27  ;;  %v1086_v36 = vpack.c.bf16 %v199_v31, %v183_v30  ;;  %v182_v37 = vld [vmem:[%s2176_s1 + $0x520] sm:$0xff]  ;;  %v184_v39 = vld [vmem:[%s2176_s1 + $0x530] sm:$0xff] }
  0x26   :  { %494 = vmatmul.mubr.f32.vlgmr.msra.gmra.mrb[0].mxu1 %v1518_v48  ;;  %1069 = vmatpush1.bf16.msra.mxu0 %v1068_v49  ;;  %v198_v38 = vld [vmem:[%s2176_s1 + $0x5a0] sm:$0xff]  ;;  %v1118_v40 = vpack.c.bf16 %v201_v33, %v185_v32  ;;  %v200_v41 = vld [vmem:[%s2176_s1 + $0x5b0] sm:$0xff]  ;;  %v215_v42 = vld [vmem:[%s2176_s1 + $0x628] sm:$0xff] }
  0x27   :  { %1101 = vmatpush1.bf16.msra.mxu1 %v1100_v50  ;;  %1071 = vmatprep.subr.bf16.mxu0 %v1070_v51  ;;  %v231_v43 = vld [vmem:[%s2176_s1 + $0x6a8] sm:$0xff]  ;;  %v217_v44 = vld [vmem:[%s2176_s1 + $0x638] sm:$0xff]  ;;  %v1088_v46 = vpack.c.bf16 %v198_v38, %v182_v37  ;;  %v1120_v47 = vpack.c.bf16 %v200_v41, %v184_v39  ;;  %v214_v50 = vld [vmem:[%s2176_s1 + $0x620] sm:$0xff] }
  0x28   :  { %1103 = vmatprep.subr.bf16.mxu1 %v1102_v55  ;;  %564 = vmatprep.mubr.f32.mxu0 %v1259_v3  ;;  %v233_v45 = vld [vmem:[%s2176_s1 + $0x6b8] sm:$0xff]  ;;  %v1090_v49 = vpack.c.bf16 %v231_v43, %v215_v42  ;;  %v230_v51 = vld [vmem:[%s2176_s1 + $0x6a0] sm:$0xff]  ;;  %v216_v52 = vld [vmem:[%s2176_s1 + $0x630] sm:$0xff] }
  0x29   :  { %635 = vmatprep.mubr.f32.mxu1 %v1259_v3  ;;  %v1122_v53 = vpack.c.bf16 %v233_v45, %v217_v44  ;;  %v232_v54 = vld [vmem:[%s2176_s1 + $0x6b0] sm:$0xff]  ;;  %v247_v55 = vld [vmem:[%s2176_s1 + $0x728] sm:$0xff]  ;;  %v249_v57 = vld [vmem:[%s2176_s1 + $0x738] sm:$0xff]  ;;  %v1092_v59 = vpack.c.bf16 %v230_v51, %v214_v50 }
  0x2a   :  { %1073 = vmatpush1.bf16.msra.mxu0 %v1072_v61  ;;  %v263_v56 = vld [vmem:[%s2176_s1 + $0x7a8] sm:$0xff]  ;;  %v265_v58 = vld [vmem:[%s2176_s1 + $0x7b8] sm:$0xff]  ;;  %v1124_v60 = vpack.c.bf16 %v232_v54, %v216_v52  ;;  %v248_v0 = vld [vmem:[%s2176_s1 + $0x730] sm:$0xff] }
  0x2b   :  { %1105 = vmatpush1.bf16.msra.mxu1 %v1104_v62  ;;  %1075 = vmatprep.subr.bf16.mxu0 %v1074_v63  ;;  %v1094_v61 = vpack.c.bf16 %v263_v56, %v247_v55  ;;  %v246_v62 = vld [vmem:[%s2176_s1 + $0x720] sm:$0xff]  ;;  %v1126_v1 = vpack.c.bf16 %v265_v58, %v249_v57  ;;  %v264_v2 = vld [vmem:[%s2176_s1 + $0x7b0] sm:$0xff]  ;;  %v43_v5 = vld [vmem:[%s2176_s1 + $0xc8] sm:$0xff] }
  0x2c   :  { %1107 = vmatprep.subr.bf16.mxu1 %v1106_v4  ;;  %v262_v63 = vld [vmem:[%s2176_s1 + $0x7a0] sm:$0xff]  ;;  %v27_v4 = vld [vmem:[%s2176_s1 + $0x48] sm:$0xff]  ;;  %v29_v6 = vld [vmem:[%s2176_s1 + $0x58] sm:$0xff]  ;;  %v1128_v9 = vpack.c.bf16 %v264_v2, %v248_v0 }
  0x2d   :  { %v45_v7 = vld [vmem:[%s2176_s1 + $0xd8] sm:$0xff]  ;;  %v1096_v8 = vpack.c.bf16 %v262_v63, %v246_v62  ;;  %v28_v13 = vld [vmem:[%s2176_s1 + $0x50] sm:$0xff]  ;;  %v75_v17 = vld [vmem:[%s2176_s1 + $0x1c8] sm:$0xff] }
  0x2e   :  { %1077 = vmatpush1.bf16.msra.mxu0 %v1076_v10  ;;  %v1130_v10 = vpack.c.bf16 %v43_v5, %v27_v4  ;;  %v1162_v14 = vpack.c.bf16 %v45_v7, %v29_v6  ;;  %v44_v15 = vld [vmem:[%s2176_s1 + $0xd0] sm:$0xff]  ;;  %v61_v18 = vld [vmem:[%s2176_s1 + $0x158] sm:$0xff]  ;;  %v107_v29 = vld [vmem:[%s2176_s1 + $0x2c8] sm:$0xff] }
  0x2f   :  { %1109 = vmatpush1.bf16.msra.mxu1 %v1108_v11  ;;  %1079 = vmatprep.subr.bf16.mxu0 %v1078_v12  ;;  %v26_v11 = vld [vmem:[%s2176_s1 + $0x40] sm:$0xff]  ;;  %v77_v19 = vld [vmem:[%s2176_s1 + $0x1d8] sm:$0xff]  ;;  %v1164_v21 = vpack.c.bf16 %v44_v15, %v28_v13  ;;  %v60_v25 = vld [vmem:[%s2176_s1 + $0x150] sm:$0xff] }
  0x30   :  { %1111 = vmatprep.subr.bf16.mxu1 %v1110_v16  ;;  %v42_v12 = vld [vmem:[%s2176_s1 + $0xc0] sm:$0xff]  ;;  %v59_v16 = vld [vmem:[%s2176_s1 + $0x148] sm:$0xff]  ;;  %v1166_v26 = vpack.c.bf16 %v77_v19, %v61_v18  ;;  %v76_v27 = vld [vmem:[%s2176_s1 + $0x1d0] sm:$0xff] }
  0x31   :  { %v1132_v20 = vpack.c.bf16 %v42_v12, %v26_v11  ;;  %v93_v30 = vld [vmem:[%s2176_s1 + $0x258] sm:$0xff]  ;;  %v1168_v33 = vpack.c.bf16 %v76_v27, %v60_v25  ;;  %v92_v37 = vld [vmem:[%s2176_s1 + $0x250] sm:$0xff]  ;;  %v139_v41 = vld [vmem:[%s2176_s1 + $0x3c8] sm:$0xff] }
  0x32   :  { %1081 = vmatpush1.bf16.msra.mxu0 %v1080_v22  ;;  %v1134_v22 = vpack.c.bf16 %v75_v17, %v59_v16  ;;  %v109_v31 = vld [vmem:[%s2176_s1 + $0x2d8] sm:$0xff]  ;;  %v108_v39 = vld [vmem:[%s2176_s1 + $0x2d0] sm:$0xff]  ;;  %v171_v54 = vld [vmem:[%s2176_s1 + $0x4c8] sm:$0xff] }
  0x33   :  { %1113 = vmatpush1.bf16.msra.mxu1 %v1112_v23  ;;  %1083 = vmatprep.subr.bf16.mxu0 %v1082_v24  ;;  %v58_v23 = vld [vmem:[%s2176_s1 + $0x140] sm:$0xff]  ;;  %v1170_v38 = vpack.c.bf16 %v109_v31, %v93_v30  ;;  %v125_v42 = vld [vmem:[%s2176_s1 + $0x358] sm:$0xff]  ;;  %v1172_v45 = vpack.c.bf16 %v108_v39, %v92_v37  ;;  %v124_v50 = vld [vmem:[%s2176_s1 + $0x350] sm:$0xff] }
  0x34   :  { %1115 = vmatprep.subr.bf16.mxu1 %v1114_v28  ;;  %v74_v24 = vld [vmem:[%s2176_s1 + $0x1c0] sm:$0xff]  ;;  %v91_v28 = vld [vmem:[%s2176_s1 + $0x248] sm:$0xff]  ;;  %v141_v43 = vld [vmem:[%s2176_s1 + $0x3d8] sm:$0xff] }
  0x35   :  { %v1136_v32 = vpack.c.bf16 %v74_v24, %v58_v23  ;;  %v1174_v51 = vpack.c.bf16 %v141_v43, %v125_v42  ;;  %v140_v52 = vld [vmem:[%s2176_s1 + $0x3d0] sm:$0xff]  ;;  %v157_v55 = vld [vmem:[%s2176_s1 + $0x458] sm:$0xff]  ;;  %v203_v2 = vld [vmem:[%s2176_s1 + $0x5c8] sm:$0xff] }
  0x36   :  { %1085 = vmatpush1.bf16.msra.mxu0 %v1084_v34  ;;  %v1138_v34 = vpack.c.bf16 %v107_v29, %v91_v28  ;;  %v173_v56 = vld [vmem:[%s2176_s1 + $0x4d8] sm:$0xff]  ;;  %v1176_v58 = vpack.c.bf16 %v140_v52, %v124_v50  ;;  %v156_v62 = vld [vmem:[%s2176_s1 + $0x450] sm:$0xff]  ;;  %v235_v15 = vld [vmem:[%s2176_s1 + $0x6c8] sm:$0xff] }
  0x37   :  { %1117 = vmatpush1.bf16.msra.mxu1 %v1116_v35  ;;  %1087 = vmatprep.subr.bf16.mxu0 %v1086_v36  ;;  %v90_v35 = vld [vmem:[%s2176_s1 + $0x240] sm:$0xff]  ;;  %v1178_v63 = vpack.c.bf16 %v173_v56, %v157_v55  ;;  %v172_v0 = vld [vmem:[%s2176_s1 + $0x4d0] sm:$0xff]  ;;  %v189_v4 = vld [vmem:[%s2176_s1 + $0x558] sm:$0xff] }
  0x38   :  { %1119 = vmatprep.subr.bf16.mxu1 %v1118_v40  ;;  %v106_v36 = vld [vmem:[%s2176_s1 + $0x2c0] sm:$0xff]  ;;  %v123_v40 = vld [vmem:[%s2176_s1 + $0x348] sm:$0xff]  ;;  %v205_v5 = vld [vmem:[%s2176_s1 + $0x5d8] sm:$0xff]  ;;  %v1180_v7 = vpack.c.bf16 %v172_v0, %v156_v62 }
  0x39   :  { %v1140_v44 = vpack.c.bf16 %v106_v36, %v90_v35  ;;  %v188_v11 = vld [vmem:[%s2176_s1 + $0x550] sm:$0xff]  ;;  %v1182_v12 = vpack.c.bf16 %v205_v5, %v189_v4  ;;  %v221_v16 = vld [vmem:[%s2176_s1 + $0x658] sm:$0xff]  ;;  %v267_v27 = vld [vmem:[%s2176_s1 + $0x7c8] sm:$0xff] }
  0x3a   :  { %1089 = vmatpush1.bf16.msra.mxu0 %v1088_v46  ;;  %v1142_v46 = vpack.c.bf16 %v139_v41, %v123_v40  ;;  %v204_v13 = vld [vmem:[%s2176_s1 + $0x5d0] sm:$0xff]  ;;  %v237_v17 = vld [vmem:[%s2176_s1 + $0x6d8] sm:$0xff]  ;;  %v47_v39 = vld [vmem:[%s2176_s1 + $0xe8] sm:$0xff] }
  0x3b   :  { %1121 = vmatpush1.bf16.msra.mxu1 %v1120_v47  ;;  %1091 = vmatprep.subr.bf16.mxu0 %v1090_v49  ;;  %v122_v47 = vld [vmem:[%s2176_s1 + $0x340] sm:$0xff]  ;;  %v1184_v19 = vpack.c.bf16 %v204_v13, %v188_v11  ;;  %v220_v23 = vld [vmem:[%s2176_s1 + $0x650] sm:$0xff]  ;;  %v1186_v24 = vpack.c.bf16 %v237_v17, %v221_v16  ;;  %v253_v28 = vld [vmem:[%s2176_s1 + $0x758] sm:$0xff] }
  0x3c   :  { %1123 = vmatprep.subr.bf16.mxu1 %v1122_v53  ;;  %v138_v49 = vld [vmem:[%s2176_s1 + $0x3c0] sm:$0xff]  ;;  %v155_v53 = vld [vmem:[%s2176_s1 + $0x448] sm:$0xff]  ;;  %v236_v25 = vld [vmem:[%s2176_s1 + $0x6d0] sm:$0xff] }
  0x3d   :  { %v1144_v57 = vpack.c.bf16 %v138_v49, %v122_v47  ;;  %v269_v29 = vld [vmem:[%s2176_s1 + $0x7d8] sm:$0xff]  ;;  %v1188_v31 = vpack.c.bf16 %v236_v25, %v220_v23  ;;  %v252_v35 = vld [vmem:[%s2176_s1 + $0x750] sm:$0xff]  ;;  %v79_v52 = vld [vmem:[%s2176_s1 + $0x1e8] sm:$0xff] }
  0x3e   :  { %1093 = vmatpush1.bf16.msra.mxu0 %v1092_v59  ;;  %v1146_v59 = vpack.c.bf16 %v171_v54, %v155_v53  ;;  %v1190_v36 = vpack.c.bf16 %v269_v29, %v253_v28  ;;  %v268_v37 = vld [vmem:[%s2176_s1 + $0x7d0] sm:$0xff]  ;;  %v33_v40 = vld [vmem:[%s2176_s1 + $0x78] sm:$0xff]  ;;  %v111_v0 = vld [vmem:[%s2176_s1 + $0x2e8] sm:$0xff] }
  0x3f   :  { %1125 = vmatpush1.bf16.msra.mxu1 %v1124_v60  ;;  %1095 = vmatprep.subr.bf16.mxu0 %v1094_v61  ;;  %v154_v60 = vld [vmem:[%s2176_s1 + $0x440] sm:$0xff]  ;;  %v49_v41 = vld [vmem:[%s2176_s1 + $0xf8] sm:$0xff]  ;;  %v1192_v43 = vpack.c.bf16 %v268_v37, %v252_v35  ;;  %v32_v47 = vld [vmem:[%s2176_s1 + $0x70] sm:$0xff] }
  0x40   :  { %1127 = vmatprep.subr.bf16.mxu1 %v1126_v1  ;;  %v170_v61 = vld [vmem:[%s2176_s1 + $0x4c0] sm:$0xff]  ;;  %v187_v1 = vld [vmem:[%s2176_s1 + $0x548] sm:$0xff]  ;;  %v1226_v49 = vpack.c.bf16 %v49_v41, %v33_v40  ;;  %v48_v50 = vld [vmem:[%s2176_s1 + $0xf0] sm:$0xff] }
  0x41   :  { %v1148_v6 = vpack.c.bf16 %v170_v61, %v154_v60  ;;  %v65_v53 = vld [vmem:[%s2176_s1 + $0x178] sm:$0xff]  ;;  %v1228_v56 = vpack.c.bf16 %v48_v50, %v32_v47  ;;  %v64_v60 = vld [vmem:[%s2176_s1 + $0x170] sm:$0xff]  ;;  %v143_v13 = vld [vmem:[%s2176_s1 + $0x3e8] sm:$0xff] }
  0x42   :  { %1097 = vmatpush1.bf16.msra.mxu0 %v1096_v8  ;;  %v1150_v8 = vpack.c.bf16 %v203_v2, %v187_v1  ;;  %v81_v54 = vld [vmem:[%s2176_s1 + $0x1f8] sm:$0xff]  ;;  %v80_v62 = vld [vmem:[%s2176_s1 + $0x1f0] sm:$0xff]  ;;  %v159_v23 = vld [vmem:[%s2176_s1 + $0x468] sm:$0xff] }
  0x43   :  { %1129 = vmatpush1.bf16.msra.mxu1 %v1128_v9  ;;  %1131 = vmatprep.subr.bf16.mxu0 %v1130_v10  ;;  %v186_v9 = vld [vmem:[%s2176_s1 + $0x540] sm:$0xff]  ;;  %v1230_v61 = vpack.c.bf16 %v81_v54, %v65_v53  ;;  %v97_v1 = vld [vmem:[%s2176_s1 + $0x278] sm:$0xff]  ;;  %v1232_v5 = vpack.c.bf16 %v80_v62, %v64_v60  ;;  %v112_v11 = vld [vmem:[%s2176_s1 + $0x2f0] sm:$0xff] }
  0x44   :  { %1163 = vmatprep.subr.bf16.mxu1 %v1162_v14  ;;  %v202_v10 = vld [vmem:[%s2176_s1 + $0x5c0] sm:$0xff]  ;;  %v219_v14 = vld [vmem:[%s2176_s1 + $0x648] sm:$0xff]  ;;  %v113_v2 = vld [vmem:[%s2176_s1 + $0x2f8] sm:$0xff] }
  0x45   :  { %565 = vmatmul.mubr.f32.vlgmr.msra.gmra.mrb[2].mxu0 %v1518_v48  ;;  %v1152_v18 = vpack.c.bf16 %v202_v10, %v186_v9  ;;  %v96_v9 = vld [vmem:[%s2176_s1 + $0x270] sm:$0xff]  ;;  %v1234_v10 = vpack.c.bf16 %v113_v2, %v97_v1  ;;  %v161_v25 = vld [vmem:[%s2176_s1 + $0x478] sm:$0xff]  ;;  %v191_v35 = vld [vmem:[%s2176_s1 + $0x568] sm:$0xff] }
  0x46   :  { %636 = vmatmul.mubr.f32.vlgmr.msra.gmra.mrb[2].mxu1 %v1518_v48  ;;  %1133 = vmatpush1.bf16.msra.mxu0 %v1132_v20  ;;  %v1154_v20 = vpack.c.bf16 %v235_v15, %v219_v14  ;;  %v129_v14 = vld [vmem:[%s2176_s1 + $0x378] sm:$0xff]  ;;  %v1236_v17 = vpack.c.bf16 %v112_v11, %v96_v9  ;;  %v223_v47 = vld [vmem:[%s2176_s1 + $0x668] sm:$0xff]  ;;  %v278_v11 = vlaneseq }
  0x47   :  { %1165 = vmatpush1.bf16.msra.mxu1 %v1164_v21  ;;  %1135 = vmatprep.subr.bf16.mxu0 %v1134_v22  ;;  %v218_v21 = vld [vmem:[%s2176_s1 + $0x640] sm:$0xff]  ;;  %v145_v15 = vld [vmem:[%s2176_s1 + $0x3f8] sm:$0xff]  ;;  %v255_v60 = vld [vmem:[%s2176_s1 + $0x768] sm:$0xff] }
  0x48   :  { %1167 = vmatprep.subr.bf16.mxu1 %v1166_v26  ;;  %706 = vmatprep.mubr.f32.mxu0 %v1259_v3  ;;  %v234_v22 = vld [vmem:[%s2176_s1 + $0x6c0] sm:$0xff]  ;;  %v251_v26 = vld [vmem:[%s2176_s1 + $0x748] sm:$0xff]  ;;  %v193_v37 = vld [vmem:[%s2176_s1 + $0x578] sm:$0xff] }
  0x49   :  { %777 = vmatprep.mubr.f32.mxu1 %v1259_v3  ;;  %v1156_v30 = vpack.c.bf16 %v234_v22, %v218_v21  ;;  %v128_v21 = vld [vmem:[%s2176_s1 + $0x370] sm:$0xff]  ;;  %v225_v50 = vld [vmem:[%s2176_s1 + $0x678] sm:$0xff] }
  0x4a   :  { %1137 = vmatpush1.bf16.msra.mxu0 %v1136_v32  ;;  %v1158_v32 = vpack.c.bf16 %v267_v27, %v251_v26  ;;  %v144_v22 = vld [vmem:[%s2176_s1 + $0x3f0] sm:$0xff]  ;;  %v177_v26 = vld [vmem:[%s2176_s1 + $0x4f8] sm:$0xff] }
  0x4b   :  { %1169 = vmatpush1.bf16.msra.mxu1 %v1168_v33  ;;  %1139 = vmatprep.subr.bf16.mxu0 %v1138_v34  ;;  %v250_v33 = vld [vmem:[%s2176_s1 + $0x740] sm:$0xff]  ;;  %v1240_v28 = vpack.c.bf16 %v144_v22, %v128_v21  ;;  %v257_v62 = vld [vmem:[%s2176_s1 + $0x778] sm:$0xff] }
  0x4c   :  { %1171 = vmatprep.subr.bf16.mxu1 %v1170_v38  ;;  %v266_v34 = vld [vmem:[%s2176_s1 + $0x7c0] sm:$0xff]  ;;  %v31_v38 = vld [vmem:[%s2176_s1 + $0x68] sm:$0xff] }
  0x4d   :  { %v1160_v42 = vpack.c.bf16 %v266_v34, %v250_v33  ;;  %v1242_v33 = vpack.c.bf16 %v177_v26, %v161_v25  ;;  %v176_v34 = vld [vmem:[%s2176_s1 + $0x4f0] sm:$0xff] }
  0x4e   :  { %1141 = vmatpush1.bf16.msra.mxu0 %v1140_v44  ;;  %v1194_v44 = vpack.c.bf16 %v47_v39, %v31_v38  ;;  %v209_v38 = vld [vmem:[%s2176_s1 + $0x5f8] sm:$0xff] }
  0x4f   :  { %1173 = vmatpush1.bf16.msra.mxu1 %v1172_v45  ;;  %1143 = vmatprep.subr.bf16.mxu0 %v1142_v46  ;;  %v30_v45 = vld [vmem:[%s2176_s1 + $0x60] sm:$0xff] }
  0x50   :  { %1175 = vmatprep.subr.bf16.mxu1 %v1174_v51  ;;  %v46_v46 = vld [vmem:[%s2176_s1 + $0xe0] sm:$0xff]  ;;  %v63_v51 = vld [vmem:[%s2176_s1 + $0x168] sm:$0xff] }
  0x51   :  { %v1196_v55 = vpack.c.bf16 %v46_v46, %v30_v45  ;;  %v1246_v45 = vpack.c.bf16 %v209_v38, %v193_v37  ;;  %v208_v46 = vld [vmem:[%s2176_s1 + $0x5f0] sm:$0xff] }
  0x52   :  { %1145 = vmatpush1.bf16.msra.mxu0 %v1144_v57  ;;  %v1198_v57 = vpack.c.bf16 %v79_v52, %v63_v51  ;;  %v241_v51 = vld [vmem:[%s2176_s1 + $0x6f8] sm:$0xff] }
  0x53   :  { %1177 = vmatpush1.bf16.msra.mxu1 %v1176_v58  ;;  %1147 = vmatprep.subr.bf16.mxu0 %v1146_v59  ;;  %v62_v58 = vld [vmem:[%s2176_s1 + $0x160] sm:$0xff] }
  0x54   :  { %1179 = vmatprep.subr.bf16.mxu1 %v1178_v63  ;;  %v78_v59 = vld [vmem:[%s2176_s1 + $0x1e0] sm:$0xff]  ;;  %v95_v63 = vld [vmem:[%s2176_s1 + $0x268] sm:$0xff] }
  0x55   :  { %v1200_v4 = vpack.c.bf16 %v78_v59, %v62_v58  ;;  %v1250_v58 = vpack.c.bf16 %v241_v51, %v225_v50  ;;  %v240_v59 = vld [vmem:[%s2176_s1 + $0x6f0] sm:$0xff] }
  0x56   :  { %1149 = vmatpush1.bf16.msra.mxu0 %v1148_v6  ;;  %v1202_v6 = vpack.c.bf16 %v111_v0, %v95_v63  ;;  %v273_v63 = vld [vmem:[%s2176_s1 + $0x7f8] sm:$0xff] }
  0x57   :  { %1181 = vmatpush1.bf16.msra.mxu1 %v1180_v7  ;;  %1151 = vmatprep.subr.bf16.mxu0 %v1150_v8  ;;  %v94_v7 = vld [vmem:[%s2176_s1 + $0x260] sm:$0xff] }
  0x58   :  { %1183 = vmatprep.subr.bf16.mxu1 %v1182_v12  ;;  %v110_v8 = vld [vmem:[%s2176_s1 + $0x2e0] sm:$0xff]  ;;  %v127_v12 = vld [vmem:[%s2176_s1 + $0x368] sm:$0xff] }
  0x59   :  { %v1204_v16 = vpack.c.bf16 %v110_v8, %v94_v7  ;;  %v256_v7 = vld [vmem:[%s2176_s1 + $0x770] sm:$0xff] }
  0x5a   :  { %1153 = vmatpush1.bf16.msra.mxu0 %v1152_v18  ;;  %v1206_v18 = vpack.c.bf16 %v143_v13, %v127_v12  ;;  %v272_v8 = vld [vmem:[%s2176_s1 + $0x7f0] sm:$0xff]  ;;  %v279_v12 = vshrl.u32 %v278_v11, 7 }
  0x5b   :  { %1185 = vmatpush1.bf16.msra.mxu1 %v1184_v19  ;;  %1155 = vmatprep.subr.bf16.mxu0 %v1154_v20  ;;  %v126_v19 = vld [vmem:[%s2176_s1 + $0x360] sm:$0xff] }
  0x5c   :  { %1187 = vmatprep.subr.bf16.mxu1 %v1186_v24  ;;  %v142_v20 = vld [vmem:[%s2176_s1 + $0x3e0] sm:$0xff]  ;;  %v175_v24 = vld [vmem:[%s2176_s1 + $0x4e8] sm:$0xff]  ;;  %v280_v13 = vsub.s32 0, %v279_v12  ;;  %v304_v22 = vsub.s32 6, %v279_v12 }
  0x5d   :  { %v1208_v27 = vpack.c.bf16 %v142_v20, %v126_v19  ;;  %v1210_v29 = vpack.c.bf16 %v175_v24, %v159_v23  ;;  %v300_v23 = vsub.s32 5, %v279_v12  ;;  %v308_v24 = vsub.s32 7, %v279_v12 }
  0x5e   :  { %1157 = vmatpush1.bf16.msra.mxu0 %v1156_v30  ;;  %v158_v30 = vld [vmem:[%s2176_s1 + $0x460] sm:$0xff] }
  0x5f   :  { %1189 = vmatpush1.bf16.msra.mxu1 %v1188_v31  ;;  %1159 = vmatprep.subr.bf16.mxu0 %v1158_v32  ;;  %v174_v31 = vld [vmem:[%s2176_s1 + $0x4e0] sm:$0xff]  ;;  %v160_v32 = vld [vmem:[%s2176_s1 + $0x470] sm:$0xff] }
  0x60   :  { %1191 = vmatprep.subr.bf16.mxu1 %v1190_v36  ;;  %v207_v36 = vld [vmem:[%s2176_s1 + $0x5e8] sm:$0xff]  ;;  %v1212_v39 = vpack.c.bf16 %v174_v31, %v158_v30  ;;  %v1244_v40 = vpack.c.bf16 %v176_v34, %v160_v32 }
  0x61   :  { %v1214_v41 = vpack.c.bf16 %v207_v36, %v191_v35  ;;  %v927_v31 = vld [vmem:[%s2179_s3 + $0x8] sm:$0xff] }
  0x62   :  { %1161 = vmatpush1.bf16.msra.mxu0 %v1160_v42  ;;  %v190_v42 = vld [vmem:[%s2176_s1 + $0x560] sm:$0xff]  ;;  %v936_v37 = vunpack.c.l.bf16 %v927_v31 }
  0x63   :  { %1193 = vmatpush1.bf16.msra.mxu1 %v1192_v43  ;;  %1195 = vmatprep.subr.bf16.mxu0 %v1194_v44  ;;  %v206_v43 = vld [vmem:[%s2176_s1 + $0x5e0] sm:$0xff]  ;;  %v192_v44 = vld [vmem:[%s2176_s1 + $0x570] sm:$0xff] }
  0x64   :  { %1227 = vmatprep.subr.bf16.mxu1 %v1226_v49  ;;  %v239_v49 = vld [vmem:[%s2176_s1 + $0x6e8] sm:$0xff]  ;;  %v1216_v52 = vpack.c.bf16 %v206_v43, %v190_v42  ;;  %v1248_v53 = vpack.c.bf16 %v208_v46, %v192_v44  ;;  %v937_v42 = vunpack.c.h.bf16 %v927_v31 }
  0x65   :  { %707 = vmatmul.mubr.f32.vlgmr.msra.gmra.mrb[4].mxu0 %v1518_v48  ;;  %v1218_v54 = vpack.c.bf16 %v239_v49, %v223_v47 }
  0x66   :  { %778 = vmatmul.mubr.f32.vlgmr.msra.gmra.mrb[4].mxu1 %v1518_v48  ;;  %1197 = vmatpush1.bf16.msra.mxu0 %v1196_v55  ;;  %v222_v55 = vld [vmem:[%s2176_s1 + $0x660] sm:$0xff] }
  0x67   :  { %1229 = vmatpush1.bf16.msra.mxu1 %v1228_v56  ;;  %1199 = vmatprep.subr.bf16.mxu0 %v1198_v57  ;;  %v238_v56 = vld [vmem:[%s2176_s1 + $0x6e0] sm:$0xff]  ;;  %v224_v57 = vld [vmem:[%s2176_s1 + $0x670] sm:$0xff] }
  0x68   :  { %1231 = vmatprep.subr.bf16.mxu1 %v1230_v61  ;;  %848 = vmatprep.mubr.f32.mxu0 %v1259_v3  ;;  %v271_v61 = vld [vmem:[%s2176_s1 + $0x7e8] sm:$0xff]  ;;  %v1220_v0 = vpack.c.bf16 %v238_v56, %v222_v55  ;;  %v1252_v1 = vpack.c.bf16 %v240_v59, %v224_v57  ;;  %v928_v56 = vld [vmem:[%s2179_s3 + $0x10] sm:$0xff] }
  0x69   :  { %919 = vmatprep.mubr.f32.mxu1 %v1259_v3  ;;  %v1238_v3 = vpack.c.bf16 %v145_v15, %v129_v14  ;;  %v1222_v2 = vpack.c.bf16 %v271_v61, %v255_v60  ;;  %v275_v14 = vld [vmem:[%s2178_s2 + $0x8] sm:$0xff]  ;;  %v938_v61 = vunpack.c.l.bf16 %v928_v56 }
  0x6a   :  { %1201 = vmatpush1.bf16.msra.mxu0 %v1200_v4  ;;  %v254_v4 = vld [vmem:[%s2176_s1 + $0x760] sm:$0xff]  ;;  %v2077_v15 = vrot.slane %v275_v14, %v280_v13  ;;  %v2087_v25 = vrot.slane %v275_v14, %v304_v22  ;;  %v2089_v26 = vrot.slane %v275_v14, %v300_v23 }
  0x6b   :  { %1233 = vmatpush1.bf16.msra.mxu1 %v1232_v5  ;;  %1203 = vmatprep.subr.bf16.mxu0 %v1202_v6  ;;  %v270_v5 = vld [vmem:[%s2176_s1 + $0x7e0] sm:$0xff]  ;;  %v1254_v6 = vpack.c.bf16 %v273_v63, %v257_v62 }
  0x6c   :  { %1235 = vmatprep.subr.bf16.mxu1 %v1234_v10  ;;  %v1224_v9 = vpack.c.bf16 %v270_v5, %v254_v4  ;;  %v1256_v10 = vpack.c.bf16 %v272_v8, %v256_v7 }
  0x6e   :  { %1205 = vmatpush1.bf16.msra.mxu0 %v1204_v16  ;;  %v288_v16 = vsub.s32 2, %v279_v12 }
  0x6f   :  { %1237 = vmatpush1.bf16.msra.mxu1 %v1236_v17  ;;  %1207 = vmatprep.subr.bf16.mxu0 %v1206_v18  ;;  %v284_v17 = vsub.s32 1, %v279_v12  ;;  %v292_v18 = vsub.s32 3, %v279_v12 }
  0x70   :  { %1239 = vmatprep.subr.bf16.mxu1 %v1238_v3  ;;  %v2079_v19 = vrot.slane %v275_v14, %v288_v16  ;;  %v296_v3 = vsub.s32 4, %v279_v12 }
  0x71   :  { %v2081_v20 = vrot.slane %v275_v14, %v284_v17  ;;  %v2083_v21 = vrot.slane %v275_v14, %v292_v18 }
  0x72   :  { %1209 = vmatpush1.bf16.msra.mxu0 %v1208_v27  ;;  %v2091_v27 = vrot.slane %v275_v14, %v308_v24 }
  0x73   :  { %1241 = vmatpush1.bf16.msra.mxu1 %v1240_v28  ;;  %1211 = vmatprep.subr.bf16.mxu0 %v1210_v29  ;;  %v274_v28 = vld [vmem:[%s2178_s2] sm:$0xff] }
  0x74   :  { %1243 = vmatprep.subr.bf16.mxu1 %v1242_v33  ;;  %v926_v29 = vld [vmem:[%s2179_s3] sm:$0xff]  ;;  %v281_v30 = vrot.slane %v274_v28, %v280_v13  ;;  %v289_v32 = vrot.slane %v274_v28, %v288_v16  ;;  %v285_v33 = vrot.slane %v274_v28, %v284_v17  ;;  %v293_v35 = vrot.slane %v274_v28, %v292_v18 }
  0x75   :  { %v934_v34 = vunpack.c.l.bf16 %v926_v29  ;;  %v935_v38 = vunpack.c.h.bf16 %v926_v29  ;;  %v297_v57 = vrot.slane %v274_v28, %v296_v3  ;;  %v305_v59 = vrot.slane %v274_v28, %v304_v22  ;;  %v930_v22 = vld [vmem:[%s2179_s3 + $0x20] sm:$0xff] }
  0x76   :  { %1213 = vmatpush1.bf16.msra.mxu0 %v1212_v39  ;;  %v301_v60 = vrot.slane %v274_v28, %v300_v23  ;;  %v309_v62 = vrot.slane %v274_v28, %v308_v24  ;;  %v931_v23 = vld [vmem:[%s2179_s3 + $0x28] sm:$0xff]  ;;  %v942_v24 = vunpack.c.l.bf16 %v930_v22 }
  0x77   :  { %1245 = vmatpush1.bf16.msra.mxu1 %v1244_v40  ;;  %1215 = vmatprep.subr.bf16.mxu0 %v1214_v41  ;;  %v944_v29 = vunpack.c.l.bf16 %v931_v23 }
  0x78   :  { %1247 = vmatprep.subr.bf16.mxu1 %v1246_v45 }
  0x7a   :  { %1217 = vmatpush1.bf16.msra.mxu0 %v1216_v52 }
  0x7b   :  { %1249 = vmatpush1.bf16.msra.mxu1 %v1248_v53  ;;  %1219 = vmatprep.subr.bf16.mxu0 %v1218_v54 }
  0x7c   :  { %1251 = vmatprep.subr.bf16.mxu1 %v1250_v58  ;;  %v929_v58 = vld [vmem:[%s2179_s3 + $0x18] sm:$0xff] }
  0x7e   :  { %1221 = vmatpush1.bf16.msra.mxu0 %v1220_v0  ;;  %v940_v0 = vunpack.c.l.bf16 %v929_v58 }
  0x7f   :  { %1253 = vmatpush1.bf16.msra.mxu1 %v1252_v1  ;;  %1223 = vmatprep.subr.bf16.mxu0 %v1222_v2  ;;  %v939_v1 = vunpack.c.h.bf16 %v928_v56 }
  0x80   :  { %1255 = vmatprep.subr.bf16.mxu1 %v1254_v6  ;;  %v941_v6 = vunpack.c.h.bf16 %v929_v58 }
  0x82   :  { %1225 = vmatpush1.bf16.msra.mxu0 %v1224_v9 }
  0x83   :  { %1257 = vmatpush1.bf16.msra.mxu1 %v1256_v10 }
  0x85   :  { %849 = vmatmul.mubr.f32.vlgmr.msra.gmra.mrb[6].mxu0 %v1518_v48 }
  0x86   :  { %920 = vmatmul.mubr.f32.vlgmr.msra.gmra.mrb[6].mxu1 %v1518_v48  ;;  %v2085_v48 = vrot.slane %v275_v14, %v296_v3 }
  0xf8   :  { %v424_v36 = vpop.f32.mrb[0].mxu0 }
  0xf9   :  { %v425_v39 = vadd.f32 %v424_v36, %v281_v30  ;;  %v495_v40 = vpop.f32.mrb[0].mxu1  ;;  %v426_v41 = vpop.f32.mrb[1].mxu0  ;;  %v943_v30 = vunpack.c.h.bf16 %v930_v22 }
  0xfa   :  { %v496_v43 = vadd.f32 %v495_v40, %v289_v32  ;;  %v427_v44 = vadd.f32 %v426_v41, %v285_v33  ;;  %v497_v45 = vpop.f32.mrb[1].mxu1 }
  0xfb   :  { %v950_v46 = vadd.f32 %v934_v34, %v425_v39  ;;  %v498_v47 = vadd.f32 %v497_v45, %v293_v35  ;;  %v945_v34 = vunpack.c.h.bf16 %v931_v23 }
  0xfc   :  { %v952_v49 = vadd.f32 %v936_v37, %v496_v43  ;;  %v951_v50 = vadd.f32 %v935_v38, %v427_v44 }
  0xfd   :  { %v966_v51 = vmax.f32 %v950_v46, 0.0  ;;  %v953_v52 = vadd.f32 %v937_v42, %v498_v47 }
  0xfe   :  { %v968_v53 = vmax.f32 %v952_v49, 0.0  ;;  %v967_v54 = vmax.f32 %v951_v50, 0.0 }
  0xff   :  { %982 = vst [vmem:[%s2180_s4] sm:$0xff] %v966_v51  ;;  %v969_v55 = vmax.f32 %v953_v52, 0.0 }
 0x100   :  { %984 = vst [vmem:[%s2180_s4 + $0x10] sm:$0xff] %v968_v53  ;;  %983 = vst [vmem:[%s2180_s4 + $0x8] sm:$0xff] %v967_v54 }
 0x101   :  { %985 = vst [vmem:[%s2180_s4 + $0x18] sm:$0xff] %v969_v55 }
 0x118   :  { %v566_v63 = vpop.f32.mrb[2].mxu0 }
 0x119   :  { %v567_v2 = vadd.f32 %v566_v63, %v297_v57  ;;  %v637_v4 = vpop.f32.mrb[2].mxu1  ;;  %v568_v5 = vpop.f32.mrb[3].mxu0 }
 0x11a   :  { %v638_v7 = vadd.f32 %v637_v4, %v305_v59  ;;  %v569_v8 = vadd.f32 %v568_v5, %v301_v60  ;;  %v639_v9 = vpop.f32.mrb[3].mxu1 }
 0x11b   :  { %v954_v10 = vadd.f32 %v938_v61, %v567_v2  ;;  %v640_v11 = vadd.f32 %v639_v9, %v309_v62 }
 0x11c   :  { %v956_v12 = vadd.f32 %v940_v0, %v638_v7  ;;  %v955_v13 = vadd.f32 %v939_v1, %v569_v8 }
 0x11d   :  { %v970_v14 = vmax.f32 %v954_v10, 0.0  ;;  %v957_v16 = vadd.f32 %v941_v6, %v640_v11 }
 0x11e   :  { %v972_v17 = vmax.f32 %v956_v12, 0.0  ;;  %v971_v18 = vmax.f32 %v955_v13, 0.0 }
 0x11f   :  { %986 = vst [vmem:[%s2180_s4 + $0x20] sm:$0xff] %v970_v14  ;;  %v973_v3 = vmax.f32 %v957_v16, 0.0 }
 0x120   :  { %988 = vst [vmem:[%s2180_s4 + $0x30] sm:$0xff] %v972_v17  ;;  %987 = vst [vmem:[%s2180_s4 + $0x28] sm:$0xff] %v971_v18 }
 0x121   :  { %989 = vst [vmem:[%s2180_s4 + $0x38] sm:$0xff] %v973_v3 }
 0x138   :  { %v708_v28 = vpop.f32.mrb[4].mxu0 }
 0x139   :  { %v709_v31 = vadd.f32 %v708_v28, %v2077_v15  ;;  %v779_v32 = vpop.f32.mrb[4].mxu1  ;;  %v710_v33 = vpop.f32.mrb[5].mxu0 }
 0x13a   :  { %v780_v35 = vadd.f32 %v779_v32, %v2079_v19  ;;  %v711_v36 = vadd.f32 %v710_v33, %v2081_v20  ;;  %v781_v37 = vpop.f32.mrb[5].mxu1  ;;  %v932_v19 = vld [vmem:[%s2179_s3 + $0x30] sm:$0xff]  ;;  %v933_v20 = vld [vmem:[%s2179_s3 + $0x38] sm:$0xff] }
 0x13b   :  { %v958_v38 = vadd.f32 %v942_v24, %v709_v31  ;;  %v782_v39 = vadd.f32 %v781_v37, %v2083_v21  ;;  %v946_v21 = vunpack.c.l.bf16 %v932_v19  ;;  %v948_v47 = vunpack.c.l.bf16 %v933_v20 }
 0x13c   :  { %v960_v40 = vadd.f32 %v944_v29, %v780_v35  ;;  %v959_v41 = vadd.f32 %v943_v30, %v711_v36  ;;  %v947_v49 = vunpack.c.h.bf16 %v932_v19  ;;  %v949_v53 = vunpack.c.h.bf16 %v933_v20 }
 0x13d   :  { %v974_v42 = vmax.f32 %v958_v38, 0.0  ;;  %v961_v43 = vadd.f32 %v945_v34, %v782_v39 }
 0x13e   :  { %v976_v44 = vmax.f32 %v960_v40, 0.0  ;;  %v975_v45 = vmax.f32 %v959_v41, 0.0 }
 0x13f   :  { %990 = vst [vmem:[%s2180_s4 + $0x40] sm:$0xff] %v974_v42  ;;  %v977_v15 = vmax.f32 %v961_v43, 0.0 }
 0x140   :  { %992 = vst [vmem:[%s2180_s4 + $0x50] sm:$0xff] %v976_v44  ;;  %991 = vst [vmem:[%s2180_s4 + $0x48] sm:$0xff] %v975_v45 }
 0x141   :  { %993 = vst [vmem:[%s2180_s4 + $0x58] sm:$0xff] %v977_v15 }
 0x158   :  { %v850_v46 = vpop.f32.mrb[6].mxu0 }
 0x159   :  { %v851_v50 = vadd.f32 %v850_v46, %v2085_v48  ;;  %v921_v51 = vpop.f32.mrb[6].mxu1  ;;  %v852_v52 = vpop.f32.mrb[7].mxu0 }
 0x15a   :  { %v922_v54 = vadd.f32 %v921_v51, %v2087_v25  ;;  %v853_v55 = vadd.f32 %v852_v52, %v2089_v26  ;;  %v923_v56 = vpop.f32.mrb[7].mxu1 }
 0x15b   :  { %v962_v57 = vadd.f32 %v946_v21, %v851_v50  ;;  %v924_v58 = vadd.f32 %v923_v56, %v2091_v27 }
 0x15c   :  { %v964_v59 = vadd.f32 %v948_v47, %v922_v54  ;;  %v963_v60 = vadd.f32 %v947_v49, %v853_v55 }
 0x15d   :  { %v978_v61 = vmax.f32 %v962_v57, 0.0  ;;  %v965_v62 = vadd.f32 %v949_v53, %v924_v58 }
 0x15e   :  { %v980_v63 = vmax.f32 %v964_v59, 0.0  ;;  %v979_v0 = vmax.f32 %v963_v60, 0.0 }
 0x15f   :  { %994 = vst [vmem:[%s2180_s4 + $0x60] sm:$0xff] %v978_v61  ;;  %v981_v48 = vmax.f32 %v965_v62, 0.0 }
 0x160   :  { %996 = vst [vmem:[%s2180_s4 + $0x70] sm:$0xff] %v980_v63  ;;  %995 = vst [vmem:[%s2180_s4 + $0x68] sm:$0xff] %v979_v0 }
 0x161   :  { %997 = vst [vmem:[%s2180_s4 + $0x78] sm:$0xff] %v981_v48 }

// kernel: rednet_forward.8
= control target key start
LH: loop header
LB: loop body
LE: loop exit
PB: predicated region body
PF: predicated region fallthrough
CT: control target
= control target key end

     0   :  { %s8254_s15 = smov 0   ;;  %s9589_s0 = inlined_call_operand.vmem [shape: bf16[8,5,5,64], index: 0, kind: input, shape index: {}]   ;;  %s9590_s1 = inlined_call_operand.vmem [shape: bf16[16,64,128], index: 1, kind: input, shape index: {}]   ;;  %s9591_s2 = inlined_call_operand.vmem [shape: bf16[2,4,4,128], index: 2, kind: output, shape index: {0}]   ;;  %s9592_s3 = inlined_call_operand.vmem [shape: f32[2,1,128], index: 3, kind: output, shape index: {1}]   ;;  %s9593_s4 = inlined_call_operand.vmem [shape: f32[2,1,128], index: 4, kind: output, shape index: {2}]  }
   0x1 LB: > { %s8260_s16 = sadd.s32 4294967295, %s8225_s15   ;;  %p5687_p0 = scmp.ge.s32.totalorder %s8225_s15, 1  ;;  %s8225_s15 = sphi %s8254_s15, %s15_s15  }
   0x2   : > { %p169_p1 = scmp.lt.s32.totalorder %s8225_s15, 3 }
   0x4   : > { %p170_p2 = pnand %p5687_p0, %p169_p1 }
   0x5   : > { %v7931_v0 = vld [vmem:[%s9590_s1 + $0x20] sm:$0xff] (!%p170_p2)   ;;  %v8227_v1 = vmov (!%p170_p2), 0.0   ;;  %v7933_v3 = vld [vmem:[%s9590_s1 + $0x28] sm:$0xff] (!%p170_p2)   ;;  %vm8228_vm0 = vmmov (!%p170_p2), 0   ;;  %s5688_s23 = sshll.u32 (!%p170_p2), %s8260_s16, 2  ;;  %v7935_v5 = vld [vmem:[%s9590_s1 + $0x30] sm:$0xff] (!%p170_p2)  }
   0x6   : > { %173 = sbr.rel (%p170_p2) target bundleno = 750 (0x2ee), region = 28  ;;  %6912 = vmatprep.subr.bf16.mxu0 (!%p170_p2), %v8227_v1  ;;  %7104 = vmatprep.subr.bf16.mxu1 (!%p170_p2), %v8227_v1  ;;  %v7932_v2 = vld [vmem:[%s9590_s1 + $0x20] sm:$0xff] (!%p170_p2)   ;;  %v7934_v4 = vld [vmem:[%s9590_s1 + $0x28] sm:$0xff] (!%p170_p2)   ;;  %p203_p3 = scmp.lt.s32.totalorder (!%p170_p2), %s5688_s23, 7  ;;  %v7936_v6 = vld [vmem:[%s9590_s1 + $0x30] sm:$0xff] (!%p170_p2)   ;;  %vm265_vm1 = vcmask (!%p170_p2), 523264  }
   0x7   : > { %6913 = vmatpush3.bf16.msra.mxu0 (!%p170_p2), %v7931_v0  ;;  %6920 = vmatprep.mubr.msk.bf16.mxu0 (!%p170_p2), %vm8228_vm0, %v8227_v1  ;;  %v7937_v7 = vld [vmem:[%s9590_s1 + $0x38] sm:$0xff] (!%p170_p2)   ;;  %v7939_v9 = vld [vmem:[%s9590_s1] sm:$0xff] (!%p170_p2)   ;;  %v7941_v13 = vld [vmem:[%s9590_s1 + $0x8] sm:$0xff] (!%p170_p2)   ;;  %p209_p4 = scmp.lt.s32.totalorder (!%p170_p2), %s8260_s16, 1  ;;  %vm1556_vm2 = vcmask (!%p170_p2), 1043456  }
   0x8   : > { %7105 = vmatpush3.bf16.msra.mxu1 (!%p170_p2), %v7932_v2  ;;  %6914 = vmatprep.subr.bf16.mxu0 (!%p170_p2), %v8227_v1  ;;  %v7938_v8 = vld [vmem:[%s9590_s1 + $0x38] sm:$0xff] (!%p170_p2)   ;;  %v7940_v10 = vld [vmem:[%s9590_s1] sm:$0xff] (!%p170_p2)   ;;  %v7942_v14 = vld [vmem:[%s9590_s1 + $0x8] sm:$0xff] (!%p170_p2)  }
   0x9   : > { %7106 = vmatprep.subr.bf16.mxu1 (!%p170_p2), %v8227_v1  ;;  %7112 = vmatprep.mubr.msk.bf16.mxu1 (!%p170_p2), %vm8228_vm0, %v8227_v1  ;;  %v7943_v15 = vld [vmem:[%s9590_s1 + $0x10] sm:$0xff] (!%p170_p2)   ;;  %v7945_v17 = vld [vmem:[%s9590_s1 + $0x18] sm:$0xff] (!%p170_p2)   ;;  %v7947_v20 = vld [vmem:[%s9590_s1 + $0x40] sm:$0xff] (!%p170_p2)  }
   0xa   : > { %v7944_v16 = vld [vmem:[%s9590_s1 + $0x10] sm:$0xff] (!%p170_p2)   ;;  %v7946_v18 = vld [vmem:[%s9590_s1 + $0x18] sm:$0xff] (!%p170_p2)   ;;  %v7948_v22 = vld [vmem:[%s9590_s1 + $0x40] sm:$0xff] (!%p170_p2)  }
   0xb   : > { %6915 = vmatpush3.bf16.msra.mxu0 (!%p170_p2), %v7933_v3  ;;  %v7949_v25 = vld [vmem:[%s9590_s1 + $0x48] sm:$0xff] (!%p170_p2)   ;;  %v7951_v28 = vld [vmem:[%s9590_s1 + $0x50] sm:$0xff] (!%p170_p2)   ;;  %v7953_v31 = vld [vmem:[%s9590_s1 + $0x58] sm:$0xff] (!%p170_p2)  }
   0xc   : > { %7107 = vmatpush3.bf16.msra.mxu1 (!%p170_p2), %v7934_v4  ;;  %6916 = vmatprep.subr.bf16.mxu0 (!%p170_p2), %v8227_v1  ;;  %v7950_v26 = vld [vmem:[%s9590_s1 + $0x48] sm:$0xff] (!%p170_p2)   ;;  %v7952_v30 = vld [vmem:[%s9590_s1 + $0x50] sm:$0xff] (!%p170_p2)   ;;  %v7954_v36 = vld [vmem:[%s9590_s1 + $0x58] sm:$0xff] (!%p170_p2)  }
   0xd   : > { %s9595_s23 = smov (!%p203_p3, %s5688_s23), 7  ;;  %7108 = vmatprep.subr.bf16.mxu1 %v8227_v1  ;;  %v7956_v38 = vld [vmem:[%s9590_s1 + $0x60] sm:$0xff]   ;;  %v7959_v43 = vld [vmem:[%s9590_s1 + $0x68] sm:$0xff]   ;;  %v7961_v46 = vld [vmem:[%s9590_s1 + $0x70] sm:$0xff]   ;;  %s9597_s16 = smov (!%p209_p4, %s8260_s16), 1 }
   0xe   : > { %s7920_s30 = smul.u32 20, %s9595_s23  ;;  %v7958_v40 = vld [vmem:[%s9590_s1 + $0x60] sm:$0xff]   ;;  %v7960_v44 = vld [vmem:[%s9590_s1 + $0x68] sm:$0xff]   ;;  %v7962_v48 = vld [vmem:[%s9590_s1 + $0x70] sm:$0xff]   ;;  %s6591_s29 = sshll.u32 %s9597_s16, 3 }
   0xf   : > { %6917 = vmatpush3.bf16.msra.mxu0 %v7935_v5  ;;  %v7963_v49 = vld [vmem:[%s9590_s1 + $0x78] sm:$0xff]   ;;  %v7966_v56 = vld [vmem:[%s9590_s1 + $0x80] sm:$0xff]   ;;  %v7969_v59 = vld [vmem:[%s9590_s1 + $0x88] sm:$0xff]   ;;  %s9453_s10 = scalar_lea.vmem %s9591_s2, %s6591_s29  ;;  %s216_s6 = scalar_lea.vmem %s9592_s3, %s9597_s16 }
  0x10   : > { %7109 = vmatpush3.bf16.msra.mxu1 %v7936_v6  ;;  %6918 = vmatprep.subr.bf16.mxu0 %v8227_v1  ;;  %s8303_s11 = scalar_lea.vmem %s9589_s0, %s7920_s30  ;;  %v7964_v54 = vld [vmem:[%s9590_s1 + $0x78] sm:$0xff]   ;;  %v7968_v58 = vld [vmem:[%s9590_s1 + $0x80] sm:$0xff]   ;;  %v7970_v60 = vld [vmem:[%s9590_s1 + $0x88] sm:$0xff]   ;;  %s219_s9 = scalar_lea.vmem %s9593_s4, %s9597_s16 }
  0x11   : > { %7110 = vmatprep.subr.bf16.mxu1 %v8227_v1  ;;  %v5692_v11 = vld [vmem:[%s8303_s11 + $0x14] sm:$0x3]  ;;  %v5915_v12 = vld [vmem:[%s8303_s11 + $0x18] sm:$0x3]  ;;  %v221_v19 = vld [vmem:[%s8303_s11] sm:$0x3] }
  0x12   : > { %v5914_v21 = vld [vmem:[%s8303_s11 + $0x4] sm:$0x3]  ;;  %v7955_v23 = vld [vmem:[%s8303_s11] ss:$0 sps:$4 sm:$0x77]   ;;  %v7971_v61 = vld [vmem:[%s9590_s1 + $0x90] sm:$0xff]  }
  0x13   : > { %6919 = vmatpush3.bf16.msra.mxu0 %v7937_v7  ;;  %v7957_v24 = vld [vmem:[%s8303_s11 + $0x4] ss:$0 sps:$4 sm:$0x77]   ;;  %v392_v27 = vshll.u32 %v7955_v23, 16  ;;  %v390_v32 = vshrl.u32 %v7955_v23, 16  ;;  %v7972_v62 = vld [vmem:[%s9590_s1 + $0x90] sm:$0xff]  }
  0x14   : > { %7111 = vmatpush3.bf16.msra.mxu1 %v7938_v8  ;;  %6924 = vmatprep.subr.bf16.mxu0 %v8227_v1  ;;  %v1741_v29 = vshll.u32 %v7957_v24, 16  ;;  %v1739_v34 = vshrl.u32 %v7957_v24, 16  ;;  %v7965_v41 = vld [vmem:[%s8303_s11 + $0x14] ss:$0 sps:$4 sm:$0x77]   ;;  %v7973_v63 = vld [vmem:[%s9590_s1 + $0x98] sm:$0xff]  }
  0x15   : > { %7116 = vmatprep.subr.bf16.mxu1 %v8227_v1  ;;  %v394_v33 = vrot.slane %v392_v27, 1  ;;  %v7967_v42 = vld [vmem:[%s8303_s11 + $0x18] ss:$0 sps:$4 sm:$0x77]   ;;  %v480_v45 = vshll.u32 %v7965_v41, 16  ;;  %v478_v50 = vshrl.u32 %v7965_v41, 16 }
  0x16   : > { %6921 = vmatmul.mubr.msk.bf16.vlgmr.msra.gmra.mrb[0].mxu0 %vm265_vm1, %v5692_v11  ;;  %v1743_v35 = vrot.slane %v1741_v29, 1  ;;  %v1828_v47 = vshll.u32 %v7967_v42, 16  ;;  %v1826_v52 = vshrl.u32 %v7967_v42, 16  ;;  %v7974_v0 = vld [vmem:[%s9590_s1 + $0x98] sm:$0xff]   ;;  %v5740_v2 = vld [vmem:[%s8303_s11 + $0x28] sm:$0x3] }
  0x17   : > { %6925 = vmatpush3.bf16.msra.mxu0 %v7939_v9  ;;  %7113 = vmatmul.mubr.msk.bf16.vlgmr.msra.gmra.mrb[0].mxu1 %vm265_vm1, %v5915_v12  ;;  %v395_v37 = vor.u32 %v394_v33, %v390_v32  ;;  %v482_v51 = vrot.slane %v480_v45, 1  ;;  %v7975_v3 = vld [vmem:[%s9590_s1 + $0xa0] sm:$0xff]   ;;  %v5964_v4 = vld [vmem:[%s8303_s11 + $0x2c] sm:$0x3]  ;;  %v7979_v8 = vld [vmem:[%s9590_s1 + $0xb0] sm:$0xff]  }
  0x18   : > { %7117 = vmatpush3.bf16.msra.mxu1 %v7940_v10  ;;  %6926 = vmatprep.subr.bf16.mxu0 %v8227_v1  ;;  %v1744_v39 = vor.u32 %v1743_v35, %v1739_v34  ;;  %v1830_v53 = vrot.slane %v1828_v47, 1  ;;  %v7976_v5 = vld [vmem:[%s9590_s1 + $0xa0] sm:$0xff]   ;;  %v7977_v6 = vld [vmem:[%s9590_s1 + $0xa8] sm:$0xff]   ;;  %v7980_v9 = vld [vmem:[%s9590_s1 + $0xb0] sm:$0xff]  }
  0x19   : > { %7118 = vmatprep.subr.bf16.mxu1 %v8227_v1  ;;  %6932 = vmatprep.mubr.msk.bf16.mxu0 %vm8228_vm0, %v8227_v1  ;;  %v483_v55 = vor.u32 %v482_v51, %v478_v50  ;;  %v7978_v7 = vld [vmem:[%s9590_s1 + $0xa8] sm:$0xff]   ;;  %v7981_v10 = vld [vmem:[%s9590_s1 + $0xb8] sm:$0xff]   ;;  %v7994_v33 = vld [vmem:[%s9590_s1 + $0xe0] sm:$0xff]  }
  0x1a   : > { %7124 = vmatprep.mubr.msk.bf16.mxu1 %vm8228_vm0, %v8227_v1  ;;  %v1831_v57 = vor.u32 %v1830_v53, %v1826_v52  ;;  %v7982_v11 = vld [vmem:[%s9590_s1 + $0xb8] sm:$0xff]   ;;  %v7995_v35 = vld [vmem:[%s9590_s1 + $0xe8] sm:$0xff]   ;;  %v7998_v41 = vld [vmem:[%s9590_s1 + $0xf0] sm:$0xff]  }
  0x1b   : > { %6927 = vmatpush3.bf16.msra.mxu0 %v7941_v13  ;;  %v5754_v12 = vld [vmem:[%s8303_s11 + $0x3c] sm:$0x3]  ;;  %v7983_v13 = vld [vmem:[%s9590_s1 + $0xc0] sm:$0xff]   ;;  %v8005_v52 = vld [vmem:[%s9590_s1 + $0x108] sm:$0xff]  }
  0x1c   : > { %7119 = vmatpush3.bf16.msra.mxu1 %v7942_v14  ;;  %6928 = vmatprep.subr.bf16.mxu0 %v8227_v1  ;;  %v5978_v14 = vld [vmem:[%s8303_s11 + $0x40] sm:$0x3]  ;;  %v7989_v24 = vld [vmem:[%s9590_s1 + $0xd8] sm:$0xff]   ;;  %v8006_v53 = vld [vmem:[%s9590_s1 + $0x108] sm:$0xff]  }
  0x1d   : > { %7120 = vmatprep.subr.bf16.mxu1 %v8227_v1  ;;  %v7990_v29 = vld [vmem:[%s9590_s1 + $0xd8] sm:$0xff]   ;;  %v8004_v51 = vld [vmem:[%s9590_s1 + $0x100] sm:$0xff]  }
  0x1e   : > { %v8001_v34 = vld [vmem:[%s8303_s11 + $0x3c] ss:$0 sps:$4 sm:$0x77]  }
  0x1f   : > { %6929 = vmatpush3.bf16.msra.mxu0 %v7943_v15  ;;  %v7991_v15 = vld [vmem:[%s8303_s11 + $0x28] ss:$0 sps:$4 sm:$0x77]   ;;  %v7999_v42 = vld [vmem:[%s9590_s1 + $0xf8] sm:$0xff]  }
  0x20   : > { %7121 = vmatpush3.bf16.msra.mxu1 %v7944_v16  ;;  %6930 = vmatprep.subr.bf16.mxu0 %v8227_v1  ;;  %v7984_v16 = vld [vmem:[%s9590_s1 + $0xc0] sm:$0xff]   ;;  %v8000_v47 = vld [vmem:[%s9590_s1 + $0xf8] sm:$0xff]  }
  0x21   : > { %7122 = vmatprep.subr.bf16.mxu1 %v8227_v1 }
  0x23   : > { %6931 = vmatpush3.bf16.msra.mxu0 %v7945_v17  ;;  %v7993_v17 = vld [vmem:[%s8303_s11 + $0x2c] ss:$0 sps:$4 sm:$0x77]  }
  0x24   : > { %7123 = vmatpush3.bf16.msra.mxu1 %v7946_v18  ;;  %6936 = vmatprep.subr.bf16.mxu0 %v8227_v1  ;;  %v7985_v18 = vld [vmem:[%s9590_s1 + $0xc8] sm:$0xff]   ;;  %v2069_v23 = vshll.u32 %v7993_v17, 16  ;;  %v2067_v27 = vshrl.u32 %v7993_v17, 16  ;;  %v8025_v17 = vld [vmem:[%s9590_s1 + $0x158] sm:$0xff]  }
  0x25   : > { %7128 = vmatprep.subr.bf16.mxu1 %v8227_v1 }
  0x26   : > { %6933 = vmatmul.mubr.msk.bf16.vlgmr.msra.gmra.mrb[0].mxu0 %vm265_vm1, %v221_v19  ;;  %v7986_v19 = vld [vmem:[%s9590_s1 + $0xc8] sm:$0xff]  }
  0x27   : > { %6937 = vmatpush3.bf16.msra.mxu0 %v7947_v20  ;;  %7125 = vmatmul.mubr.msk.bf16.vlgmr.msra.gmra.mrb[0].mxu1 %vm265_vm1, %v5914_v21  ;;  %v726_v20 = vshll.u32 %v7991_v15, 16  ;;  %v7987_v21 = vld [vmem:[%s9590_s1 + $0xd0] sm:$0xff]  }
  0x28   : > { %7129 = vmatpush3.bf16.msra.mxu1 %v7948_v22  ;;  %6938 = vmatprep.subr.bf16.mxu0 %v8227_v1  ;;  %v7988_v22 = vld [vmem:[%s9590_s1 + $0xd0] sm:$0xff]  }
  0x29   : > { %7130 = vmatprep.subr.bf16.mxu1 %v8227_v1  ;;  %6944 = vmatprep.mubr.msk.bf16.mxu0 %vm8228_vm0, %v8227_v1 }
  0x2a   : > { %7136 = vmatprep.mubr.msk.bf16.mxu1 %vm8228_vm0, %v8227_v1 }
  0x2b   : > { %6939 = vmatpush3.bf16.msra.mxu0 %v7949_v25  ;;  %v724_v25 = vshrl.u32 %v7991_v15, 16 }
  0x2c   : > { %7131 = vmatpush3.bf16.msra.mxu1 %v7950_v26  ;;  %6940 = vmatprep.subr.bf16.mxu0 %v8227_v1  ;;  %v728_v26 = vrot.slane %v726_v20, 1 }
  0x2d   : > { %7132 = vmatprep.subr.bf16.mxu1 %v8227_v1 }
  0x2f   : > { %6941 = vmatpush3.bf16.msra.mxu0 %v7951_v28  ;;  %v2071_v28 = vrot.slane %v2069_v23, 1 }
  0x30   : > { %7133 = vmatpush3.bf16.msra.mxu1 %v7952_v30  ;;  %6942 = vmatprep.subr.bf16.mxu0 %v8227_v1  ;;  %v729_v30 = vor.u32 %v728_v26, %v724_v25  ;;  %v8030_v26 = vld [vmem:[%s9590_s1 + $0x160] sm:$0xff]  }
  0x31   : > { %7134 = vmatprep.subr.bf16.mxu1 %v8227_v1  ;;  %v2072_v32 = vor.u32 %v2071_v28, %v2067_v27  ;;  %v8037_v27 = vld [vmem:[%s8303_s11 + $0x18] ss:$0 sps:$4 sm:$0x77]   ;;  %v8039_v28 = vld [vmem:[%s8303_s11 + $0x1c] ss:$0 sps:$4 sm:$0x77]  }
  0x33   : > { %6943 = vmatpush3.bf16.msra.mxu0 %v7953_v31  ;;  %v7992_v31 = vld [vmem:[%s9590_s1 + $0xe0] sm:$0xff]  }
  0x34   : > { %7135 = vmatpush3.bf16.msra.mxu1 %v7954_v36  ;;  %6948 = vmatprep.subr.bf16.mxu0 %v8227_v1  ;;  %v8003_v36 = vld [vmem:[%s8303_s11 + $0x40] ss:$0 sps:$4 sm:$0x77]  }
  0x35   : > { %7140 = vmatprep.subr.bf16.mxu1 %v8227_v1  ;;  %v2154_v45 = vshrl.u32 %v8003_v36, 16 }
  0x36   : > { %6945 = vmatmul.mubr.msk.bf16.vlgmr.msra.gmra.mrb[0].mxu0 %vm265_vm1, %v395_v37  ;;  %v7996_v37 = vld [vmem:[%s9590_s1 + $0xe8] sm:$0xff]  }
  0x37   : > { %6949 = vmatpush3.bf16.msra.mxu0 %v7956_v38  ;;  %7137 = vmatmul.mubr.msk.bf16.vlgmr.msra.gmra.mrb[0].mxu1 %vm265_vm1, %v1744_v39  ;;  %v814_v38 = vshll.u32 %v8001_v34, 16  ;;  %v7997_v39 = vld [vmem:[%s9590_s1 + $0xf0] sm:$0xff]  }
  0x38   : > { %7141 = vmatpush3.bf16.msra.mxu1 %v7958_v40  ;;  %6950 = vmatprep.subr.bf16.mxu0 %v8227_v1  ;;  %v2156_v40 = vshll.u32 %v8003_v36, 16  ;;  %v1146_v36 = vshrl.u32 %v8037_v27, 16 }
  0x39   : > { %7142 = vmatprep.subr.bf16.mxu1 %v8227_v1  ;;  %6956 = vmatprep.mubr.msk.bf16.mxu0 %vm8228_vm0, %v8227_v1 }
  0x3a   : > { %7148 = vmatprep.mubr.msk.bf16.mxu1 %vm8228_vm0, %v8227_v1 }
  0x3b   : > { %6951 = vmatpush3.bf16.msra.mxu0 %v7959_v43  ;;  %v812_v43 = vshrl.u32 %v8001_v34, 16  ;;  %v2486_v34 = vshll.u32 %v8039_v28, 16 }
  0x3c   : > { %7143 = vmatpush3.bf16.msra.mxu1 %v7960_v44  ;;  %6952 = vmatprep.subr.bf16.mxu0 %v8227_v1  ;;  %v816_v44 = vrot.slane %v814_v38, 1  ;;  %v2484_v38 = vshrl.u32 %v8039_v28, 16  ;;  %v8071_v28 = vld [vmem:[%s9590_s1 + $0x1f8] sm:$0xff]  }
  0x3d   : > { %7144 = vmatprep.subr.bf16.mxu1 %v8227_v1 }
  0x3f   : > { %6953 = vmatpush3.bf16.msra.mxu0 %v7961_v46  ;;  %v2158_v46 = vrot.slane %v2156_v40, 1  ;;  %v8036_v40 = vld [vmem:[%s9590_s1 + $0x178] sm:$0xff]  }
  0x40   : > { %7145 = vmatpush3.bf16.msra.mxu1 %v7962_v48  ;;  %6954 = vmatprep.subr.bf16.mxu0 %v8227_v1  ;;  %v817_v48 = vor.u32 %v816_v44, %v812_v43  ;;  %v8040_v44 = vld [vmem:[%s9590_s1 + $0x180] sm:$0xff]  }
  0x41   : > { %7146 = vmatprep.subr.bf16.mxu1 %v8227_v1  ;;  %v2159_v50 = vor.u32 %v2158_v46, %v2154_v45  ;;  %v8041_v45 = vld [vmem:[%s9590_s1 + $0x188] sm:$0xff]  }
  0x42   : > { %v8042_v46 = vld [vmem:[%s9590_s1 + $0x188] sm:$0xff]  }
  0x43   : > { %6955 = vmatpush3.bf16.msra.mxu0 %v7963_v49  ;;  %v8002_v49 = vld [vmem:[%s9590_s1 + $0x100] sm:$0xff]  }
  0x44   : > { %7147 = vmatpush3.bf16.msra.mxu1 %v7964_v54  ;;  %6960 = vmatprep.subr.bf16.mxu0 %v8227_v1  ;;  %v8007_v54 = vld [vmem:[%s9590_s1 + $0x110] sm:$0xff]  }
  0x45   : > { %7152 = vmatprep.subr.bf16.mxu1 %v8227_v1 }
  0x46   : > { %6957 = vmatmul.mubr.msk.bf16.vlgmr.msra.gmra.mrb[0].mxu0 %vm265_vm1, %v483_v55  ;;  %v8008_v55 = vld [vmem:[%s9590_s1 + $0x110] sm:$0xff]  }
  0x47   : > { %6961 = vmatpush3.bf16.msra.mxu0 %v7966_v56  ;;  %7149 = vmatmul.mubr.msk.bf16.vlgmr.msra.gmra.mrb[0].mxu1 %vm265_vm1, %v1831_v57  ;;  %v8009_v56 = vld [vmem:[%s9590_s1 + $0x118] sm:$0xff]  }
  0x48   : > { %7153 = vmatpush3.bf16.msra.mxu1 %v7968_v58  ;;  %6962 = vmatprep.subr.bf16.mxu0 %v8227_v1  ;;  %v8010_v57 = vld [vmem:[%s9590_s1 + $0x118] sm:$0xff]   ;;  %v5798_v58 = vld [vmem:[%s8303_s11 + $0x4] sm:$0x3] }
  0x49   : > { %7154 = vmatprep.subr.bf16.mxu1 %v8227_v1  ;;  %6968 = vmatprep.mubr.msk.bf16.mxu0 %vm8228_vm0, %v8227_v1 }
  0x4a   : > { %7160 = vmatprep.mubr.msk.bf16.mxu1 %vm8228_vm0, %v8227_v1 }
  0x4b   : > { %6963 = vmatpush3.bf16.msra.mxu0 %v7969_v59  ;;  %v8011_v59 = vld [vmem:[%s9590_s1 + $0x120] sm:$0xff]  }
  0x4c   : > { %7155 = vmatpush3.bf16.msra.mxu1 %v7970_v60  ;;  %6964 = vmatprep.subr.bf16.mxu0 %v8227_v1  ;;  %v6022_v60 = vld [vmem:[%s8303_s11 + $0x8] sm:$0x3] }
  0x4d   : > { %7156 = vmatprep.subr.bf16.mxu1 %v8227_v1 }
  0x4f   : > { %6965 = vmatpush3.bf16.msra.mxu0 %v7971_v61  ;;  %v8012_v61 = vld [vmem:[%s9590_s1 + $0x120] sm:$0xff]  }
  0x50   : > { %7157 = vmatpush3.bf16.msra.mxu1 %v7972_v62  ;;  %6966 = vmatprep.subr.bf16.mxu0 %v8227_v1  ;;  %v8013_v62 = vld [vmem:[%s9590_s1 + $0x128] sm:$0xff]  }
  0x51   : > { %7158 = vmatprep.subr.bf16.mxu1 %v8227_v1 }
  0x53   : > { %6967 = vmatpush3.bf16.msra.mxu0 %v7973_v63  ;;  %v8014_v63 = vld [vmem:[%s9590_s1 + $0x128] sm:$0xff]  }
  0x54   : > { %7159 = vmatpush3.bf16.msra.mxu1 %v7974_v0  ;;  %6972 = vmatprep.subr.bf16.mxu0 %v8227_v1  ;;  %v8015_v0 = vld [vmem:[%s9590_s1 + $0x130] sm:$0xff]  }
  0x55   : > { %7164 = vmatprep.subr.bf16.mxu1 %v8227_v1 }
  0x56   : > { %6969 = vmatmul.mubr.msk.bf16.vlgmr.msra.gmra.mrb[0].mxu0 %vm265_vm1, %v5740_v2  ;;  %v8016_v2 = vld [vmem:[%s9590_s1 + $0x130] sm:$0xff]  }
  0x57   : > { %6973 = vmatpush3.bf16.msra.mxu0 %v7975_v3  ;;  %7161 = vmatmul.mubr.msk.bf16.vlgmr.msra.gmra.mrb[0].mxu1 %vm265_vm1, %v5964_v4  ;;  %v8017_v3 = vld [vmem:[%s9590_s1 + $0x138] sm:$0xff]  }
  0x58   : > { %7165 = vmatpush3.bf16.msra.mxu1 %v7976_v5  ;;  %6974 = vmatprep.subr.bf16.mxu0 %v8227_v1  ;;  %v8018_v4 = vld [vmem:[%s9590_s1 + $0x138] sm:$0xff]  }
  0x59   : > { %7166 = vmatprep.subr.bf16.mxu1 %v8227_v1  ;;  %6980 = vmatprep.mubr.msk.bf16.mxu0 %vm8228_vm0, %v8227_v1  ;;  %v5812_v5 = vld [vmem:[%s8303_s11 + $0x18] sm:$0x3] }
  0x5a   : > { %7172 = vmatprep.mubr.msk.bf16.mxu1 %vm8228_vm0, %v8227_v1 }
  0x5b   : > { %6975 = vmatpush3.bf16.msra.mxu0 %v7977_v6  ;;  %v8019_v6 = vld [vmem:[%s9590_s1 + $0x140] sm:$0xff]  }
  0x5c   : > { %7167 = vmatpush3.bf16.msra.mxu1 %v7978_v7  ;;  %6976 = vmatprep.subr.bf16.mxu0 %v8227_v1  ;;  %v6036_v7 = vld [vmem:[%s8303_s11 + $0x1c] sm:$0x3] }
  0x5d   : > { %7168 = vmatprep.subr.bf16.mxu1 %v8227_v1 }
  0x5f   : > { %6977 = vmatpush3.bf16.msra.mxu0 %v7979_v8  ;;  %v8020_v8 = vld [vmem:[%s9590_s1 + $0x140] sm:$0xff]  }
  0x60   : > { %7169 = vmatpush3.bf16.msra.mxu1 %v7980_v9  ;;  %6978 = vmatprep.subr.bf16.mxu0 %v8227_v1  ;;  %v8027_v9 = vld [vmem:[%s8303_s11 + $0x4] ss:$0 sps:$4 sm:$0x77]  }
  0x61   : > { %7170 = vmatprep.subr.bf16.mxu1 %v8227_v1 }
  0x63   : > { %6979 = vmatpush3.bf16.msra.mxu0 %v7981_v10  ;;  %v8029_v10 = vld [vmem:[%s8303_s11 + $0x8] ss:$0 sps:$4 sm:$0x77]  }
  0x64   : > { %7171 = vmatpush3.bf16.msra.mxu1 %v7982_v11  ;;  %6984 = vmatprep.subr.bf16.mxu0 %v8227_v1  ;;  %v8021_v11 = vld [vmem:[%s9590_s1 + $0x148] sm:$0xff]   ;;  %v2399_v15 = vshll.u32 %v8029_v10, 16  ;;  %v2397_v20 = vshrl.u32 %v8029_v10, 16  ;;  %v8061_v10 = vld [vmem:[%s9590_s1 + $0x1d8] sm:$0xff]  }
  0x65   : > { %7176 = vmatprep.subr.bf16.mxu1 %v8227_v1 }
  0x66   : > { %6981 = vmatmul.mubr.msk.bf16.vlgmr.msra.gmra.mrb[0].mxu0 %vm265_vm1, %v5754_v12  ;;  %v8022_v12 = vld [vmem:[%s9590_s1 + $0x148] sm:$0xff]  }
  0x67   : > { %6985 = vmatpush3.bf16.msra.mxu0 %v7983_v13  ;;  %7173 = vmatmul.mubr.msk.bf16.vlgmr.msra.gmra.mrb[0].mxu1 %vm265_vm1, %v5978_v14  ;;  %v1060_v13 = vshll.u32 %v8027_v9, 16  ;;  %v8023_v14 = vld [vmem:[%s9590_s1 + $0x150] sm:$0xff]  }
  0x68   : > { %7177 = vmatpush3.bf16.msra.mxu1 %v7984_v16  ;;  %6986 = vmatprep.subr.bf16.mxu0 %v8227_v1  ;;  %v8024_v16 = vld [vmem:[%s9590_s1 + $0x150] sm:$0xff]  }
  0x69   : > { %7178 = vmatprep.subr.bf16.mxu1 %v8227_v1  ;;  %6992 = vmatprep.mubr.msk.bf16.mxu0 %vm8228_vm0, %v8227_v1 }
  0x6a   : > { %7184 = vmatprep.mubr.msk.bf16.mxu1 %vm8228_vm0, %v8227_v1 }
  0x6b   : > { %6987 = vmatpush3.bf16.msra.mxu0 %v7985_v18  ;;  %v1058_v18 = vshrl.u32 %v8027_v9, 16 }
  0x6c   : > { %7179 = vmatpush3.bf16.msra.mxu1 %v7986_v19  ;;  %6988 = vmatprep.subr.bf16.mxu0 %v8227_v1  ;;  %v1062_v19 = vrot.slane %v1060_v13, 1 }
  0x6d   : > { %7180 = vmatprep.subr.bf16.mxu1 %v8227_v1 }
  0x6e   : > { %v1063_v23 = vor.u32 %v1062_v19, %v1058_v18  ;;  %v8066_v19 = vld [vmem:[%s9590_s1 + $0x1e0] sm:$0xff]  }
  0x6f   : > { %6989 = vmatpush3.bf16.msra.mxu0 %v7987_v21  ;;  %v2401_v21 = vrot.slane %v2399_v15, 1  ;;  %v8062_v15 = vld [vmem:[%s9590_s1 + $0x1d8] sm:$0xff]  }
  0x70   : > { %7181 = vmatpush3.bf16.msra.mxu1 %v7988_v22  ;;  %6990 = vmatprep.subr.bf16.mxu0 %v8227_v1  ;;  %v8026_v22 = vld [vmem:[%s9590_s1 + $0x158] sm:$0xff]  }
  0x71   : > { %7182 = vmatprep.subr.bf16.mxu1 %v8227_v1  ;;  %v2402_v25 = vor.u32 %v2401_v21, %v2397_v20  ;;  %v8073_v20 = vld [vmem:[%s8303_s11 + $0x40] ss:$0 sps:$4 sm:$0x77]   ;;  %v8067_v21 = vld [vmem:[%s9590_s1 + $0x1e8] sm:$0xff]  }
  0x73   : > { %6991 = vmatpush3.bf16.msra.mxu0 %v7989_v24  ;;  %v8028_v24 = vld [vmem:[%s9590_s1 + $0x160] sm:$0xff]  }
  0x74   : > { %7183 = vmatpush3.bf16.msra.mxu1 %v7990_v29  ;;  %6996 = vmatprep.subr.bf16.mxu0 %v8227_v1  ;;  %v8031_v29 = vld [vmem:[%s9590_s1 + $0x168] sm:$0xff]  }
  0x75   : > { %7188 = vmatprep.subr.bf16.mxu1 %v8227_v1 }
  0x76   : > { %6993 = vmatmul.mubr.msk.bf16.vlgmr.msra.gmra.mrb[0].mxu0 %vm265_vm1, %v729_v30  ;;  %v8032_v30 = vld [vmem:[%s9590_s1 + $0x168] sm:$0xff]  }
  0x77   : > { %6997 = vmatpush3.bf16.msra.mxu0 %v7992_v31  ;;  %7185 = vmatmul.mubr.msk.bf16.vlgmr.msra.gmra.mrb[0].mxu1 %vm265_vm1, %v2072_v32  ;;  %v8033_v31 = vld [vmem:[%s9590_s1 + $0x170] sm:$0xff]   ;;  %v1148_v32 = vshll.u32 %v8037_v27, 16 }
  0x78   : > { %7189 = vmatpush3.bf16.msra.mxu1 %v7994_v33  ;;  %6998 = vmatprep.subr.bf16.mxu0 %v8227_v1  ;;  %v8034_v33 = vld [vmem:[%s9590_s1 + $0x170] sm:$0xff]  }
  0x79   : > { %7190 = vmatprep.subr.bf16.mxu1 %v8227_v1  ;;  %7004 = vmatprep.mubr.msk.bf16.mxu0 %vm8228_vm0, %v8227_v1 }
  0x7a   : > { %7196 = vmatprep.mubr.msk.bf16.mxu1 %vm8228_vm0, %v8227_v1 }
  0x7b   : > { %6999 = vmatpush3.bf16.msra.mxu0 %v7995_v35  ;;  %v8035_v35 = vld [vmem:[%s9590_s1 + $0x178] sm:$0xff]  }
  0x7c   : > { %7191 = vmatpush3.bf16.msra.mxu1 %v7996_v37  ;;  %7000 = vmatprep.subr.bf16.mxu0 %v8227_v1  ;;  %v1150_v37 = vrot.slane %v1148_v32, 1 }
  0x7d   : > { %7192 = vmatprep.subr.bf16.mxu1 %v8227_v1 }
  0x7f   : > { %7001 = vmatpush3.bf16.msra.mxu0 %v7997_v39  ;;  %v2488_v39 = vrot.slane %v2486_v34, 1 }
  0x80   : > { %7193 = vmatpush3.bf16.msra.mxu1 %v7998_v41  ;;  %7002 = vmatprep.subr.bf16.mxu0 %v8227_v1  ;;  %v1151_v41 = vor.u32 %v1150_v37, %v1146_v36  ;;  %v8076_v37 = vld [vmem:[%s9590_s1 + $0x20] sm:$0xff]  }
  0x81   : > { %7194 = vmatprep.subr.bf16.mxu1 %v8227_v1  ;;  %v2489_v43 = vor.u32 %v2488_v39, %v2484_v38  ;;  %v8077_v38 = vld [vmem:[%s9590_s1 + $0x28] sm:$0xff]  }
  0x82   : > { %v8078_v39 = vld [vmem:[%s9590_s1 + $0x28] sm:$0xff]  }
  0x83   : > { %7003 = vmatpush3.bf16.msra.mxu0 %v7999_v42  ;;  %v8038_v42 = vld [vmem:[%s9590_s1 + $0x180] sm:$0xff]  }
  0x84   : > { %7195 = vmatpush3.bf16.msra.mxu1 %v8000_v47  ;;  %7008 = vmatprep.subr.bf16.mxu0 %v8227_v1  ;;  %v8043_v47 = vld [vmem:[%s9590_s1 + $0x190] sm:$0xff]  }
  0x85   : > { %7200 = vmatprep.subr.bf16.mxu1 %v8227_v1 }
  0x86   : > { %7005 = vmatmul.mubr.msk.bf16.vlgmr.msra.gmra.mrb[0].mxu0 %vm265_vm1, %v817_v48  ;;  %v8044_v48 = vld [vmem:[%s9590_s1 + $0x190] sm:$0xff]  }
  0x87   : > { %7009 = vmatpush3.bf16.msra.mxu0 %v8002_v49  ;;  %7197 = vmatmul.mubr.msk.bf16.vlgmr.msra.gmra.mrb[0].mxu1 %vm265_vm1, %v2159_v50  ;;  %v8045_v49 = vld [vmem:[%s9590_s1 + $0x198] sm:$0xff]  }
  0x88   : > { %7201 = vmatpush3.bf16.msra.mxu1 %v8004_v51  ;;  %7010 = vmatprep.subr.bf16.mxu0 %v8227_v1  ;;  %v8046_v50 = vld [vmem:[%s9590_s1 + $0x198] sm:$0xff]   ;;  %v5856_v51 = vld [vmem:[%s8303_s11 + $0x2c] sm:$0x3] }
  0x89   : > { %7202 = vmatprep.subr.bf16.mxu1 %v8227_v1  ;;  %7016 = vmatprep.mubr.msk.bf16.mxu0 %vm8228_vm0, %v8227_v1 }
  0x8a   : > { %7208 = vmatprep.mubr.msk.bf16.mxu1 %vm8228_vm0, %v8227_v1 }
  0x8b   : > { %7011 = vmatpush3.bf16.msra.mxu0 %v8005_v52  ;;  %v8047_v52 = vld [vmem:[%s9590_s1 + $0x1a0] sm:$0xff]  }
  0x8c   : > { %7203 = vmatpush3.bf16.msra.mxu1 %v8006_v53  ;;  %7012 = vmatprep.subr.bf16.mxu0 %v8227_v1  ;;  %v6080_v53 = vld [vmem:[%s8303_s11 + $0x30] sm:$0x3] }
  0x8d   : > { %7204 = vmatprep.subr.bf16.mxu1 %v8227_v1 }
  0x8f   : > { %7013 = vmatpush3.bf16.msra.mxu0 %v8007_v54  ;;  %v8048_v54 = vld [vmem:[%s9590_s1 + $0x1a0] sm:$0xff]  }
  0x90   : > { %7205 = vmatpush3.bf16.msra.mxu1 %v8008_v55  ;;  %7014 = vmatprep.subr.bf16.mxu0 %v8227_v1  ;;  %v8049_v55 = vld [vmem:[%s9590_s1 + $0x1a8] sm:$0xff]  }
  0x91   : > { %7206 = vmatprep.subr.bf16.mxu1 %v8227_v1 }
  0x93   : > { %7015 = vmatpush3.bf16.msra.mxu0 %v8009_v56  ;;  %v8050_v56 = vld [vmem:[%s9590_s1 + $0x1a8] sm:$0xff]  }
  0x94   : > { %7207 = vmatpush3.bf16.msra.mxu1 %v8010_v57  ;;  %7020 = vmatprep.subr.bf16.mxu0 %v8227_v1  ;;  %v8051_v57 = vld [vmem:[%s9590_s1 + $0x1b0] sm:$0xff]  }
  0x95   : > { %7212 = vmatprep.subr.bf16.mxu1 %v8227_v1 }
  0x96   : > { %7017 = vmatmul.mubr.msk.bf16.vlgmr.msra.gmra.mrb[0].mxu0 %vm265_vm1, %v5798_v58  ;;  %v8052_v58 = vld [vmem:[%s9590_s1 + $0x1b0] sm:$0xff]  }
  0x97   : > { %7021 = vmatpush3.bf16.msra.mxu0 %v8011_v59  ;;  %7209 = vmatmul.mubr.msk.bf16.vlgmr.msra.gmra.mrb[0].mxu1 %vm265_vm1, %v6022_v60  ;;  %v8053_v59 = vld [vmem:[%s9590_s1 + $0x1b8] sm:$0xff]  }
  0x98   : > { %7213 = vmatpush3.bf16.msra.mxu1 %v8012_v61  ;;  %7022 = vmatprep.subr.bf16.mxu0 %v8227_v1  ;;  %v8054_v60 = vld [vmem:[%s9590_s1 + $0x1b8] sm:$0xff]   ;;  %v5870_v61 = vld [vmem:[%s8303_s11 + $0x40] sm:$0x3] }
  0x99   : > { %7214 = vmatprep.subr.bf16.mxu1 %v8227_v1  ;;  %7028 = vmatprep.mubr.msk.bf16.mxu0 %vm8228_vm0, %v8227_v1 }
  0x9a   : > { %7220 = vmatprep.mubr.msk.bf16.mxu1 %vm8228_vm0, %v8227_v1 }
  0x9b   : > { %7023 = vmatpush3.bf16.msra.mxu0 %v8013_v62  ;;  %v8055_v62 = vld [vmem:[%s9590_s1 + $0x1c0] sm:$0xff]  }
  0x9c   : > { %7215 = vmatpush3.bf16.msra.mxu1 %v8014_v63  ;;  %7024 = vmatprep.subr.bf16.mxu0 %v8227_v1  ;;  %v6094_v63 = vld [vmem:[%s8303_s11 + $0x44] sm:$0x3] }
  0x9d   : > { %7216 = vmatprep.subr.bf16.mxu1 %v8227_v1 }
  0x9f   : > { %7025 = vmatpush3.bf16.msra.mxu0 %v8015_v0  ;;  %v8056_v0 = vld [vmem:[%s9590_s1 + $0x1c0] sm:$0xff]  }
  0xa0   : > { %7217 = vmatpush3.bf16.msra.mxu1 %v8016_v2  ;;  %7026 = vmatprep.subr.bf16.mxu0 %v8227_v1  ;;  %v8063_v2 = vld [vmem:[%s8303_s11 + $0x2c] ss:$0 sps:$4 sm:$0x77]  }
  0xa1   : > { %7218 = vmatprep.subr.bf16.mxu1 %v8227_v1 }
  0xa3   : > { %7027 = vmatpush3.bf16.msra.mxu0 %v8017_v3  ;;  %v8057_v3 = vld [vmem:[%s9590_s1 + $0x1c8] sm:$0xff]  }
  0xa4   : > { %7219 = vmatpush3.bf16.msra.mxu1 %v8018_v4  ;;  %7032 = vmatprep.subr.bf16.mxu0 %v8227_v1  ;;  %v8065_v4 = vld [vmem:[%s8303_s11 + $0x30] ss:$0 sps:$4 sm:$0x77]  }
  0xa5   : > { %7224 = vmatprep.subr.bf16.mxu1 %v8227_v1  ;;  %v2729_v9 = vshll.u32 %v8065_v4, 16  ;;  %v2727_v13 = vshrl.u32 %v8065_v4, 16 }
  0xa6   : > { %7029 = vmatmul.mubr.msk.bf16.vlgmr.msra.gmra.mrb[0].mxu0 %vm265_vm1, %v5812_v5  ;;  %v8058_v5 = vld [vmem:[%s9590_s1 + $0x1c8] sm:$0xff]  }
  0xa7   : > { %7033 = vmatpush3.bf16.msra.mxu0 %v8019_v6  ;;  %7221 = vmatmul.mubr.msk.bf16.vlgmr.msra.gmra.mrb[0].mxu1 %vm265_vm1, %v6036_v7  ;;  %v8059_v6 = vld [vmem:[%s9590_s1 + $0x1d0] sm:$0xff]   ;;  %v1394_v7 = vshll.u32 %v8063_v2, 16 }
  0xa8   : > { %7225 = vmatpush3.bf16.msra.mxu1 %v8020_v8  ;;  %7034 = vmatprep.subr.bf16.mxu0 %v8227_v1  ;;  %v8060_v8 = vld [vmem:[%s9590_s1 + $0x1d0] sm:$0xff]  }
  0xa9   : > { %7226 = vmatprep.subr.bf16.mxu1 %v8227_v1  ;;  %7040 = vmatprep.mubr.msk.bf16.mxu0 %vm8228_vm0, %v8227_v1 }
  0xaa   : > { %7232 = vmatprep.mubr.msk.bf16.mxu1 %vm8228_vm0, %v8227_v1 }
  0xab   : > { %7035 = vmatpush3.bf16.msra.mxu0 %v8021_v11  ;;  %v1392_v11 = vshrl.u32 %v8063_v2, 16  ;;  %v8096_v2 = vld [vmem:[%s9590_s1 + $0x50] sm:$0xff]  }
  0xac   : > { %7227 = vmatpush3.bf16.msra.mxu1 %v8022_v12  ;;  %7036 = vmatprep.subr.bf16.mxu0 %v8227_v1  ;;  %v1396_v12 = vrot.slane %v1394_v7, 1 }
  0xad   : > { %7228 = vmatprep.subr.bf16.mxu1 %v8227_v1 }
  0xaf   : > { %7037 = vmatpush3.bf16.msra.mxu0 %v8023_v14  ;;  %v2731_v14 = vrot.slane %v2729_v9, 1 }
  0xb0   : > { %7229 = vmatpush3.bf16.msra.mxu1 %v8024_v16  ;;  %7038 = vmatprep.subr.bf16.mxu0 %v8227_v1  ;;  %v1397_v16 = vor.u32 %v1396_v12, %v1392_v11  ;;  %v8102_v12 = vld [vmem:[%s9590_s1 + $0x60] sm:$0xff]  }
  0xb1   : > { %7230 = vmatprep.subr.bf16.mxu1 %v8227_v1  ;;  %v2732_v18 = vor.u32 %v2731_v14, %v2727_v13  ;;  %v8109_v13 = vld [vmem:[%s8303_s11 + $0x1c] ss:$0 sps:$4 sm:$0x77]   ;;  %v8103_v14 = vld [vmem:[%s9590_s1 + $0x68] sm:$0xff]  }
  0xb3   : > { %7039 = vmatpush3.bf16.msra.mxu0 %v8025_v17  ;;  %v8064_v17 = vld [vmem:[%s9590_s1 + $0x1e0] sm:$0xff]  }
  0xb4   : > { %7231 = vmatpush3.bf16.msra.mxu1 %v8026_v22  ;;  %7044 = vmatprep.subr.bf16.mxu0 %v8227_v1  ;;  %v8068_v22 = vld [vmem:[%s9590_s1 + $0x1e8] sm:$0xff]  }
  0xb5   : > { %7236 = vmatprep.subr.bf16.mxu1 %v8227_v1 }
  0xb6   : > { %7041 = vmatmul.mubr.msk.bf16.vlgmr.msra.gmra.mrb[0].mxu0 %vm265_vm1, %v1063_v23  ;;  %v8074_v23 = vld [vmem:[%s8303_s11 + $0x44] ss:$0 sps:$4 sm:$0x77]  }
  0xb7   : > { %7045 = vmatpush3.bf16.msra.mxu0 %v8028_v24  ;;  %7233 = vmatmul.mubr.msk.bf16.vlgmr.msra.gmra.mrb[0].mxu1 %vm265_vm1, %v2402_v25  ;;  %v8069_v24 = vld [vmem:[%s9590_s1 + $0x1f0] sm:$0xff]   ;;  %v2816_v27 = vshll.u32 %v8074_v23, 16 }
  0xb8   : > { %7237 = vmatpush3.bf16.msra.mxu1 %v8030_v26  ;;  %7046 = vmatprep.subr.bf16.mxu0 %v8227_v1  ;;  %v8070_v25 = vld [vmem:[%s9590_s1 + $0x1f0] sm:$0xff]   ;;  %v1482_v26 = vshll.u32 %v8073_v20, 16 }
  0xb9   : > { %7238 = vmatprep.subr.bf16.mxu1 %v8227_v1  ;;  %7052 = vmatprep.mubr.msk.bf16.mxu0 %vm8228_vm0, %v8227_v1  ;;  %v2818_v32 = vrot.slane %v2816_v27, 1 }
  0xba   : > { %7244 = vmatprep.mubr.msk.bf16.mxu1 %vm8228_vm0, %v8227_v1 }
  0xbb   : > { %7047 = vmatpush3.bf16.msra.mxu0 %v8031_v29  ;;  %v1480_v29 = vshrl.u32 %v8073_v20, 16  ;;  %v8106_v20 = vld [vmem:[%s9590_s1 + $0x70] sm:$0xff]  }
  0xbc   : > { %7239 = vmatpush3.bf16.msra.mxu1 %v8032_v30  ;;  %7048 = vmatprep.subr.bf16.mxu0 %v8227_v1  ;;  %v2814_v30 = vshrl.u32 %v8074_v23, 16  ;;  %v8107_v23 = vld [vmem:[%s9590_s1 + $0x78] sm:$0xff]  }
  0xbd   : > { %7240 = vmatprep.subr.bf16.mxu1 %v8227_v1 }
  0xbe   : > { %v2819_v36 = vor.u32 %v2818_v32, %v2814_v30  ;;  %v8112_v30 = vld [vmem:[%s9590_s1 + $0x80] sm:$0xff]   ;;  %v8114_v32 = vld [vmem:[%s9590_s1 + $0x88] sm:$0xff]  }
  0xbf   : > { %7049 = vmatpush3.bf16.msra.mxu0 %v8033_v31  ;;  %v1484_v31 = vrot.slane %v1482_v26, 1  ;;  %v8108_v26 = vld [vmem:[%s9590_s1 + $0x78] sm:$0xff]  }
  0xc0   : > { %7241 = vmatpush3.bf16.msra.mxu1 %v8034_v33  ;;  %7050 = vmatprep.subr.bf16.mxu0 %v8227_v1  ;;  %v8072_v33 = vld [vmem:[%s9590_s1 + $0x1f8] sm:$0xff]  }
  0xc1   : > { %7242 = vmatprep.subr.bf16.mxu1 %v8227_v1  ;;  %v1485_v34 = vor.u32 %v1484_v31, %v1480_v29  ;;  %v8113_v31 = vld [vmem:[%s9590_s1 + $0x88] sm:$0xff]  }
  0xc3   : > { %7051 = vmatpush3.bf16.msra.mxu0 %v8035_v35  ;;  %v8075_v35 = vld [vmem:[%s9590_s1 + $0x20] sm:$0xff]  }
  0xc4   : > { %7243 = vmatpush3.bf16.msra.mxu1 %v8036_v40  ;;  %7056 = vmatprep.subr.bf16.mxu0 %v8227_v1  ;;  %v8079_v40 = vld [vmem:[%s9590_s1 + $0x30] sm:$0xff]  }
  0xc5   : > { %7248 = vmatprep.subr.bf16.mxu1 %v8227_v1 }
  0xc6   : > { %7053 = vmatmul.mubr.msk.bf16.vlgmr.msra.gmra.mrb[0].mxu0 %vm265_vm1, %v1151_v41  ;;  %v8080_v41 = vld [vmem:[%s9590_s1 + $0x30] sm:$0xff]  }
  0xc7   : > { %7057 = vmatpush3.bf16.msra.mxu0 %v8038_v42  ;;  %7245 = vmatmul.mubr.msk.bf16.vlgmr.msra.gmra.mrb[0].mxu1 %vm265_vm1, %v2489_v43  ;;  %v8081_v42 = vld [vmem:[%s9590_s1 + $0x38] sm:$0xff]  }
  0xc8   : > { %7249 = vmatpush3.bf16.msra.mxu1 %v8040_v44  ;;  %7058 = vmatprep.subr.bf16.mxu0 %v8227_v1  ;;  %v8082_v43 = vld [vmem:[%s9590_s1 + $0x38] sm:$0xff]  }
  0xc9   : > { %7250 = vmatprep.subr.bf16.mxu1 %v8227_v1  ;;  %7064 = vmatprep.mubr.msk.bf16.mxu0 %vm8228_vm0, %v8227_v1  ;;  %v6140_v44 = vld [vmem:[%s8303_s11 + $0x1c] sm:$0x3] }
  0xca   : > { %7256 = vmatprep.mubr.msk.bf16.mxu1 %vm8228_vm0, %v8227_v1 }
  0xcb   : > { %7059 = vmatpush3.bf16.msra.mxu0 %v8041_v45  ;;  %v8083_v45 = vld [vmem:[%s9590_s1] sm:$0xff]  }
  0xcc   : > { %7251 = vmatpush3.bf16.msra.mxu1 %v8042_v46  ;;  %7060 = vmatprep.subr.bf16.mxu0 %v8227_v1  ;;  %v6365_v46 = vld [vmem:[%s8303_s11 + $0x20] sm:$0x3] }
  0xcd   : > { %7252 = vmatprep.subr.bf16.mxu1 %v8227_v1 }
  0xcf   : > { %7061 = vmatpush3.bf16.msra.mxu0 %v8043_v47  ;;  %v8084_v47 = vld [vmem:[%s9590_s1] sm:$0xff]  }
  0xd0   : > { %7253 = vmatpush3.bf16.msra.mxu1 %v8044_v48  ;;  %7062 = vmatprep.subr.bf16.mxu0 %v8227_v1  ;;  %v8085_v48 = vld [vmem:[%s9590_s1 + $0x8] sm:$0xff]  }
  0xd1   : > { %7254 = vmatprep.subr.bf16.mxu1 %v8227_v1 }
  0xd3   : > { %7063 = vmatpush3.bf16.msra.mxu0 %v8045_v49  ;;  %v8086_v49 = vld [vmem:[%s9590_s1 + $0x8] sm:$0xff]  }
  0xd4   : > { %7255 = vmatpush3.bf16.msra.mxu1 %v8046_v50  ;;  %7068 = vmatprep.subr.bf16.mxu0 %v8227_v1  ;;  %v8087_v50 = vld [vmem:[%s9590_s1 + $0x10] sm:$0xff]  }
  0xd5   : > { %7260 = vmatprep.subr.bf16.mxu1 %v8227_v1 }
  0xd6   : > { %7065 = vmatmul.mubr.msk.bf16.vlgmr.msra.gmra.mrb[0].mxu0 %vm265_vm1, %v5856_v51  ;;  %v8088_v51 = vld [vmem:[%s9590_s1 + $0x10] sm:$0xff]  }
  0xd7   : > { %7069 = vmatpush3.bf16.msra.mxu0 %v8047_v52  ;;  %7257 = vmatmul.mubr.msk.bf16.vlgmr.msra.gmra.mrb[0].mxu1 %vm265_vm1, %v6080_v53  ;;  %v8089_v52 = vld [vmem:[%s9590_s1 + $0x18] sm:$0xff]  }
  0xd8   : > { %7261 = vmatpush3.bf16.msra.mxu1 %v8048_v54  ;;  %7070 = vmatprep.subr.bf16.mxu0 %v8227_v1  ;;  %v8090_v53 = vld [vmem:[%s9590_s1 + $0x18] sm:$0xff]   ;;  %v6139_v54 = vld [vmem:[%s8303_s11 + $0x8] sm:$0x3] }
  0xd9   : > { %7262 = vmatprep.subr.bf16.mxu1 %v8227_v1  ;;  %7076 = vmatprep.mubr.msk.bf16.mxu0 %vm8228_vm0, %v8227_v1 }
  0xda   : > { %7268 = vmatprep.mubr.msk.bf16.mxu1 %vm8228_vm0, %v8227_v1 }
  0xdb   : > { %7071 = vmatpush3.bf16.msra.mxu0 %v8049_v55  ;;  %v8091_v55 = vld [vmem:[%s9590_s1 + $0x40] sm:$0xff]  }
  0xdc   : > { %7263 = vmatpush3.bf16.msra.mxu1 %v8050_v56  ;;  %7072 = vmatprep.subr.bf16.mxu0 %v8227_v1  ;;  %v6364_v56 = vld [vmem:[%s8303_s11 + $0xc] sm:$0x3] }
  0xdd   : > { %7264 = vmatprep.subr.bf16.mxu1 %v8227_v1 }
  0xdf   : > { %7073 = vmatpush3.bf16.msra.mxu0 %v8051_v57  ;;  %v8092_v57 = vld [vmem:[%s9590_s1 + $0x40] sm:$0xff]  }
  0xe0   : > { %7265 = vmatpush3.bf16.msra.mxu1 %v8052_v58  ;;  %7074 = vmatprep.subr.bf16.mxu0 %v8227_v1  ;;  %v8099_v58 = vld [vmem:[%s8303_s11 + $0x8] ss:$0 sps:$4 sm:$0x77]  }
  0xe1   : > { %7266 = vmatprep.subr.bf16.mxu1 %v8227_v1 }
  0xe3   : > { %7075 = vmatpush3.bf16.msra.mxu0 %v8053_v59  ;;  %v8093_v59 = vld [vmem:[%s9590_s1 + $0x48] sm:$0xff]  }
  0xe4   : > { %7267 = vmatpush3.bf16.msra.mxu1 %v8054_v60  ;;  %7080 = vmatprep.subr.bf16.mxu0 %v8227_v1  ;;  %v8101_v60 = vld [vmem:[%s8303_s11 + $0xc] ss:$0 sps:$4 sm:$0x77]  }
  0xe5   : > { %7272 = vmatprep.subr.bf16.mxu1 %v8227_v1 }
  0xe6   : > { %7077 = vmatmul.mubr.msk.bf16.vlgmr.msra.gmra.mrb[0].mxu0 %vm265_vm1, %v5870_v61  ;;  %v8094_v61 = vld [vmem:[%s9590_s1 + $0x48] sm:$0xff]  }
  0xe7   : > { %7081 = vmatpush3.bf16.msra.mxu0 %v8055_v62  ;;  %7269 = vmatmul.mubr.msk.bf16.vlgmr.msra.gmra.mrb[0].mxu1 %vm265_vm1, %v6094_v63  ;;  %v3075_v62 = vshll.u32 %v8099_v58, 16  ;;  %v8095_v63 = vld [vmem:[%s9590_s1 + $0x50] sm:$0xff]  }
  0xe8   : > { %7273 = vmatpush3.bf16.msra.mxu1 %v8056_v0  ;;  %7082 = vmatprep.subr.bf16.mxu0 %v8227_v1  ;;  %v4409_v0 = vshll.u32 %v8101_v60, 16 }
  0xe9   : > { %7274 = vmatprep.subr.bf16.mxu1 %v8227_v1  ;;  %7088 = vmatprep.mubr.msk.bf16.mxu0 %vm8228_vm0, %v8227_v1  ;;  %v3077_v4 = vrot.slane %v3075_v62, 1 }
  0xea   : > { %7280 = vmatprep.mubr.msk.bf16.mxu1 %vm8228_vm0, %v8227_v1  ;;  %v4411_v7 = vrot.slane %v4409_v0, 1  ;;  %v8134_v0 = vld [vmem:[%s9590_s1 + $0xd8] sm:$0xff]  }
  0xeb   : > { %7083 = vmatpush3.bf16.msra.mxu0 %v8057_v3  ;;  %v3073_v3 = vshrl.u32 %v8099_v58, 16  ;;  %v8132_v58 = vld [vmem:[%s9590_s1 + $0xd0] sm:$0xff]  }
  0xec   : > { %7275 = vmatpush3.bf16.msra.mxu1 %v8058_v5  ;;  %7084 = vmatprep.subr.bf16.mxu0 %v8227_v1  ;;  %v8097_v5 = vld [vmem:[%s9590_s1 + $0x58] sm:$0xff]  }
  0xed   : > { %7276 = vmatprep.subr.bf16.mxu1 %v8227_v1  ;;  %v3078_v9 = vor.u32 %v3077_v4, %v3073_v3  ;;  %v8136_v3 = vld [vmem:[%s9590_s1 + $0xe0] sm:$0xff]  }
  0xef   : > { %7085 = vmatpush3.bf16.msra.mxu0 %v8059_v6  ;;  %v4407_v6 = vshrl.u32 %v8101_v60, 16 }
  0xf0   : > { %7277 = vmatpush3.bf16.msra.mxu1 %v8060_v8  ;;  %7086 = vmatprep.subr.bf16.mxu0 %v8227_v1  ;;  %v8098_v8 = vld [vmem:[%s9590_s1 + $0x58] sm:$0xff]  }
  0xf1   : > { %7278 = vmatprep.subr.bf16.mxu1 %v8227_v1  ;;  %v4412_v11 = vor.u32 %v4411_v7, %v4407_v6  ;;  %v8145_v6 = vld [vmem:[%s8303_s11 + $0x44] ss:$0 sps:$4 sm:$0x77]   ;;  %v8139_v7 = vld [vmem:[%s9590_s1 + $0xe8] sm:$0xff]  }
  0xf3   : > { %7087 = vmatpush3.bf16.msra.mxu0 %v8061_v10  ;;  %v8100_v10 = vld [vmem:[%s9590_s1 + $0x60] sm:$0xff]  }
  0xf4   : > { %7279 = vmatpush3.bf16.msra.mxu1 %v8062_v15  ;;  %7092 = vmatprep.subr.bf16.mxu0 %v8227_v1  ;;  %v8111_v15 = vld [vmem:[%s8303_s11 + $0x20] ss:$0 sps:$4 sm:$0x77]  }
  0xf5   : > { %7284 = vmatprep.subr.bf16.mxu1 %v8227_v1 }
  0xf6   : > { %7089 = vmatmul.mubr.msk.bf16.vlgmr.msra.gmra.mrb[0].mxu0 %vm265_vm1, %v1397_v16  ;;  %v8104_v16 = vld [vmem:[%s9590_s1 + $0x68] sm:$0xff]  }
  0xf7   : > { %7093 = vmatpush3.bf16.msra.mxu0 %v8064_v17  ;;  %7281 = vmatmul.mubr.msk.bf16.vlgmr.msra.gmra.mrb[0].mxu1 %vm265_vm1, %v2732_v18  ;;  %v3162_v17 = vshll.u32 %v8109_v13, 16  ;;  %v8105_v18 = vld [vmem:[%s9590_s1 + $0x70] sm:$0xff]  }
  0xf8   : > { %7285 = vmatpush3.bf16.msra.mxu1 %v8066_v19  ;;  %7094 = vmatprep.subr.bf16.mxu0 %v8227_v1  ;;  %v4496_v19 = vshll.u32 %v8111_v15, 16 }
  0xf9   : > { %7286 = vmatprep.subr.bf16.mxu1 %v8227_v1  ;;  %7100 = vmatprep.mubr.msk.bf16.mxu0 %vm8228_vm0, %v8227_v1 }
  0xfa   : > { %7292 = vmatprep.mubr.msk.bf16.mxu1 %vm8228_vm0, %v8227_v1 }
  0xfb   : > { %7095 = vmatpush3.bf16.msra.mxu0 %v8067_v21  ;;  %v3160_v21 = vshrl.u32 %v8109_v13, 16  ;;  %v8142_v13 = vld [vmem:[%s9590_s1 + $0xf0] sm:$0xff]  }
  0xfc   : > { %7287 = vmatpush3.bf16.msra.mxu1 %v8068_v22  ;;  %7096 = vmatprep.subr.bf16.mxu0 %v8227_v1  ;;  %v3164_v22 = vrot.slane %v3162_v17, 1 }
  0xfd   : > { %7288 = vmatprep.subr.bf16.mxu1 %v8227_v1 }
  0xfe   : > { %v3165_v27 = vor.u32 %v3164_v22, %v3160_v21  ;;  %v8146_v21 = vld [vmem:[%s9590_s1 + $0x100] sm:$0xff]  }
  0xff   : > { %7097 = vmatpush3.bf16.msra.mxu0 %v8069_v24  ;;  %v4494_v24 = vshrl.u32 %v8111_v15, 16 }
 0x100   : > { %7289 = vmatpush3.bf16.msra.mxu1 %v8070_v25  ;;  %7098 = vmatprep.subr.bf16.mxu0 %v8227_v1  ;;  %v4498_v25 = vrot.slane %v4496_v19, 1  ;;  %v8144_v19 = vld [vmem:[%s9590_s1 + $0xf8] sm:$0xff]  }
 0x101   : > { %7290 = vmatprep.subr.bf16.mxu1 %v8227_v1 }
 0x102   : > { %v4499_v29 = vor.u32 %v4498_v25, %v4494_v24  ;;  %v8149_v24 = vld [vmem:[%s9590_s1 + $0x108] sm:$0xff]  }
 0x103   : > { %7099 = vmatpush3.bf16.msra.mxu0 %v8071_v28  ;;  %v8110_v28 = vld [vmem:[%s9590_s1 + $0x80] sm:$0xff]   ;;  %v8150_v25 = vld [vmem:[%s9590_s1 + $0x108] sm:$0xff]  }
 0x104   : > { %7291 = vmatpush3.bf16.msra.mxu1 %v8072_v33  ;;  %7296 = vmatprep.subr.bf16.mxu0 %v8227_v1  ;;  %v8115_v33 = vld [vmem:[%s9590_s1 + $0x90] sm:$0xff]  }
 0x105   : > { %7488 = vmatprep.subr.bf16.mxu1 %v8227_v1 }
 0x106   : > { %7101 = vmatmul.mubr.msk.bf16.vlgmr.msra.gmra.mrb[0].mxu0 %vm265_vm1, %v1485_v34  ;;  %v8116_v34 = vld [vmem:[%s9590_s1 + $0x90] sm:$0xff]  }
 0x107   : > { %7293 = vmatmul.mubr.msk.bf16.vlgmr.msra.gmra.mrb[0].mxu1 %vm265_vm1, %v2819_v36  ;;  %7297 = vmatpush3.bf16.msra.mxu0 %v8075_v35  ;;  %v8117_v35 = vld [vmem:[%s9590_s1 + $0x98] sm:$0xff]  }
 0x108   : > { %7489 = vmatpush3.bf16.msra.mxu1 %v8076_v37  ;;  %7298 = vmatprep.subr.bf16.mxu0 %v8227_v1  ;;  %v8118_v36 = vld [vmem:[%s9590_s1 + $0x98] sm:$0xff]   ;;  %v6189_v37 = vld [vmem:[%s8303_s11 + $0x30] sm:$0x3] }
 0x109   : > { %7490 = vmatprep.subr.bf16.mxu1 %v8227_v1  ;;  %7304 = vmatprep.mubr.msk.bf16.mxu0 %vm8228_vm0, %v8227_v1 }
 0x10a   : > { %7496 = vmatprep.mubr.msk.bf16.mxu1 %vm8228_vm0, %v8227_v1 }
 0x10b   : > { %7299 = vmatpush3.bf16.msra.mxu0 %v8077_v38  ;;  %v8119_v38 = vld [vmem:[%s9590_s1 + $0xa0] sm:$0xff]  }
 0x10c   : > { %7491 = vmatpush3.bf16.msra.mxu1 %v8078_v39  ;;  %7300 = vmatprep.subr.bf16.mxu0 %v8227_v1  ;;  %v6414_v39 = vld [vmem:[%s8303_s11 + $0x34] sm:$0x3] }
 0x10d   : > { %7492 = vmatprep.subr.bf16.mxu1 %v8227_v1 }
 0x10f   : > { %7301 = vmatpush3.bf16.msra.mxu0 %v8079_v40  ;;  %v8120_v40 = vld [vmem:[%s9590_s1 + $0xa0] sm:$0xff]  }
 0x110   : > { %7493 = vmatpush3.bf16.msra.mxu1 %v8080_v41  ;;  %7302 = vmatprep.subr.bf16.mxu0 %v8227_v1  ;;  %v8121_v41 = vld [vmem:[%s9590_s1 + $0xa8] sm:$0xff]  }
 0x111   : > { %7494 = vmatprep.subr.bf16.mxu1 %v8227_v1 }
 0x113   : > { %7303 = vmatpush3.bf16.msra.mxu0 %v8081_v42  ;;  %v8122_v42 = vld [vmem:[%s9590_s1 + $0xa8] sm:$0xff]  }
 0x114   : > { %7495 = vmatpush3.bf16.msra.mxu1 %v8082_v43  ;;  %7308 = vmatprep.subr.bf16.mxu0 %v8227_v1  ;;  %v8123_v43 = vld [vmem:[%s9590_s1 + $0xb0] sm:$0xff]  }
 0x115   : > { %7500 = vmatprep.subr.bf16.mxu1 %v8227_v1 }
 0x116   : > { %7305 = vmatmul.mubr.msk.bf16.vlgmr.msra.gmra.mrb[4].mxu0 %vm265_vm1, %v6140_v44  ;;  %v8124_v44 = vld [vmem:[%s9590_s1 + $0xb0] sm:$0xff]  }
 0x117   : > { %7309 = vmatpush3.bf16.msra.mxu0 %v8083_v45  ;;  %7497 = vmatmul.mubr.msk.bf16.vlgmr.msra.gmra.mrb[4].mxu1 %vm265_vm1, %v6365_v46  ;;  %v8125_v45 = vld [vmem:[%s9590_s1 + $0xb8] sm:$0xff]  }
 0x118   : > { %7501 = vmatpush3.bf16.msra.mxu1 %v8084_v47  ;;  %7310 = vmatprep.subr.bf16.mxu0 %v8227_v1  ;;  %v8126_v46 = vld [vmem:[%s9590_s1 + $0xb8] sm:$0xff]   ;;  %v6203_v47 = vld [vmem:[%s8303_s11 + $0x44] sm:$0x3] }
 0x119   : > { %7502 = vmatprep.subr.bf16.mxu1 %v8227_v1  ;;  %7316 = vmatprep.mubr.msk.bf16.mxu0 %vm8228_vm0, %v8227_v1 }
 0x11a   : > { %7508 = vmatprep.mubr.msk.bf16.mxu1 %vm8228_vm0, %v8227_v1 }
 0x11b   : > { %7311 = vmatpush3.bf16.msra.mxu0 %v8085_v48  ;;  %v8127_v48 = vld [vmem:[%s9590_s1 + $0xc0] sm:$0xff]  }
 0x11c   : > { %7503 = vmatpush3.bf16.msra.mxu1 %v8086_v49  ;;  %7312 = vmatprep.subr.bf16.mxu0 %v8227_v1  ;;  %v6428_v49 = vld [vmem:[%s8303_s11 + $0x48] sm:$0x3] }
 0x11d   : > { %7504 = vmatprep.subr.bf16.mxu1 %v8227_v1 }
 0x11f   : > { %7313 = vmatpush3.bf16.msra.mxu0 %v8087_v50  ;;  %v8128_v50 = vld [vmem:[%s9590_s1 + $0xc0] sm:$0xff]  }
 0x120   : > { %7505 = vmatpush3.bf16.msra.mxu1 %v8088_v51  ;;  %7314 = vmatprep.subr.bf16.mxu0 %v8227_v1  ;;  %v8135_v51 = vld [vmem:[%s8303_s11 + $0x30] ss:$0 sps:$4 sm:$0x77]  }
 0x121   : > { %7506 = vmatprep.subr.bf16.mxu1 %v8227_v1 }
 0x123   : > { %7315 = vmatpush3.bf16.msra.mxu0 %v8089_v52  ;;  %v8129_v52 = vld [vmem:[%s9590_s1 + $0xc8] sm:$0xff]  }
 0x124   : > { %7507 = vmatpush3.bf16.msra.mxu1 %v8090_v53  ;;  %7320 = vmatprep.subr.bf16.mxu0 %v8227_v1  ;;  %v8137_v53 = vld [vmem:[%s8303_s11 + $0x34] ss:$0 sps:$4 sm:$0x77]  }
 0x125   : > { %7512 = vmatprep.subr.bf16.mxu1 %v8227_v1  ;;  %v4735_v62 = vshrl.u32 %v8137_v53, 16 }
 0x126   : > { %7317 = vmatmul.mubr.msk.bf16.vlgmr.msra.gmra.mrb[4].mxu0 %vm265_vm1, %v6139_v54  ;;  %v8130_v54 = vld [vmem:[%s9590_s1 + $0xc8] sm:$0xff]  }
 0x127   : > { %7321 = vmatpush3.bf16.msra.mxu0 %v8091_v55  ;;  %7509 = vmatmul.mubr.msk.bf16.vlgmr.msra.gmra.mrb[4].mxu1 %vm265_vm1, %v6364_v56  ;;  %v3403_v55 = vshll.u32 %v8135_v51, 16  ;;  %v8131_v56 = vld [vmem:[%s9590_s1 + $0xd0] sm:$0xff]  }
 0x128   : > { %7513 = vmatpush3.bf16.msra.mxu1 %v8092_v57  ;;  %7322 = vmatprep.subr.bf16.mxu0 %v8227_v1  ;;  %v4737_v57 = vshll.u32 %v8137_v53, 16 }
 0x129   : > { %7514 = vmatprep.subr.bf16.mxu1 %v8227_v1  ;;  %7328 = vmatprep.mubr.msk.bf16.mxu0 %vm8228_vm0, %v8227_v1  ;;  %v3405_v60 = vrot.slane %v3403_v55, 1 }
 0x12a   : > { %7520 = vmatprep.mubr.msk.bf16.mxu1 %vm8228_vm0, %v8227_v1 }
 0x12b   : > { %7323 = vmatpush3.bf16.msra.mxu0 %v8093_v59  ;;  %v3401_v59 = vshrl.u32 %v8135_v51, 16  ;;  %v8168_v51 = vld [vmem:[%s9590_s1 + $0x150] sm:$0xff]  }
 0x12c   : > { %7515 = vmatpush3.bf16.msra.mxu1 %v8094_v61  ;;  %7324 = vmatprep.subr.bf16.mxu0 %v8227_v1  ;;  %v8133_v61 = vld [vmem:[%s9590_s1 + $0xd8] sm:$0xff]  }
 0x12d   : > { %7516 = vmatprep.subr.bf16.mxu1 %v8227_v1 }
 0x12f   : > { %7325 = vmatpush3.bf16.msra.mxu0 %v8095_v63  ;;  %v4739_v63 = vrot.slane %v4737_v57, 1  ;;  %v8170_v57 = vld [vmem:[%s9590_s1 + $0x158] sm:$0xff]  }
 0x130   : > { %7517 = vmatpush3.bf16.msra.mxu1 %v8096_v2  ;;  %7326 = vmatprep.subr.bf16.mxu0 %v8227_v1  ;;  %v3406_v2 = vor.u32 %v3405_v60, %v3401_v59  ;;  %v8172_v59 = vld [vmem:[%s9590_s1 + $0x160] sm:$0xff]  }
 0x131   : > { %7518 = vmatprep.subr.bf16.mxu1 %v8227_v1  ;;  %v4740_v4 = vor.u32 %v4739_v63, %v4735_v62  ;;  %v8181_v62 = vld [vmem:[%s8303_s11 + $0x20] ss:$0 sps:$4 sm:$0x77]   ;;  %v8175_v63 = vld [vmem:[%s9590_s1 + $0x168] sm:$0xff]  }
 0x133   : > { %7327 = vmatpush3.bf16.msra.mxu0 %v8097_v5  ;;  %v8138_v5 = vld [vmem:[%s9590_s1 + $0xe0] sm:$0xff]  }
 0x134   : > { %7519 = vmatpush3.bf16.msra.mxu1 %v8098_v8  ;;  %7332 = vmatprep.subr.bf16.mxu0 %v8227_v1  ;;  %v8147_v8 = vld [vmem:[%s8303_s11 + $0x48] ss:$0 sps:$4 sm:$0x77]  }
 0x135   : > { %7524 = vmatprep.subr.bf16.mxu1 %v8227_v1  ;;  %v4822_v17 = vshrl.u32 %v8147_v8, 16 }
 0x136   : > { %7329 = vmatmul.mubr.msk.bf16.vlgmr.msra.gmra.mrb[4].mxu0 %vm265_vm1, %v3078_v9  ;;  %v8140_v9 = vld [vmem:[%s9590_s1 + $0xe8] sm:$0xff]  }
 0x137   : > { %7333 = vmatpush3.bf16.msra.mxu0 %v8100_v10  ;;  %7521 = vmatmul.mubr.msk.bf16.vlgmr.msra.gmra.mrb[4].mxu1 %vm265_vm1, %v4412_v11  ;;  %v3490_v10 = vshll.u32 %v8145_v6, 16  ;;  %v8141_v11 = vld [vmem:[%s9590_s1 + $0xf0] sm:$0xff]  }
 0x138   : > { %7525 = vmatpush3.bf16.msra.mxu1 %v8102_v12  ;;  %7334 = vmatprep.subr.bf16.mxu0 %v8227_v1  ;;  %v4824_v12 = vshll.u32 %v8147_v8, 16 }
 0x139   : > { %7526 = vmatprep.subr.bf16.mxu1 %v8227_v1  ;;  %7340 = vmatprep.mubr.msk.bf16.mxu0 %vm8228_vm0, %v8227_v1  ;;  %v3492_v15 = vrot.slane %v3490_v10, 1 }
 0x13a   : > { %7532 = vmatprep.mubr.msk.bf16.mxu1 %vm8228_vm0, %v8227_v1 }
 0x13b   : > { %7335 = vmatpush3.bf16.msra.mxu0 %v8103_v14  ;;  %v3488_v14 = vshrl.u32 %v8145_v6, 16  ;;  %v8178_v6 = vld [vmem:[%s9590_s1 + $0x170] sm:$0xff]  }
 0x13c   : > { %7527 = vmatpush3.bf16.msra.mxu1 %v8104_v16  ;;  %7336 = vmatprep.subr.bf16.mxu0 %v8227_v1  ;;  %v8143_v16 = vld [vmem:[%s9590_s1 + $0xf8] sm:$0xff]  }
 0x13d   : > { %7528 = vmatprep.subr.bf16.mxu1 %v8227_v1 }
 0x13f   : > { %7337 = vmatpush3.bf16.msra.mxu0 %v8105_v18  ;;  %v4826_v18 = vrot.slane %v4824_v12, 1  ;;  %v8180_v12 = vld [vmem:[%s9590_s1 + $0x178] sm:$0xff]  }
 0x140   : > { %7529 = vmatpush3.bf16.msra.mxu1 %v8106_v20  ;;  %7338 = vmatprep.subr.bf16.mxu0 %v8227_v1  ;;  %v3493_v20 = vor.u32 %v3492_v15, %v3488_v14  ;;  %v8182_v14 = vld [vmem:[%s9590_s1 + $0x180] sm:$0xff]  }
 0x141   : > { %7530 = vmatprep.subr.bf16.mxu1 %v8227_v1  ;;  %v4827_v22 = vor.u32 %v4826_v18, %v4822_v17  ;;  %v8185_v17 = vld [vmem:[%s9590_s1 + $0x188] sm:$0xff]  }
 0x142   : > { %v8186_v18 = vld [vmem:[%s9590_s1 + $0x188] sm:$0xff]  }
 0x143   : > { %7339 = vmatpush3.bf16.msra.mxu0 %v8107_v23  ;;  %v8148_v23 = vld [vmem:[%s9590_s1 + $0x100] sm:$0xff]  }
 0x144   : > { %7531 = vmatpush3.bf16.msra.mxu1 %v8108_v26  ;;  %7344 = vmatprep.subr.bf16.mxu0 %v8227_v1  ;;  %v8151_v26 = vld [vmem:[%s9590_s1 + $0x110] sm:$0xff]  }
 0x145   : > { %7536 = vmatprep.subr.bf16.mxu1 %v8227_v1 }
 0x146   : > { %7341 = vmatmul.mubr.msk.bf16.vlgmr.msra.gmra.mrb[4].mxu0 %vm265_vm1, %v3165_v27  ;;  %v8152_v27 = vld [vmem:[%s9590_s1 + $0x110] sm:$0xff]  }
 0x147   : > { %7345 = vmatpush3.bf16.msra.mxu0 %v8110_v28  ;;  %7533 = vmatmul.mubr.msk.bf16.vlgmr.msra.gmra.mrb[4].mxu1 %vm265_vm1, %v4499_v29  ;;  %v8153_v28 = vld [vmem:[%s9590_s1 + $0x118] sm:$0xff]  }
 0x148   : > { %7537 = vmatpush3.bf16.msra.mxu1 %v8112_v30  ;;  %7346 = vmatprep.subr.bf16.mxu0 %v8227_v1  ;;  %v8154_v29 = vld [vmem:[%s9590_s1 + $0x118] sm:$0xff]   ;;  %v6247_v30 = vld [vmem:[%s8303_s11 + $0xc] sm:$0x3] }
 0x149   : > { %7538 = vmatprep.subr.bf16.mxu1 %v8227_v1  ;;  %7352 = vmatprep.mubr.msk.bf16.mxu0 %vm8228_vm0, %v8227_v1 }
 0x14a   : > { %7544 = vmatprep.mubr.msk.bf16.mxu1 %vm8228_vm0, %v8227_v1 }
 0x14b   : > { %7347 = vmatpush3.bf16.msra.mxu0 %v8113_v31  ;;  %v8155_v31 = vld [vmem:[%s9590_s1 + $0x120] sm:$0xff]  }
 0x14c   : > { %7539 = vmatpush3.bf16.msra.mxu1 %v8114_v32  ;;  %7348 = vmatprep.subr.bf16.mxu0 %v8227_v1  ;;  %v6472_v32 = vld [vmem:[%s8303_s11 + $0x10] sm:$0x3] }
 0x14d   : > { %7540 = vmatprep.subr.bf16.mxu1 %v8227_v1 }
 0x14f   : > { %7349 = vmatpush3.bf16.msra.mxu0 %v8115_v33  ;;  %v8156_v33 = vld [vmem:[%s9590_s1 + $0x120] sm:$0xff]  }
 0x150   : > { %7541 = vmatpush3.bf16.msra.mxu1 %v8116_v34  ;;  %7350 = vmatprep.subr.bf16.mxu0 %v8227_v1  ;;  %v8157_v34 = vld [vmem:[%s9590_s1 + $0x128] sm:$0xff]  }
 0x151   : > { %7542 = vmatprep.subr.bf16.mxu1 %v8227_v1 }
 0x153   : > { %7351 = vmatpush3.bf16.msra.mxu0 %v8117_v35  ;;  %v8158_v35 = vld [vmem:[%s9590_s1 + $0x128] sm:$0xff]  }
 0x154   : > { %7543 = vmatpush3.bf16.msra.mxu1 %v8118_v36  ;;  %7356 = vmatprep.subr.bf16.mxu0 %v8227_v1  ;;  %v8159_v36 = vld [vmem:[%s9590_s1 + $0x130] sm:$0xff]  }
 0x155   : > { %7548 = vmatprep.subr.bf16.mxu1 %v8227_v1 }
 0x156   : > { %7353 = vmatmul.mubr.msk.bf16.vlgmr.msra.gmra.mrb[4].mxu0 %vm265_vm1, %v6189_v37  ;;  %v8160_v37 = vld [vmem:[%s9590_s1 + $0x130] sm:$0xff]  }
 0x157   : > { %7357 = vmatpush3.bf16.msra.mxu0 %v8119_v38  ;;  %7545 = vmatmul.mubr.msk.bf16.vlgmr.msra.gmra.mrb[4].mxu1 %vm265_vm1, %v6414_v39  ;;  %v8161_v38 = vld [vmem:[%s9590_s1 + $0x138] sm:$0xff]  }
 0x158   : > { %7549 = vmatpush3.bf16.msra.mxu1 %v8120_v40  ;;  %7358 = vmatprep.subr.bf16.mxu0 %v8227_v1  ;;  %v8162_v39 = vld [vmem:[%s9590_s1 + $0x138] sm:$0xff]   ;;  %v6261_v40 = vld [vmem:[%s8303_s11 + $0x20] sm:$0x3] }
 0x159   : > { %7550 = vmatprep.subr.bf16.mxu1 %v8227_v1  ;;  %7364 = vmatprep.mubr.msk.bf16.mxu0 %vm8228_vm0, %v8227_v1 }
 0x15a   : > { %7556 = vmatprep.mubr.msk.bf16.mxu1 %vm8228_vm0, %v8227_v1 }
 0x15b   : > { %7359 = vmatpush3.bf16.msra.mxu0 %v8121_v41  ;;  %v8163_v41 = vld [vmem:[%s9590_s1 + $0x140] sm:$0xff]  }
 0x15c   : > { %7551 = vmatpush3.bf16.msra.mxu1 %v8122_v42  ;;  %7360 = vmatprep.subr.bf16.mxu0 %v8227_v1  ;;  %v6486_v42 = vld [vmem:[%s8303_s11 + $0x24] sm:$0x3] }
 0x15d   : > { %7552 = vmatprep.subr.bf16.mxu1 %v8227_v1 }
 0x15f   : > { %7361 = vmatpush3.bf16.msra.mxu0 %v8123_v43  ;;  %v8164_v43 = vld [vmem:[%s9590_s1 + $0x140] sm:$0xff]  }
 0x160   : > { %7553 = vmatpush3.bf16.msra.mxu1 %v8124_v44  ;;  %7362 = vmatprep.subr.bf16.mxu0 %v8227_v1  ;;  %v8171_v44 = vld [vmem:[%s8303_s11 + $0xc] ss:$0 sps:$4 sm:$0x77]  }
 0x161   : > { %7554 = vmatprep.subr.bf16.mxu1 %v8227_v1 }
 0x163   : > { %7363 = vmatpush3.bf16.msra.mxu0 %v8125_v45  ;;  %v8165_v45 = vld [vmem:[%s9590_s1 + $0x148] sm:$0xff]  }
 0x164   : > { %7555 = vmatpush3.bf16.msra.mxu1 %v8126_v46  ;;  %7368 = vmatprep.subr.bf16.mxu0 %v8227_v1  ;;  %v8173_v46 = vld [vmem:[%s8303_s11 + $0x10] ss:$0 sps:$4 sm:$0x77]  }
 0x165   : > { %7560 = vmatprep.subr.bf16.mxu1 %v8227_v1  ;;  %v5065_v55 = vshrl.u32 %v8173_v46, 16 }
 0x166   : > { %7365 = vmatmul.mubr.msk.bf16.vlgmr.msra.gmra.mrb[4].mxu0 %vm265_vm1, %v6203_v47  ;;  %v8166_v47 = vld [vmem:[%s9590_s1 + $0x148] sm:$0xff]  }
 0x167   : > { %7369 = vmatpush3.bf16.msra.mxu0 %v8127_v48  ;;  %7557 = vmatmul.mubr.msk.bf16.vlgmr.msra.gmra.mrb[4].mxu1 %vm265_vm1, %v6428_v49  ;;  %v3733_v48 = vshll.u32 %v8171_v44, 16  ;;  %v8167_v49 = vld [vmem:[%s9590_s1 + $0x150] sm:$0xff]  }
 0x168   : > { %7561 = vmatpush3.bf16.msra.mxu1 %v8128_v50  ;;  %7370 = vmatprep.subr.bf16.mxu0 %v8227_v1  ;;  %v5067_v50 = vshll.u32 %v8173_v46, 16  ;;  %v8196_v46 = vld [vmem:[%s9590_s1 + $0x1b0] sm:$0xff]  }
 0x169   : > { %7562 = vmatprep.subr.bf16.mxu1 %v8227_v1  ;;  %7376 = vmatprep.mubr.msk.bf16.mxu0 %vm8228_vm0, %v8227_v1  ;;  %v3735_v53 = vrot.slane %v3733_v48, 1 }
 0x16a   : > { %7568 = vmatprep.mubr.msk.bf16.mxu1 %vm8228_vm0, %v8227_v1 }
 0x16b   : > { %7371 = vmatpush3.bf16.msra.mxu0 %v8129_v52  ;;  %v3731_v52 = vshrl.u32 %v8171_v44, 16 }
 0x16c   : > { %7563 = vmatpush3.bf16.msra.mxu1 %v8130_v54  ;;  %7372 = vmatprep.subr.bf16.mxu0 %v8227_v1  ;;  %v8169_v54 = vld [vmem:[%s9590_s1 + $0x158] sm:$0xff]  }
 0x16d   : > { %7564 = vmatprep.subr.bf16.mxu1 %v8227_v1 }
 0x16f   : > { %7373 = vmatpush3.bf16.msra.mxu0 %v8131_v56  ;;  %v5069_v56 = vrot.slane %v5067_v50, 1 }
 0x170   : > { %7565 = vmatpush3.bf16.msra.mxu1 %v8132_v58  ;;  %7374 = vmatprep.subr.bf16.mxu0 %v8227_v1  ;;  %v3736_v58 = vor.u32 %v3735_v53, %v3731_v52 }
 0x171   : > { %7566 = vmatprep.subr.bf16.mxu1 %v8227_v1  ;;  %v5070_v60 = vor.u32 %v5069_v56, %v5065_v55  ;;  %v8197_v55 = vld [vmem:[%s9590_s1 + $0x1b8] sm:$0xff]  }
 0x173   : > { %7375 = vmatpush3.bf16.msra.mxu0 %v8133_v61  ;;  %v8174_v61 = vld [vmem:[%s9590_s1 + $0x160] sm:$0xff]  }
 0x174   : > { %7567 = vmatpush3.bf16.msra.mxu1 %v8134_v0  ;;  %7380 = vmatprep.subr.bf16.mxu0 %v8227_v1  ;;  %v8183_v0 = vld [vmem:[%s8303_s11 + $0x24] ss:$0 sps:$4 sm:$0x77]  }
 0x175   : > { %7572 = vmatprep.subr.bf16.mxu1 %v8227_v1  ;;  %v5152_v10 = vshrl.u32 %v8183_v0, 16 }
 0x176   : > { %7377 = vmatmul.mubr.msk.bf16.vlgmr.msra.gmra.mrb[4].mxu0 %vm265_vm1, %v3406_v2  ;;  %v8176_v2 = vld [vmem:[%s9590_s1 + $0x168] sm:$0xff]  }
 0x177   : > { %7381 = vmatpush3.bf16.msra.mxu0 %v8136_v3  ;;  %7569 = vmatmul.mubr.msk.bf16.vlgmr.msra.gmra.mrb[4].mxu1 %vm265_vm1, %v4740_v4  ;;  %v3820_v3 = vshll.u32 %v8181_v62, 16  ;;  %v8177_v4 = vld [vmem:[%s9590_s1 + $0x170] sm:$0xff]  }
 0x178   : > { %7573 = vmatpush3.bf16.msra.mxu1 %v8138_v5  ;;  %7382 = vmatprep.subr.bf16.mxu0 %v8227_v1  ;;  %v5154_v5 = vshll.u32 %v8183_v0, 16 }
 0x179   : > { %7574 = vmatprep.subr.bf16.mxu1 %v8227_v1  ;;  %7388 = vmatprep.mubr.msk.bf16.mxu0 %vm8228_vm0, %v8227_v1  ;;  %v3822_v8 = vrot.slane %v3820_v3, 1  ;;  %v8199_v3 = vld [vmem:[%s9590_s1 + $0x1c0] sm:$0xff]  }
 0x17a   : > { %7580 = vmatprep.mubr.msk.bf16.mxu1 %vm8228_vm0, %v8227_v1 }
 0x17b   : > { %7383 = vmatpush3.bf16.msra.mxu0 %v8139_v7  ;;  %v3818_v7 = vshrl.u32 %v8181_v62, 16 }
 0x17c   : > { %7575 = vmatpush3.bf16.msra.mxu1 %v8140_v9  ;;  %7384 = vmatprep.subr.bf16.mxu0 %v8227_v1  ;;  %v8179_v9 = vld [vmem:[%s9590_s1 + $0x178] sm:$0xff]  }
 0x17d   : > { %7576 = vmatprep.subr.bf16.mxu1 %v8227_v1 }
 0x17f   : > { %7385 = vmatpush3.bf16.msra.mxu0 %v8141_v11  ;;  %v5156_v11 = vrot.slane %v5154_v5, 1 }
 0x180   : > { %7577 = vmatpush3.bf16.msra.mxu1 %v8142_v13  ;;  %7386 = vmatprep.subr.bf16.mxu0 %v8227_v1  ;;  %v3823_v13 = vor.u32 %v3822_v8, %v3818_v7  ;;  %v8200_v7 = vld [vmem:[%s9590_s1 + $0x1c0] sm:$0xff]  }
 0x181   : > { %7578 = vmatprep.subr.bf16.mxu1 %v8227_v1  ;;  %v5157_v15 = vor.u32 %v5156_v11, %v5152_v10 }
 0x183   : > { %7387 = vmatpush3.bf16.msra.mxu0 %v8143_v16  ;;  %v8184_v16 = vld [vmem:[%s9590_s1 + $0x180] sm:$0xff]  }
 0x184   : > { %7579 = vmatpush3.bf16.msra.mxu1 %v8144_v19  ;;  %7392 = vmatprep.subr.bf16.mxu0 %v8227_v1  ;;  %v8187_v19 = vld [vmem:[%s9590_s1 + $0x190] sm:$0xff]  }
 0x185   : > { %7584 = vmatprep.subr.bf16.mxu1 %v8227_v1 }
 0x186   : > { %7389 = vmatmul.mubr.msk.bf16.vlgmr.msra.gmra.mrb[4].mxu0 %vm265_vm1, %v3493_v20  ;;  %v8188_v20 = vld [vmem:[%s9590_s1 + $0x190] sm:$0xff]  }
 0x187   : > { %7393 = vmatpush3.bf16.msra.mxu0 %v8146_v21  ;;  %7581 = vmatmul.mubr.msk.bf16.vlgmr.msra.gmra.mrb[4].mxu1 %vm265_vm1, %v4827_v22  ;;  %v8189_v21 = vld [vmem:[%s9590_s1 + $0x198] sm:$0xff]  }
 0x188   : > { %7585 = vmatpush3.bf16.msra.mxu1 %v8148_v23  ;;  %7394 = vmatprep.subr.bf16.mxu0 %v8227_v1  ;;  %v8190_v22 = vld [vmem:[%s9590_s1 + $0x198] sm:$0xff]   ;;  %v6305_v23 = vld [vmem:[%s8303_s11 + $0x34] sm:$0x3] }
 0x189   : > { %7586 = vmatprep.subr.bf16.mxu1 %v8227_v1  ;;  %7400 = vmatprep.mubr.msk.bf16.mxu0 %vm8228_vm0, %v8227_v1 }
 0x18a   : > { %7592 = vmatprep.mubr.msk.bf16.mxu1 %vm8228_vm0, %v8227_v1 }
 0x18b   : > { %7395 = vmatpush3.bf16.msra.mxu0 %v8149_v24  ;;  %v8191_v24 = vld [vmem:[%s9590_s1 + $0x1a0] sm:$0xff]  }
 0x18c   : > { %7587 = vmatpush3.bf16.msra.mxu1 %v8150_v25  ;;  %7396 = vmatprep.subr.bf16.mxu0 %v8227_v1  ;;  %v6530_v25 = vld [vmem:[%s8303_s11 + $0x38] sm:$0x3] }
 0x18d   : > { %7588 = vmatprep.subr.bf16.mxu1 %v8227_v1 }
 0x18f   : > { %7397 = vmatpush3.bf16.msra.mxu0 %v8151_v26  ;;  %v8192_v26 = vld [vmem:[%s9590_s1 + $0x1a0] sm:$0xff]  }
 0x190   : > { %7589 = vmatpush3.bf16.msra.mxu1 %v8152_v27  ;;  %7398 = vmatprep.subr.bf16.mxu0 %v8227_v1  ;;  %v8193_v27 = vld [vmem:[%s9590_s1 + $0x1a8] sm:$0xff]  }
 0x191   : > { %7590 = vmatprep.subr.bf16.mxu1 %v8227_v1 }
 0x193   : > { %7399 = vmatpush3.bf16.msra.mxu0 %v8153_v28  ;;  %v8194_v28 = vld [vmem:[%s9590_s1 + $0x1a8] sm:$0xff]  }
 0x194   : > { %7591 = vmatpush3.bf16.msra.mxu1 %v8154_v29  ;;  %7404 = vmatprep.subr.bf16.mxu0 %v8227_v1 }
 0x195   : > { %7596 = vmatprep.subr.bf16.mxu1 %v8227_v1 }
 0x196   : > { %7401 = vmatmul.mubr.msk.bf16.vlgmr.msra.gmra.mrb[4].mxu0 %vm265_vm1, %v6247_v30 }
 0x197   : > { %7405 = vmatpush3.bf16.msra.mxu0 %v8155_v31  ;;  %7593 = vmatmul.mubr.msk.bf16.vlgmr.msra.gmra.mrb[4].mxu1 %vm265_vm1, %v6472_v32 }
 0x198   : > { %7597 = vmatpush3.bf16.msra.mxu1 %v8156_v33  ;;  %7406 = vmatprep.subr.bf16.mxu0 %v8227_v1 }
 0x199   : > { %7598 = vmatprep.subr.bf16.mxu1 %v8227_v1  ;;  %7412 = vmatprep.mubr.msk.bf16.mxu0 %vm8228_vm0, %v8227_v1 }
 0x19a   : > { %7604 = vmatprep.mubr.msk.bf16.mxu1 %vm8228_vm0, %v8227_v1 }
 0x19b   : > { %7407 = vmatpush3.bf16.msra.mxu0 %v8157_v34 }
 0x19c   : > { %7599 = vmatpush3.bf16.msra.mxu1 %v8158_v35  ;;  %7408 = vmatprep.subr.bf16.mxu0 %v8227_v1 }
 0x19d   : > { %7600 = vmatprep.subr.bf16.mxu1 %v8227_v1 }
 0x19f   : > { %7409 = vmatpush3.bf16.msra.mxu0 %v8159_v36 }
 0x1a0   : > { %7601 = vmatpush3.bf16.msra.mxu1 %v8160_v37  ;;  %7410 = vmatprep.subr.bf16.mxu0 %v8227_v1 }
 0x1a1   : > { %7602 = vmatprep.subr.bf16.mxu1 %v8227_v1 }
 0x1a3   : > { %7411 = vmatpush3.bf16.msra.mxu0 %v8161_v38 }
 0x1a4   : > { %7603 = vmatpush3.bf16.msra.mxu1 %v8162_v39  ;;  %7416 = vmatprep.subr.bf16.mxu0 %v8227_v1 }
 0x1a5   : > { %7608 = vmatprep.subr.bf16.mxu1 %v8227_v1 }
 0x1a6   : > { %7413 = vmatmul.mubr.msk.bf16.vlgmr.msra.gmra.mrb[4].mxu0 %vm265_vm1, %v6261_v40 }
 0x1a7   : > { %7417 = vmatpush3.bf16.msra.mxu0 %v8163_v41  ;;  %7605 = vmatmul.mubr.msk.bf16.vlgmr.msra.gmra.mrb[4].mxu1 %vm265_vm1, %v6486_v42  ;;  %v8195_v41 = vld [vmem:[%s9590_s1 + $0x1b0] sm:$0xff]  }
 0x1a8   : > { %7609 = vmatpush3.bf16.msra.mxu1 %v8164_v43  ;;  %7418 = vmatprep.subr.bf16.mxu0 %v8227_v1 }
 0x1a9   : > { %7610 = vmatprep.subr.bf16.mxu1 %v8227_v1  ;;  %7424 = vmatprep.mubr.msk.bf16.mxu0 %vm8228_vm0, %v8227_v1 }
 0x1aa   : > { %7616 = vmatprep.mubr.msk.bf16.mxu1 %vm8228_vm0, %v8227_v1 }
 0x1ab   : > { %7419 = vmatpush3.bf16.msra.mxu0 %v8165_v45 }
 0x1ac   : > { %7611 = vmatpush3.bf16.msra.mxu1 %v8166_v47  ;;  %7420 = vmatprep.subr.bf16.mxu0 %v8227_v1 }
 0x1ad   : > { %7612 = vmatprep.subr.bf16.mxu1 %v8227_v1 }
 0x1af   : > { %7421 = vmatpush3.bf16.msra.mxu0 %v8167_v49 }
 0x1b0   : > { %7613 = vmatpush3.bf16.msra.mxu1 %v8168_v51  ;;  %7422 = vmatprep.subr.bf16.mxu0 %v8227_v1 }
 0x1b1   : > { %7614 = vmatprep.subr.bf16.mxu1 %v8227_v1 }
 0x1b3   : > { %7423 = vmatpush3.bf16.msra.mxu0 %v8169_v54 }
 0x1b4   : > { %7615 = vmatpush3.bf16.msra.mxu1 %v8170_v57  ;;  %7428 = vmatprep.subr.bf16.mxu0 %v8227_v1 }
 0x1b5   : > { %7620 = vmatprep.subr.bf16.mxu1 %v8227_v1 }
 0x1b6   : > { %7425 = vmatmul.mubr.msk.bf16.vlgmr.msra.gmra.mrb[4].mxu0 %vm265_vm1, %v3736_v58  ;;  %v8198_v58 = vld [vmem:[%s9590_s1 + $0x1b8] sm:$0xff]  }
 0x1b7   : > { %7429 = vmatpush3.bf16.msra.mxu0 %v8172_v59  ;;  %7617 = vmatmul.mubr.msk.bf16.vlgmr.msra.gmra.mrb[4].mxu1 %vm265_vm1, %v5070_v60 }
 0x1b8   : > { %7621 = vmatpush3.bf16.msra.mxu1 %v8174_v61  ;;  %7430 = vmatprep.subr.bf16.mxu0 %v8227_v1 }
 0x1b9   : > { %7622 = vmatprep.subr.bf16.mxu1 %v8227_v1  ;;  %7436 = vmatprep.mubr.msk.bf16.mxu0 %vm8228_vm0, %v8227_v1 }
 0x1ba   : > { %7628 = vmatprep.mubr.msk.bf16.mxu1 %vm8228_vm0, %v8227_v1 }
 0x1bb   : > { %7431 = vmatpush3.bf16.msra.mxu0 %v8175_v63 }
 0x1bc   : > { %7623 = vmatpush3.bf16.msra.mxu1 %v8176_v2  ;;  %7432 = vmatprep.subr.bf16.mxu0 %v8227_v1  ;;  %v6319_v2 = vld [vmem:[%s8303_s11 + $0x48] sm:$0x3] }
 0x1bd   : > { %7624 = vmatprep.subr.bf16.mxu1 %v8227_v1 }
 0x1bf   : > { %7433 = vmatpush3.bf16.msra.mxu0 %v8177_v4 }
 0x1c0   : > { %7625 = vmatpush3.bf16.msra.mxu1 %v8178_v6  ;;  %7434 = vmatprep.subr.bf16.mxu0 %v8227_v1  ;;  %v6544_v6 = vld [vmem:[%s8303_s11 + $0x4c] sm:$0x3] }
 0x1c1   : > { %7626 = vmatprep.subr.bf16.mxu1 %v8227_v1 }
 0x1c3   : > { %7435 = vmatpush3.bf16.msra.mxu0 %v8179_v9 }
 0x1c4   : > { %7627 = vmatpush3.bf16.msra.mxu1 %v8180_v12  ;;  %7440 = vmatprep.subr.bf16.mxu0 %v8227_v1  ;;  %v8207_v12 = vld [vmem:[%s8303_s11 + $0x34] ss:$0 sps:$4 sm:$0x77]  }
 0x1c5   : > { %7632 = vmatprep.subr.bf16.mxu1 %v8227_v1 }
 0x1c6   : > { %7437 = vmatmul.mubr.msk.bf16.vlgmr.msra.gmra.mrb[4].mxu0 %vm265_vm1, %v3823_v13 }
 0x1c7   : > { %7441 = vmatpush3.bf16.msra.mxu0 %v8182_v14  ;;  %7629 = vmatmul.mubr.msk.bf16.vlgmr.msra.gmra.mrb[4].mxu1 %vm265_vm1, %v5157_v15  ;;  %v8201_v14 = vld [vmem:[%s9590_s1 + $0x1c8] sm:$0xff]   ;;  %v8209_v15 = vld [vmem:[%s8303_s11 + $0x38] ss:$0 sps:$4 sm:$0x77]  }
 0x1c8   : > { %7633 = vmatpush3.bf16.msra.mxu1 %v8184_v16  ;;  %7442 = vmatprep.subr.bf16.mxu0 %v8227_v1 }
 0x1c9   : > { %7634 = vmatprep.subr.bf16.mxu1 %v8227_v1  ;;  %7448 = vmatprep.mubr.msk.bf16.mxu0 %vm8228_vm0, %v8227_v1 }
 0x1ca   : > { %7640 = vmatprep.mubr.msk.bf16.mxu1 %vm8228_vm0, %v8227_v1 }
 0x1cb   : > { %7443 = vmatpush3.bf16.msra.mxu0 %v8185_v17 }
 0x1cc   : > { %7635 = vmatpush3.bf16.msra.mxu1 %v8186_v18  ;;  %7444 = vmatprep.subr.bf16.mxu0 %v8227_v1  ;;  %v8202_v18 = vld [vmem:[%s9590_s1 + $0x1c8] sm:$0xff]  }
 0x1cd   : > { %7636 = vmatprep.subr.bf16.mxu1 %v8227_v1 }
 0x1cf   : > { %7445 = vmatpush3.bf16.msra.mxu0 %v8187_v19 }
 0x1d0   : > { %7637 = vmatpush3.bf16.msra.mxu1 %v8188_v20  ;;  %7446 = vmatprep.subr.bf16.mxu0 %v8227_v1  ;;  %v4063_v20 = vshll.u32 %v8207_v12, 16 }
 0x1d1   : > { %7638 = vmatprep.subr.bf16.mxu1 %v8227_v1 }
 0x1d3   : > { %7447 = vmatpush3.bf16.msra.mxu0 %v8189_v21  ;;  %v8203_v21 = vld [vmem:[%s9590_s1 + $0x1d0] sm:$0xff]  }
 0x1d4   : > { %7639 = vmatpush3.bf16.msra.mxu1 %v8190_v22  ;;  %7452 = vmatprep.subr.bf16.mxu0 %v8227_v1  ;;  %v5397_v22 = vshll.u32 %v8209_v15, 16 }
 0x1d5   : > { %7644 = vmatprep.subr.bf16.mxu1 %v8227_v1 }
 0x1d6   : > { %7449 = vmatmul.mubr.msk.bf16.vlgmr.msra.gmra.mrb[4].mxu0 %vm265_vm1, %v6305_v23  ;;  %v8204_v23 = vld [vmem:[%s9590_s1 + $0x1d0] sm:$0xff]  }
 0x1d7   : > { %7453 = vmatpush3.bf16.msra.mxu0 %v8191_v24  ;;  %7641 = vmatmul.mubr.msk.bf16.vlgmr.msra.gmra.mrb[4].mxu1 %vm265_vm1, %v6530_v25  ;;  %v4061_v24 = vshrl.u32 %v8207_v12, 16  ;;  %v4065_v25 = vrot.slane %v4063_v20, 1 }
 0x1d8   : > { %7645 = vmatpush3.bf16.msra.mxu1 %v8192_v26  ;;  %7454 = vmatprep.subr.bf16.mxu0 %v8227_v1  ;;  %v8205_v26 = vld [vmem:[%s9590_s1 + $0x1d8] sm:$0xff]  }
 0x1d9   : > { %v1547_v29 = vpop.f32.mrb[0].mxu0  ;;  %7646 = vmatprep.subr.bf16.mxu1 %v8227_v1  ;;  %7460 = vmatprep.mubr.msk.bf16.mxu0 %vm8228_vm0, %v8227_v1 }
 0x1da   : > { %v1554_v30 = vpack.c.bf16 %v1547_v29, %v1547_v29  ;;  %v1557_v31 = vsel %vm1556_vm2, %v1547_v29, 0.0  ;;  %v1565_v32 = vmul.f32 %v1547_v29, %v1547_v29  ;;  %v2881_v33 = vpop.f32.mrb[0].mxu1  ;;  %v7102_v34 = vpop.f32.mrb[1].mxu0  ;;  %7652 = vmatprep.mubr.msk.bf16.mxu1 %vm8228_vm0, %v8227_v1  ;;  %v8206_v29 = vld [vmem:[%s9590_s1 + $0x1d8] sm:$0xff]  }
 0x1db   : > { %v1558_v35 = vrot.slane %v1557_v31, 4  ;;  %v2888_v36 = vpack.c.bf16 %v2881_v33, %v2881_v33  ;;  %v2891_v37 = vsel %vm1556_vm2, %v2881_v33, 0.0  ;;  %v2899_v38 = vmul.f32 %v2881_v33, %v2881_v33  ;;  %v7294_v39 = vpop.f32.mrb[1].mxu1  ;;  %v1550_v40 = vpop.f32.mrb[2].mxu0  ;;  %7455 = vmatpush3.bf16.msra.mxu0 %v8193_v27  ;;  %v8210_v33 = vld [vmem:[%s9590_s1 + $0x1e0] sm:$0xff]  }
 0x1dc   : > { %1555 = vst [vmem:[%s9453_s10] sm:$0x3] %v1554_v30  ;;  %v1566_v42 = vsel %vm1556_vm2, %v1565_v32, 0.0  ;;  %v2892_v43 = vrot.slane %v2891_v37, 4  ;;  %v2884_v44 = vpop.f32.mrb[2].mxu1  ;;  %7647 = vmatpush3.bf16.msra.mxu1 %v8194_v28  ;;  %v7103_v45 = vpop.f32.mrb[3].mxu0  ;;  %7456 = vmatprep.subr.bf16.mxu0 %v8227_v1  ;;  %v5395_v27 = vshrl.u32 %v8209_v15, 16  ;;  %v4066_v30 = vor.u32 %v4065_v25, %v4061_v24 }
 0x1dd   : > { %v1559_v47 = vadd.f32 %v1558_v35, %v1557_v31  ;;  %v1567_v48 = vrot.slane %v1566_v42, 4  ;;  %6138 = vst [vmem:[%s9453_s10 + $0x2] sm:$0x3] %v2888_v36  ;;  %v2900_v49 = vsel %vm1556_vm2, %v2899_v38, 0.0  ;;  %v7295_v50 = vpop.f32.mrb[3].mxu1  ;;  %7648 = vmatprep.subr.bf16.mxu1 %v8227_v1  ;;  %v5399_v28 = vrot.slane %v5397_v22, 1 }
 0x1de   : > { %v2893_v51 = vadd.f32 %v2892_v43, %v2891_v37  ;;  %v2901_v52 = vrot.slane %v2900_v49, 4  ;;  %v8208_v31 = vld [vmem:[%s9590_s1 + $0x1e0] sm:$0xff]   ;;  %v8217_v34 = vld [vmem:[%s8303_s11 + $0x48] ss:$0 sps:$4 sm:$0x77]   ;;  %v8213_v39 = vld [vmem:[%s9590_s1 + $0x1f0] sm:$0xff]  }
 0x1df   : > { %v1560_v53 = vrot.slane %v1559_v47, 2  ;;  %v1568_v54 = vadd.f32 %v1567_v48, %v1566_v42  ;;  %7457 = vmatpush3.bf16.msra.mxu0 %v8195_v41  ;;  %v5400_v32 = vor.u32 %v5399_v28, %v5395_v27  ;;  %v8211_v35 = vld [vmem:[%s9590_s1 + $0x1e8] sm:$0xff]   ;;  %v4150_v38 = vshll.u32 %v8217_v34, 16  ;;  %v8214_v41 = vld [vmem:[%s9590_s1 + $0x1f0] sm:$0xff]   ;;  %v8215_v44 = vld [vmem:[%s9590_s1 + $0x1f8] sm:$0xff]  }
 0x1e0   : > { %v2894_v56 = vrot.slane %v2893_v51, 2  ;;  %v2902_v57 = vadd.f32 %v2901_v52, %v2900_v49  ;;  %7649 = vmatpush3.bf16.msra.mxu1 %v8196_v46  ;;  %7458 = vmatprep.subr.bf16.mxu0 %v8227_v1  ;;  %v8218_v36 = vld [vmem:[%s8303_s11 + $0x4c] ss:$0 sps:$4 sm:$0x77]   ;;  %v4148_v42 = vshrl.u32 %v8217_v34, 16 }
 0x1e1   : > { %v1561_v59 = vadd.f32 %v1560_v53, %v1559_v47  ;;  %v1569_v60 = vrot.slane %v1568_v54, 2  ;;  %7650 = vmatprep.subr.bf16.mxu1 %v8227_v1  ;;  %v8212_v37 = vld [vmem:[%s9590_s1 + $0x1e8] sm:$0xff]   ;;  %v5484_v40 = vshll.u32 %v8218_v36, 16  ;;  %v4152_v43 = vrot.slane %v4150_v38, 1  ;;  %v8216_v47 = vld [vmem:[%s9590_s1 + $0x1f8] sm:$0xff]  }
 0x1e2   : > { %v2895_v61 = vadd.f32 %v2894_v56, %v2893_v51  ;;  %v2903_v62 = vrot.slane %v2902_v57, 2  ;;  %v5482_v45 = vshrl.u32 %v8218_v36, 16 }
 0x1e3   : > { %v1562_v63 = vrot.slane %v1561_v59, 1  ;;  %v1570_v0 = vadd.f32 %v1569_v60, %v1568_v54  ;;  %7459 = vmatpush3.bf16.msra.mxu0 %v8197_v55  ;;  %v5486_v46 = vrot.slane %v5484_v40, 1  ;;  %v4153_v48 = vor.u32 %v4152_v43, %v4148_v42 }
 0x1e4   : > { %v2896_v4 = vrot.slane %v2895_v61, 1  ;;  %v2904_v5 = vadd.f32 %v2903_v62, %v2902_v57  ;;  %7651 = vmatpush3.bf16.msra.mxu1 %v8198_v58  ;;  %7464 = vmatprep.subr.bf16.mxu0 %v8227_v1 }
 0x1e5   : > { %v1563_v8 = vadd.f32 %v1562_v63, %v1561_v59  ;;  %v1571_v9 = vrot.slane %v1570_v0, 1  ;;  %7656 = vmatprep.subr.bf16.mxu1 %v8227_v1  ;;  %v5487_v49 = vor.u32 %v5486_v46, %v5482_v45 }
 0x1e6   : > { %v2897_v10 = vadd.f32 %v2896_v4, %v2895_v61  ;;  %v2905_v11 = vrot.slane %v2904_v5, 1  ;;  %7461 = vmatmul.mubr.msk.bf16.vlgmr.msra.gmra.mrb[4].mxu0 %vm265_vm1, %v6319_v2 }
 0x1e7   : > { %v1572_v13 = vadd.f32 %v1571_v9, %v1570_v0  ;;  %7465 = vmatpush3.bf16.msra.mxu0 %v8199_v3  ;;  %7653 = vmatmul.mubr.msk.bf16.vlgmr.msra.gmra.mrb[4].mxu1 %vm265_vm1, %v6544_v6 }
 0x1e8   : > { %v9499_v16 = vadd.f32 %v2897_v10, %v1563_v8  ;;  %v2906_v17 = vadd.f32 %v2905_v11, %v2904_v5  ;;  %7657 = vmatpush3.bf16.msra.mxu1 %v8200_v7  ;;  %7466 = vmatprep.subr.bf16.mxu0 %v8227_v1 }
 0x1e9   : > { %7658 = vmatprep.subr.bf16.mxu1 %v8227_v1  ;;  %7472 = vmatprep.mubr.msk.bf16.mxu0 %vm8228_vm0, %v8227_v1 }
 0x1ea   : > { %v9508_v19 = vadd.f32 %v2906_v17, %v1572_v13  ;;  %7664 = vmatprep.mubr.msk.bf16.mxu1 %vm8228_vm0, %v8227_v1 }
 0x1eb   : > { %7467 = vmatpush3.bf16.msra.mxu0 %v8201_v14 }
 0x1ec   : > { %7659 = vmatpush3.bf16.msra.mxu1 %v8202_v18  ;;  %7468 = vmatprep.subr.bf16.mxu0 %v8227_v1 }
 0x1ed   : > { %7660 = vmatprep.subr.bf16.mxu1 %v8227_v1 }
 0x1ef   : > { %7469 = vmatpush3.bf16.msra.mxu0 %v8203_v21 }
 0x1f0   : > { %7661 = vmatpush3.bf16.msra.mxu1 %v8204_v23  ;;  %7470 = vmatprep.subr.bf16.mxu0 %v8227_v1 }
 0x1f1   : > { %7662 = vmatprep.subr.bf16.mxu1 %v8227_v1 }
 0x1f3   : > { %7471 = vmatpush3.bf16.msra.mxu0 %v8205_v26 }
 0x1f4   : > { %7663 = vmatpush3.bf16.msra.mxu1 %v8206_v29  ;;  %7476 = vmatprep.subr.bf16.mxu0 %v8227_v1 }
 0x1f5   : > { %7668 = vmatprep.subr.bf16.mxu1 %v8227_v1 }
 0x1f6   : > { %7473 = vmatmul.mubr.msk.bf16.vlgmr.msra.gmra.mrb[4].mxu0 %vm265_vm1, %v4066_v30 }
 0x1f7   : > { %7477 = vmatpush3.bf16.msra.mxu0 %v8208_v31  ;;  %7665 = vmatmul.mubr.msk.bf16.vlgmr.msra.gmra.mrb[4].mxu1 %vm265_vm1, %v5400_v32 }
 0x1f8   : > { %7669 = vmatpush3.bf16.msra.mxu1 %v8210_v33  ;;  %7478 = vmatprep.subr.bf16.mxu0 %v8227_v1 }
 0x1f9   : > { %7670 = vmatprep.subr.bf16.mxu1 %v8227_v1  ;;  %7484 = vmatprep.mubr.msk.bf16.mxu0 %vm8228_vm0, %v8227_v1 }
 0x1fa   : > { %7676 = vmatprep.mubr.msk.bf16.mxu1 %vm8228_vm0, %v8227_v1 }
 0x1fb   : > { %7479 = vmatpush3.bf16.msra.mxu0 %v8211_v35 }
 0x1fc   : > { %7671 = vmatpush3.bf16.msra.mxu1 %v8212_v37  ;;  %7480 = vmatprep.subr.bf16.mxu0 %v8227_v1 }
 0x1fd   : > { %7672 = vmatprep.subr.bf16.mxu1 %v8227_v1 }
 0x1ff   : > { %7481 = vmatpush3.bf16.msra.mxu0 %v8213_v39 }
 0x200   : > { %7673 = vmatpush3.bf16.msra.mxu1 %v8214_v41  ;;  %7482 = vmatprep.subr.bf16.mxu0 %v8227_v1 }
 0x201   : > { %7674 = vmatprep.subr.bf16.mxu1 %v8227_v1 }
 0x203   : > { %7483 = vmatpush3.bf16.msra.mxu0 %v8215_v44 }
 0x204   : > { %7675 = vmatpush3.bf16.msra.mxu1 %v8216_v47 }
 0x206   : > { %7485 = vmatmul.mubr.msk.bf16.vlgmr.msra.gmra.mrb[4].mxu0 %vm265_vm1, %v4153_v48 }
 0x207   : > { %7677 = vmatmul.mubr.msk.bf16.vlgmr.msra.gmra.mrb[4].mxu1 %vm265_vm1, %v5487_v49 }
 0x2d9   : > { %v4215_v50 = vpop.f32.mrb[4].mxu0 }
 0x2da   : > { %v4222_v51 = vpack.c.bf16 %v4215_v50, %v4215_v50  ;;  %v4225_v52 = vsel %vm1556_vm2, %v4215_v50, 0.0  ;;  %v4233_v53 = vmul.f32 %v4215_v50, %v4215_v50  ;;  %v5549_v54 = vpop.f32.mrb[4].mxu1  ;;  %v7486_v55 = vpop.f32.mrb[5].mxu0 }
 0x2db   : > { %v4226_v56 = vrot.slane %v4225_v52, 4  ;;  %v5556_v57 = vpack.c.bf16 %v5549_v54, %v5549_v54  ;;  %v5559_v1 = vsel %vm1556_vm2, %v5549_v54, 0.0  ;;  %v5567_v58 = vmul.f32 %v5549_v54, %v5549_v54  ;;  %v7678_v59 = vpop.f32.mrb[5].mxu1  ;;  %v4218_v60 = vpop.f32.mrb[6].mxu0 }
 0x2dc   : > { %6363 = vst [vmem:[%s9453_s10 + $0x4] sm:$0x3] %v4222_v51  ;;  %v4234_v61 = vsel %vm1556_vm2, %v4233_v53, 0.0  ;;  %v5560_v62 = vrot.slane %v5559_v1, 4  ;;  %v5552_v63 = vpop.f32.mrb[6].mxu1  ;;  %v7487_v0 = vpop.f32.mrb[7].mxu0 }
 0x2dd   : > { %v4227_v2 = vadd.f32 %v4226_v56, %v4225_v52  ;;  %v4235_v3 = vrot.slane %v4234_v61, 4  ;;  %6588 = vst [vmem:[%s9453_s10 + $0x6] sm:$0x3] %v5556_v57  ;;  %v5568_v4 = vsel %vm1556_vm2, %v5567_v58, 0.0  ;;  %v7679_v5 = vpop.f32.mrb[7].mxu1 }
 0x2de   : > { %v5561_v6 = vadd.f32 %v5560_v62, %v5559_v1  ;;  %v5569_v7 = vrot.slane %v5568_v4, 4 }
 0x2df   : > { %v4228_v8 = vrot.slane %v4227_v2, 2  ;;  %v4236_v9 = vadd.f32 %v4235_v3, %v4234_v61 }
 0x2e0   : > { %v5562_v10 = vrot.slane %v5561_v6, 2  ;;  %v5570_v11 = vadd.f32 %v5569_v7, %v5568_v4 }
 0x2e1   : > { %v4229_v12 = vadd.f32 %v4228_v8, %v4227_v2  ;;  %v4237_v13 = vrot.slane %v4236_v9, 2 }
 0x2e2   : > { %v5563_v14 = vadd.f32 %v5562_v10, %v5561_v6  ;;  %v5571_v15 = vrot.slane %v5570_v11, 2 }
 0x2e3   : > { %v4230_v17 = vrot.slane %v4229_v12, 1  ;;  %v4238_v18 = vadd.f32 %v4237_v13, %v4236_v9 }
 0x2e4   : > { %v5564_v20 = vrot.slane %v5563_v14, 1  ;;  %v5572_v21 = vadd.f32 %v5571_v15, %v5570_v11 }
 0x2e5   : > { %v4231_v22 = vadd.f32 %v4230_v17, %v4229_v12  ;;  %v4239_v23 = vrot.slane %v4238_v18, 1 }
 0x2e6   : > { %v5573_v24 = vrot.slane %v5572_v21, 1  ;;  %v5565_v27 = vadd.f32 %v5564_v20, %v5563_v14 }
 0x2e7   : > { %v4232_v25 = vadd.f32 %v4231_v22, %v9499_v16  ;;  %v4240_v26 = vadd.f32 %v4239_v23, %v4238_v18 }
 0x2e8   : > { %v5574_v30 = vadd.f32 %v5573_v24, %v5572_v21 }
 0x2e9   : > { %v4241_v28 = vadd.f32 %v4240_v26, %v9508_v19  ;;  %v5566_v29 = vadd.f32 %v5565_v27, %v4232_v25 }
 0x2eb   : > { %v5575_v31 = vadd.f32 %v5574_v30, %v4241_v28  ;;  %5576 = vst [vmem:[%s216_s6] sm:$0x1] %v5566_v29 }
 0x2ed   : > { %5577 = vst [vmem:[%s219_s9] sm:$0x1] %v5575_v31 }
 0x2ee PF: > { %s15_s15 = sadd.s32 1, %s8225_s15  }
 0x2ef   : > { %p12_p5 = scmp.ge.s32.totalorder %s15_s15, 4  }
 0x2f1   :  { %14 = sbr.rel (!%p12_p5) target bundleno = 1 (0x1), region = 119 }

// kernel: rednet_forward.11
= control target key start
LH: loop header
LB: loop body
LE: loop exit
PB: predicated region body
PF: predicated region fallthrough
CT: control target
= control target key end

     0   :  { %v442_v3 = vmov 0.0   ;;  %vm323_vm0 = vcmask 523264   ;;  %s737_s1 = inlined_call_operand.vmem [shape: f32[128,256], index: 1, kind: input, shape index: {}]   ;;  %s738_s4 = inlined_call_operand.vmem [shape: f32[256,64], index: 4, kind: input, shape index: {}]   ;;  %s739_s0 = inlined_call_operand.vmem [shape: f32[32,128], index: 0, kind: input, shape index: {}]   ;;  %s740_s2 = inlined_call_operand.vmem [shape: f32[1,256], index: 2, kind: input, shape index: {}]   ;;  %s741_s3 = inlined_call_operand.vmem [shape: bf16[32,256], index: 3, kind: input, shape index: {}]   ;;  %s742_s5 = inlined_call_operand.vmem [shape: f32[1,64], index: 5, kind: input, shape index: {}]   ;;  %s743_s6 = inlined_call_operand.vmem [shape: f32[32,64], index: 6, kind: input, shape index: {}]   ;;  %s744_s7 = inlined_call_operand.vmem [shape: f32[32,64], index: 7, kind: output, shape index: {}]  }
   0x1   :  { %v31_v0 = vld [vmem:[%s737_s1 + $0x8] sm:$0xff]  ;;  %v33_v1 = vld [vmem:[%s737_s1 + $0x18] sm:$0xff]  ;;  %v30_v2 = vld [vmem:[%s737_s1] sm:$0xff]  ;;  %138 = vmatprep.mubr.f32.mxu0 %v442_v3 }
   0x2   :  { %v377_v4 = vpack.c.bf16 %v33_v1, %v31_v0  ;;  %v32_v5 = vld [vmem:[%s737_s1 + $0x10] sm:$0xff]  ;;  %v35_v6 = vld [vmem:[%s737_s1 + $0x28] sm:$0xff]  ;;  %v37_v7 = vld [vmem:[%s737_s1 + $0x38] sm:$0xff] }
   0x3   :  { %v379_v8 = vpack.c.bf16 %v32_v5, %v30_v2  ;;  %v381_v9 = vpack.c.bf16 %v37_v7, %v35_v6  ;;  %v34_v10 = vld [vmem:[%s737_s1 + $0x20] sm:$0xff]  ;;  %v36_v11 = vld [vmem:[%s737_s1 + $0x30] sm:$0xff]  ;;  %v39_v12 = vld [vmem:[%s737_s1 + $0x48] sm:$0xff] }
   0x4   :  { %378 = vmatprep.subr.bf16.mxu0 %v377_v4  ;;  %v41_v13 = vld [vmem:[%s737_s1 + $0x58] sm:$0xff]  ;;  %v383_v14 = vpack.c.bf16 %v36_v11, %v34_v10  ;;  %v38_v16 = vld [vmem:[%s737_s1 + $0x40] sm:$0xff]  ;;  %v40_v17 = vld [vmem:[%s737_s1 + $0x50] sm:$0xff] }
   0x5   :  { %380 = vmatpush1.bf16.msra.mxu0 %v379_v8  ;;  %v385_v15 = vpack.c.bf16 %v41_v13, %v39_v12  ;;  %v43_v18 = vld [vmem:[%s737_s1 + $0x68] sm:$0xff]  ;;  %v45_v19 = vld [vmem:[%s737_s1 + $0x78] sm:$0xff]  ;;  %v387_v20 = vpack.c.bf16 %v40_v17, %v38_v16  ;;  %v42_v22 = vld [vmem:[%s737_s1 + $0x60] sm:$0xff] }
   0x6   :  { %382 = vmatprep.subr.bf16.mxu0 %v381_v9  ;;  %v389_v21 = vpack.c.bf16 %v45_v19, %v43_v18  ;;  %v44_v23 = vld [vmem:[%s737_s1 + $0x70] sm:$0xff]  ;;  %v47_v24 = vld [vmem:[%s737_s1 + $0x88] sm:$0xff]  ;;  %v49_v25 = vld [vmem:[%s737_s1 + $0x98] sm:$0xff] }
   0x7   :  { %v46_v26 = vld [vmem:[%s737_s1 + $0x80] sm:$0xff]  ;;  %v48_v27 = vld [vmem:[%s737_s1 + $0x90] sm:$0xff]  ;;  %v391_v28 = vpack.c.bf16 %v44_v23, %v42_v22  ;;  %v51_v29 = vld [vmem:[%s737_s1 + $0xa8] sm:$0xff]  ;;  %v393_v34 = vpack.c.bf16 %v49_v25, %v47_v24 }
   0x8   :  { %v53_v30 = vld [vmem:[%s737_s1 + $0xb8] sm:$0xff]  ;;  %v207_v31 = vld [vmem:[%s738_s4 + $0x80] sm:$0xff]  ;;  %v208_v32 = vld [vmem:[%s738_s4 + $0x88] sm:$0xff]  ;;  %v395_v45 = vpack.c.bf16 %v48_v27, %v46_v26 }
   0x9   :  { %384 = vmatpush1.bf16.msra.mxu0 %v383_v14  ;;  %v191_v33 = vld [vmem:[%s738_s4] sm:$0xff]  ;;  %v409_v35 = vpack.c.bf16 %v208_v32, %v207_v31  ;;  %v192_v36 = vld [vmem:[%s738_s4 + $0x8] sm:$0xff]  ;;  %v209_v37 = vld [vmem:[%s738_s4 + $0x90] sm:$0xff]  ;;  %v397_v49 = vpack.c.bf16 %v53_v30, %v51_v29 }
   0xa   :  { %386 = vmatprep.subr.bf16.mxu0 %v385_v15  ;;  %v210_v38 = vld [vmem:[%s738_s4 + $0x98] sm:$0xff]  ;;  %v411_v39 = vpack.c.bf16 %v192_v36, %v191_v33  ;;  %v193_v41 = vld [vmem:[%s738_s4 + $0x10] sm:$0xff]  ;;  %v211_v43 = vld [vmem:[%s738_s4 + $0xa0] sm:$0xff] }
   0xb   :  { %v413_v40 = vpack.c.bf16 %v210_v38, %v209_v37  ;;  %v194_v42 = vld [vmem:[%s738_s4 + $0x18] sm:$0xff]  ;;  %410 = vmatprep.subr.bf16.mxu1 %v409_v35  ;;  %v212_v44 = vld [vmem:[%s738_s4 + $0xa8] sm:$0xff]  ;;  %v50_v46 = vld [vmem:[%s737_s1 + $0xa0] sm:$0xff]  ;;  %v64_v37 = vlaneseq }
   0xc   :  { %v52_v47 = vld [vmem:[%s737_s1 + $0xb0] sm:$0xff]  ;;  %412 = vmatpush3.bf16.msra.mxu1 %v411_v39  ;;  %v415_v48 = vpack.c.bf16 %v194_v42, %v193_v41  ;;  %v55_v50 = vld [vmem:[%s737_s1 + $0xc8] sm:$0xff]  ;;  %v417_v51 = vpack.c.bf16 %v212_v44, %v211_v43  ;;  %v195_v52 = vld [vmem:[%s738_s4 + $0x20] sm:$0xff] }
   0xd   :  { %388 = vmatpush1.bf16.msra.mxu0 %v387_v20  ;;  %414 = vmatprep.subr.bf16.mxu1 %v413_v40  ;;  %v196_v53 = vld [vmem:[%s738_s4 + $0x28] sm:$0xff]  ;;  %v57_v54 = vld [vmem:[%s737_s1 + $0xd8] sm:$0xff]  ;;  %v213_v55 = vld [vmem:[%s738_s4 + $0xb0] sm:$0xff]  ;;  %v399_v57 = vpack.c.bf16 %v52_v47, %v50_v46  ;;  %v65_v38 = vshrl.u32 %v64_v37, 7 }
   0xe   :  { %390 = vmatprep.subr.bf16.mxu0 %v389_v21  ;;  %v214_v56 = vld [vmem:[%s738_s4 + $0xb8] sm:$0xff]  ;;  %v54_v58 = vld [vmem:[%s737_s1 + $0xc0] sm:$0xff]  ;;  %v56_v59 = vld [vmem:[%s737_s1 + $0xd0] sm:$0xff]  ;;  %v419_v60 = vpack.c.bf16 %v196_v53, %v195_v52  ;;  %v401_v61 = vpack.c.bf16 %v57_v54, %v55_v50 }
   0xf   :  { %v59_v62 = vld [vmem:[%s737_s1 + $0xe8] sm:$0xff]  ;;  %v421_v63 = vpack.c.bf16 %v214_v56, %v213_v55  ;;  %v197_v0 = vld [vmem:[%s738_s4 + $0x30] sm:$0xff]  ;;  %v198_v1 = vld [vmem:[%s738_s4 + $0x38] sm:$0xff]  ;;  %v403_v6 = vpack.c.bf16 %v56_v59, %v54_v58  ;;  %v66_v39 = vsub.s32 0, %v65_v38  ;;  %v70_v41 = vsub.s32 1, %v65_v38 }
  0x10   :  { %416 = vmatpush3.bf16.msra.mxu1 %v415_v48  ;;  %v61_v2 = vld [vmem:[%s737_s1 + $0xf8] sm:$0xff]  ;;  %v215_v4 = vld [vmem:[%s738_s4 + $0xc0] sm:$0xff]  ;;  %v216_v5 = vld [vmem:[%s738_s4 + $0xc8] sm:$0xff]  ;;  %v423_v8 = vpack.c.bf16 %v198_v1, %v197_v0 }
  0x11   :  { %392 = vmatpush1.bf16.msra.mxu0 %v391_v28  ;;  %418 = vmatprep.subr.bf16.mxu1 %v417_v51  ;;  %v58_v7 = vld [vmem:[%s737_s1 + $0xe0] sm:$0xff]  ;;  %v405_v9 = vpack.c.bf16 %v61_v2, %v59_v62  ;;  %v60_v10 = vld [vmem:[%s737_s1 + $0xf0] sm:$0xff]  ;;  %v425_v11 = vpack.c.bf16 %v216_v5, %v215_v4  ;;  %v200_v13 = vld [vmem:[%s738_s4 + $0x48] sm:$0xff] }
  0x12   :  { %394 = vmatprep.subr.bf16.mxu0 %v393_v34  ;;  %v199_v12 = vld [vmem:[%s738_s4 + $0x40] sm:$0xff]  ;;  %v217_v14 = vld [vmem:[%s738_s4 + $0xd0] sm:$0xff]  ;;  %v218_v15 = vld [vmem:[%s738_s4 + $0xd8] sm:$0xff]  ;;  %v407_v16 = vpack.c.bf16 %v60_v10, %v58_v7 }
  0x13   :  { %v427_v17 = vpack.c.bf16 %v200_v13, %v199_v12  ;;  %v429_v18 = vpack.c.bf16 %v218_v15, %v217_v14  ;;  %v201_v19 = vld [vmem:[%s738_s4 + $0x50] sm:$0xff]  ;;  %v202_v20 = vld [vmem:[%s738_s4 + $0x58] sm:$0xff]  ;;  %v26_v21 = vld [vmem:[%s739_s0] sm:$0xff] }
  0x14   :  { %420 = vmatpush3.bf16.msra.mxu1 %v419_v60  ;;  %v431_v22 = vpack.c.bf16 %v202_v20, %v201_v19  ;;  %v27_v23 = vld [vmem:[%s739_s0 + $0x8] sm:$0xff]  ;;  %v28_v24 = vld [vmem:[%s739_s0 + $0x10] sm:$0xff]  ;;  %v29_v25 = vld [vmem:[%s739_s0 + $0x18] sm:$0xff] }
  0x15   :  { %396 = vmatpush1.bf16.msra.mxu0 %v395_v45  ;;  %422 = vmatprep.subr.bf16.mxu1 %v421_v63  ;;  %v219_v26 = vld [vmem:[%s738_s4 + $0xe0] sm:$0xff]  ;;  %v220_v27 = vld [vmem:[%s738_s4 + $0xe8] sm:$0xff]  ;;  %v221_v31 = vld [vmem:[%s738_s4 + $0xf0] sm:$0xff] }
  0x16   :  { %398 = vmatprep.subr.bf16.mxu0 %v397_v49  ;;  %v433_v28 = vpack.c.bf16 %v220_v27, %v219_v26  ;;  %v203_v29 = vld [vmem:[%s738_s4 + $0x60] sm:$0xff]  ;;  %v222_v32 = vld [vmem:[%s738_s4 + $0xf8] sm:$0xff]  ;;  %v205_v34 = vld [vmem:[%s738_s4 + $0x70] sm:$0xff] }
  0x17   :  { %v437_v33 = vpack.c.bf16 %v222_v32, %v221_v31  ;;  %v206_v35 = vld [vmem:[%s738_s4 + $0x78] sm:$0xff]  ;;  %v62_v40 = vld [vmem:[%s740_s2] sm:$0x3]  ;;  %v164_v47 = vld [vmem:[%s741_s3 + $0x8] sm:$0xff] }
  0x18   :  { %424 = vmatpush3.bf16.msra.mxu1 %v423_v8  ;;  %v439_v36 = vpack.c.bf16 %v206_v35, %v205_v34  ;;  %v163_v42 = vld [vmem:[%s741_s3] sm:$0xff]  ;;  %v67_v43 = vrot.slane %v62_v40, %v66_v39  ;;  %v71_v44 = vrot.slane %v62_v40, %v70_v41  ;;  %v169_v53 = vunpack.c.l.bf16 %v164_v47  ;;  %v165_v56 = vld [vmem:[%s741_s3 + $0x10] sm:$0xff]  ;;  %v166_v5 = vld [vmem:[%s741_s3 + $0x18] sm:$0xff] }
  0x19   :  { %400 = vmatpush1.bf16.msra.mxu0 %v399_v57  ;;  %426 = vmatprep.subr.bf16.mxu1 %v425_v11  ;;  %v167_v45 = vunpack.c.l.bf16 %v163_v42  ;;  %v168_v48 = vunpack.c.h.bf16 %v163_v42  ;;  %v170_v55 = vunpack.c.h.bf16 %v164_v47  ;;  %v171_v0 = vunpack.c.l.bf16 %v165_v56  ;;  %v332_v26 = vld [vmem:[%s742_s5] ss:$0 sm:$0xff]  ;;  %v316_v34 = vld [vmem:[%s743_s6 + $0x8] sm:$0xff]  ;;  %v317_v40 = vld [vmem:[%s743_s6 + $0x10] sm:$0xff] }
  0x1a   :  { %402 = vmatprep.subr.bf16.mxu0 %v401_v61  ;;  %v172_v4 = vunpack.c.h.bf16 %v165_v56  ;;  %v173_v12 = vunpack.c.l.bf16 %v166_v5  ;;  %v174_v15 = vunpack.c.h.bf16 %v166_v5 }
  0x1c   :  { %428 = vmatpush3.bf16.msra.mxu1 %v427_v17 }
  0x1d   :  { %404 = vmatpush1.bf16.msra.mxu0 %v403_v6  ;;  %430 = vmatprep.subr.bf16.mxu1 %v429_v18 }
  0x1e   :  { %406 = vmatprep.subr.bf16.mxu0 %v405_v9 }
  0x20   :  { %432 = vmatpush3.bf16.msra.mxu1 %v431_v22 }
  0x21   :  { %408 = vmatpush1.bf16.msra.mxu0 %v407_v16  ;;  %434 = vmatprep.subr.bf16.mxu1 %v433_v28 }
  0x24   :  { %139 = vmatmul.mubr.f32.vlgmr.msra.gmra.mrb[0].mxu0 %v26_v21 }
  0x25   :  { %144 = vmatprep.mubr.f32.mxu0 %v442_v3 }
  0x28   :  { %145 = vmatmul.mubr.f32.gmra.mrb[2].mxu0 %v27_v23 }
  0x29   :  { %150 = vmatprep.mubr.f32.mxu0 %v442_v3 }
  0x2c   :  { %151 = vmatmul.mubr.f32.gmra.mrb[4].mxu0 %v28_v24 }
  0x2d   :  { %156 = vmatprep.mubr.f32.mxu0 %v442_v3  ;;  %v204_v3 = vld [vmem:[%s738_s4 + $0x68] sm:$0xff] }
  0x2e   :  { %v435_v30 = vpack.c.bf16 %v204_v3, %v203_v29  ;;  %v315_v29 = vld [vmem:[%s743_s6] sm:$0xff] }
  0x30   :  { %157 = vmatmul.mubr.f32.gmra.mrb[6].mxu0 %v29_v25  ;;  %436 = vmatpush3.bf16.msra.mxu1 %v435_v30 }
  0x31   :  { %438 = vmatprep.subr.bf16.mxu1 %v437_v33 }
  0x34   :  { %440 = vmatpush3.bf16.msra.mxu1 %v439_v36 }
  0xf7   :  { %v140_v46 = vpop.f32.mrb[0].mxu0 }
  0xf8   :  { %v141_v49 = vadd.f32 %v140_v46, %v67_v43  ;;  %v142_v50 = vpop.f32.mrb[1].mxu0  ;;  %v318_v46 = vld [vmem:[%s743_s6 + $0x18] sm:$0xff] }
  0xf9   :  { %v143_v51 = vadd.f32 %v142_v50, %v71_v44 }
  0xfa   :  { %v175_v52 = vadd.f32 %v167_v45, %v141_v49 }
  0xfb   :  { %v146_v54 = vpop.f32.mrb[2].mxu0  ;;  %v176_v57 = vadd.f32 %v168_v48, %v143_v51 }
  0xfc   :  { %v147_v58 = vadd.f32 %v146_v54, %v67_v43  ;;  %v148_v59 = vpop.f32.mrb[3].mxu0  ;;  %v183_v62 = vmax.f32 %v175_v52, 0.0 }
  0xfd   :  { %v149_v60 = vadd.f32 %v148_v59, %v71_v44  ;;  %v184_v61 = vmax.f32 %v176_v57, 0.0 }
  0xfe   :  { %v177_v63 = vadd.f32 %v169_v53, %v147_v58 }
  0xff   :  { %v178_v1 = vadd.f32 %v170_v55, %v149_v60  ;;  %v152_v2 = vpop.f32.mrb[4].mxu0  ;;  %294 = vmatprep.mubr.f32.mxu1 %v184_v61 }
 0x100   :  { %v153_v6 = vadd.f32 %v152_v2, %v67_v43  ;;  %v154_v7 = vpop.f32.mrb[5].mxu0  ;;  %295 = vmatmul.mubr.f32.vlgmr.msra.gmra.mrb[0].mxu1 %v183_v62  ;;  %v185_v10 = vmax.f32 %v177_v63, 0.0 }
 0x101   :  { %v186_v8 = vmax.f32 %v178_v1, 0.0  ;;  %v155_v9 = vadd.f32 %v154_v7, %v71_v44 }
 0x102   :  { %v179_v11 = vadd.f32 %v171_v0, %v153_v6 }
 0x103   :  { %v180_v13 = vadd.f32 %v172_v4, %v155_v9  ;;  %v158_v14 = vpop.f32.mrb[6].mxu0  ;;  %299 = vmatprep.mubr.f32.mxu1 %v186_v8 }
 0x104   :  { %v159_v16 = vadd.f32 %v158_v14, %v67_v43  ;;  %v160_v17 = vpop.f32.mrb[7].mxu0  ;;  %300 = vmatmul.mubr.f32.gmra.mrb[2].mxu1 %v185_v10  ;;  %v187_v20 = vmax.f32 %v179_v11, 0.0 }
 0x105   :  { %v188_v18 = vmax.f32 %v180_v13, 0.0  ;;  %v161_v19 = vadd.f32 %v160_v17, %v71_v44 }
 0x106   :  { %v181_v21 = vadd.f32 %v173_v12, %v159_v16 }
 0x107   :  { %v182_v22 = vadd.f32 %v174_v15, %v161_v19  ;;  %304 = vmatprep.mubr.f32.mxu1 %v188_v18 }
 0x108   :  { %305 = vmatmul.mubr.f32.gmra.mrb[4].mxu1 %v187_v20  ;;  %v189_v24 = vmax.f32 %v181_v21, 0.0 }
 0x109   :  { %v190_v23 = vmax.f32 %v182_v22, 0.0 }
 0x10b   :  { %309 = vmatprep.mubr.f32.mxu1 %v190_v23 }
 0x10c   :  { %310 = vmatmul.mubr.f32.gmra.mrb[6].mxu1 %v189_v24 }
 0x1d3   :  { %v365_v25 = vpop.f32.mrb[0].mxu1 }
 0x1d4   :  { %v366_v27 = vpop.f32.mrb[1].mxu1 }
 0x1d5   :  { %v367_v28 = vadd.f32 %v366_v27, %v365_v25 }
 0x1d7   :  { %v297_v3 = vadd.f32 %v367_v28, %v332_v26  ;;  %v368_v30 = vpop.f32.mrb[2].mxu1 }
 0x1d8   :  { %v369_v31 = vpop.f32.mrb[3].mxu1 }
 0x1d9   :  { %v319_v32 = vadd.f32 %v315_v29, %v297_v3  ;;  %v370_v33 = vadd.f32 %v369_v31, %v368_v30 }
 0x1db   :  { %324 = vst.msk [vmem:[%s744_s7] sm:$0xff] %vm323_vm0, %v319_v32  ;;  %v302_v35 = vadd.f32 %v370_v33, %v332_v26  ;;  %v371_v36 = vpop.f32.mrb[4].mxu1 }
 0x1dc   :  { %v372_v37 = vpop.f32.mrb[5].mxu1 }
 0x1dd   :  { %v320_v38 = vadd.f32 %v316_v34, %v302_v35  ;;  %v373_v39 = vadd.f32 %v372_v37, %v371_v36 }
 0x1df   :  { %325 = vst.msk [vmem:[%s744_s7 + $0x8] sm:$0xff] %vm323_vm0, %v320_v38  ;;  %v307_v41 = vadd.f32 %v373_v39, %v332_v26  ;;  %v374_v42 = vpop.f32.mrb[6].mxu1 }
 0x1e0   :  { %v375_v43 = vpop.f32.mrb[7].mxu1 }
 0x1e1   :  { %v321_v44 = vadd.f32 %v317_v40, %v307_v41  ;;  %v376_v45 = vadd.f32 %v375_v43, %v374_v42 }
 0x1e3   :  { %326 = vst.msk [vmem:[%s744_s7 + $0x10] sm:$0xff] %vm323_vm0, %v321_v44  ;;  %v312_v47 = vadd.f32 %v376_v45, %v332_v26 }
 0x1e5   :  { %v322_v48 = vadd.f32 %v318_v46, %v312_v47 }
 0x1e7   :  { %327 = vst.msk [vmem:[%s744_s7 + $0x18] sm:$0xff] %vm323_vm0, %v322_v48 }

</bundles_post_ra>
